<compile_context>
chip_gen: v5e
topology: v5e:2x2
jax: 0.10.0
libtpu: 0.0.40
codegen_flags: <defaults>
</compile_context>

<pallas_src>
import functools
import math

import jax
import jax.numpy as jnp
from jax import lax
from jax.experimental import pallas as pl
from jax.experimental.pallas import tpu as pltpu


# ----------------------------------------------------------------------------
# Pallas kernel: fused Conv2d(4x4, pad=1) [+ InstanceNorm2d] [+ LeakyReLU]
# ----------------------------------------------------------------------------

def _conv_block_kernel(x_ref, w_ref, b_ref, o_ref, acc_ref, *,
                       tap_info, oh, ow, apply_in, apply_act):
    """Process one image.

    x_ref  : (P, Hq, Wq, Cin)  bf16  phase-stacked, spatially padded input
    w_ref  : (16, Cin, Cout)   bf16  tap-major weights (tap = ki*4 + kj)
    b_ref  : (1, Cout)         f32   bias
    o_ref  : (1, OH, OW, Cout)       output block
    acc_ref: (OH, OW, Cout)    f32   VMEM accumulator scratch
    """
    cout = w_ref.shape[-1]

    def row_body(r, carry):
        # One output row: accumulate the 16 kernel taps as small MXU matmuls.
        acc = jnp.zeros((ow, cout), jnp.float32)
        for tap, (p, dr, dc) in enumerate(tap_info):
            xs = x_ref[p, r + dr, pl.ds(dc, ow), :]          # (OW, Cin) bf16
            acc += jnp.dot(xs, w_ref[tap],
                           preferred_element_type=jnp.float32)
        acc_ref[r] = acc
        return carry

    lax.fori_loop(0, oh, row_body, 0)

    y = acc_ref[...] + b_ref[...].astype(jnp.float32)        # (OH, OW, Cout)

    if apply_in:
        # InstanceNorm2d(affine=False, eps=1e-5), biased variance, per channel.
        mean = jnp.mean(jnp.mean(y, axis=0, keepdims=True), axis=1,
                        keepdims=True)
        yc = y - mean
        var = jnp.mean(jnp.mean(yc * yc, axis=0, keepdims=True), axis=1,
                       keepdims=True)
        y = yc * lax.rsqrt(var + 1e-5)
    if apply_act:
        y = jnp.where(y >= 0.0, y, 0.2 * y)                  # LeakyReLU(0.2)

    o_ref[0] = y.astype(o_ref.dtype)


# ----------------------------------------------------------------------------
# Wrapper: one conv layer == one pallas_call (grid over batch)
# ----------------------------------------------------------------------------

def conv_layer(x, w_hwio, bias, stride, *, apply_in, apply_act, out_dtype):
    """x: (N, H, W, Cin) bf16 NHWC; w_hwio: (4, 4, Cin, Cout) bf16.

    Returns (N, OH, OW, Cout) in out_dtype.
    """
    n, h, wd, cin = x.shape
    kh, kw, _, cout = w_hwio.shape
    pad = (kw - 1) // 2
    oh = (h + 2 * pad - kh) // stride + 1
    ow = (wd + 2 * pad - kw) // stride + 1

    xp = jnp.pad(x, ((0, 0), (pad, pad), (pad, pad), (0, 0)))
    if stride == 1:
        phases = xp[:, None]                                  # (N,1,Hp,Wp,C)
        tap_info = tuple((0, ki, kj)
                         for ki in range(kh) for kj in range(kw))
    elif stride == 2:
        # Space-to-depth: 4 phase images (row/col parity) so every in-kernel
        # access is unit-stride.  Extra zero padding (to even size) is inert.
        hp, wp = h + 2 * pad, wd + 2 * pad
        hp2, wp2 = hp + hp % 2, wp + wp % 2
        xp = jnp.pad(xp, ((0, 0), (0, hp2 - hp), (0, wp2 - wp), (0, 0)))
        xp = xp.reshape(n, hp2 // 2, 2, wp2 // 2, 2, cin)
        phases = xp.transpose(0, 2, 4, 1, 3, 5)               # (N,2,2,Hq,Wq,C)
        phases = phases.reshape(n, 4, hp2 // 2, wp2 // 2, cin)
        tap_info = tuple((2 * (ki % 2) + (kj % 2), ki // 2, kj // 2)
                         for ki in range(kh) for kj in range(kw))
    else:
        raise ValueError("unsupported stride")

    _, p, hq, wq, _ = phases.shape
    phases = phases.reshape(n * p, hq, wq, cin)               # fold (N, P)
    w_taps = w_hwio.reshape(kh * kw, cin, cout)
    b_row = bias.reshape(1, cout).astype(jnp.float32)

    kernel = functools.partial(_conv_block_kernel, tap_info=tap_info,
                               oh=oh, ow=ow, apply_in=apply_in,
                               apply_act=apply_act)

    return pl.pallas_call(
        kernel,
        out_shape=jax.ShapeDtypeStruct((n, oh, ow, cout), out_dtype),
        grid=(n,),
        in_specs=[
            pl.BlockSpec((p, hq, wq, cin), lambda i: (i, 0, 0, 0)),
            pl.BlockSpec((kh * kw, cin, cout), lambda i: (0, 0, 0)),  # resident
            pl.BlockSpec((1, cout), lambda i: (0, 0)),                # resident
        ],
        out_specs=pl.BlockSpec((1, oh, ow, cout), lambda i: (i, 0, 0, 0)),
        scratch_shapes=[pltpu.VMEM((oh, ow, cout), jnp.float32)],
        compiler_params=pltpu.CompilerParams(
            dimension_semantics=("parallel",)),
    )(phases, w_taps, b_row)


# ----------------------------------------------------------------------------
# Parameters & forward pass
# ----------------------------------------------------------------------------

def init_nlayer_discriminator_params(key, input_nc=3, ndf=64, n_layers=3):
    """Deterministic synthetic parameters; mirrors the nn.Sequential layout."""
    kw = 4
    # (cin, cout, stride, use_instance_norm, use_leaky_relu)
    specs = [(input_nc, ndf, 2, False, True)]
    nf_mult = 1
    for nl in range(1, n_layers):
        nf_prev, nf_mult = nf_mult, min(2 ** nl, 8)
        specs.append((ndf * nf_prev, ndf * nf_mult, 2, True, True))
    nf_prev, nf_mult = nf_mult, min(2 ** n_layers, 8)
    specs.append((ndf * nf_prev, ndf * nf_mult, 1, True, True))
    specs.append((ndf * nf_mult, 1, 1, False, False))

    params = []
    for (cin, cout, stride, use_in, use_act) in specs:
        key, k_w, k_b = jax.random.split(key, 3)
        fan_in = cin * kw * kw
        # Stored as (KH, KW, Cin, Cout) — transpose PyTorch (Cout,Cin,KH,KW).
        w = jax.random.normal(k_w, (kw, kw, cin, cout), jnp.float32) \
            * (1.0 / math.sqrt(fan_in))
        b = jax.random.normal(k_b, (cout,), jnp.float32) * 0.01
        params.append(dict(w=w.astype(jnp.bfloat16), b=b, stride=stride,
                           use_in=use_in, use_act=use_act))
    return params


def nlayer_discriminator_forward(x_nchw, params):
    """Forward pass equivalent to NLayerDiscriminator.forward (NCHW in/out)."""
    x = jnp.transpose(x_nchw, (0, 2, 3, 1)).astype(jnp.bfloat16)   # -> NHWC
    last = len(params) - 1
    for i, lp in enumerate(params):
        x = conv_layer(x, lp["w"], lp["b"], lp["stride"],
                       apply_in=lp["use_in"], apply_act=lp["use_act"],
                       out_dtype=jnp.float32 if i == last else jnp.bfloat16)
    return jnp.transpose(x, (0, 3, 1, 2))                          # -> NCHW


def reference_forward(x_nchw, params):
    """Plain-JAX f32 reference (same bf16-valued weights / bf16-rounded input)."""
    x = jnp.transpose(x_nchw, (0, 2, 3, 1)).astype(jnp.bfloat16).astype(
        jnp.float32)
    for lp in params:
        w = lp["w"].astype(jnp.float32)
        y = lax.conv_general_dilated(
            x, w, window_strides=(lp["stride"], lp["stride"]),
            padding=((1, 1), (1, 1)),
            dimension_numbers=("NHWC", "HWIO", "NHWC"))
        y = y + lp["b"].reshape(1, 1, 1, -1)
        if lp["use_in"]:
            m = jnp.mean(y, axis=(1, 2), keepdims=True)
            v = jnp.mean((y - m) ** 2, axis=(1, 2), keepdims=True)
            y = (y - m) * lax.rsqrt(v + 1e-5)
        if lp["use_act"]:
            y = jnp.where(y >= 0.0, y, 0.2 * y)
        x = y
    return jnp.transpose(x, (0, 3, 1, 2))


# ----------------------------------------------------------------------------
# Driver
# ----------------------------------------------------------------------------

if __name__ == "__main__":
    INPUT_NC = 3
    NDF = 16          # small ndf for a fast synthetic test (module default: 64)
    N_LAYERS = 3
    BATCH, H, W = 2, 32, 32

    key = jax.random.PRNGKey(0)
    k_params, k_x = jax.random.split(key)
    params = init_nlayer_discriminator_params(
        k_params, input_nc=INPUT_NC, ndf=NDF, n_layers=N_LAYERS)
    x = jax.random.normal(k_x, (BATCH, INPUT_NC, H, W), jnp.float32)

    fwd = jax.jit(lambda inp: nlayer_discriminator_forward(inp, params))
    out = fwd(x)
    jax.block_until_ready(out)

    # 32 -> 16 -> 8 -> 4 -> 3 -> 2 spatial; final channels = 1
    assert out.shape == (BATCH, 1, 2, 2), out.shape
    assert out.dtype == jnp.float32

    ref = reference_forward(x, params)
    assert bool(jnp.allclose(out, ref, rtol=1e-1, atol=1e-1)), (
        "mismatch vs reference: max abs err "
        f"{float(jnp.max(jnp.abs(out - ref)))}")

    print("KERNEL_OK")
</pallas_src>

<mosaic_0001>
module attributes {stable_mosaic.version = 11 : i64} {
  func.func @_conv_block_kernel(%arg0: i32, %arg1: memref<4x17x17x3xbf16, #tpu.memory_space<vmem>>, %arg2: memref<16x3x16xbf16, #tpu.memory_space<vmem>>, %arg3: memref<1x16xf32, #tpu.memory_space<vmem>>, %arg4: memref<1x16x16x16xbf16, #tpu.memory_space<vmem>>, %arg5: memref<16x16x16xf32, #tpu.memory_space<vmem>>) attributes {dimension_semantics = [#tpu.dimension_semantics<parallel>], iteration_bounds = array<i64: 2>, scalar_prefetch = 0 : i64, scratch_operands = 1 : i64, tpu.core_type = #tpu.core_type<tc>, window_params = [{transform_indices = @transform_0, window_bounds = array<i64: 4, 17, 17, 3>}, {pipeline_mode = #tpu.pipeline_mode<synchronous>, transform_indices = @transform_1, window_bounds = array<i64: 16, 3, 16>}, {pipeline_mode = #tpu.pipeline_mode<synchronous>, transform_indices = @transform_2, window_bounds = array<i64: 1, 16>}, {transform_indices = @transform_3, window_bounds = array<i64: 1, 16, 16, 16>}]} {
    %c0_i32 = arith.constant 0 : i32
    %c16_i32 = arith.constant 16 : i32
    %0 = arith.addi %c0_i32, %c16_i32 : i32
    %c1_i32 = arith.constant 1 : i32
    scf.for %arg6 = %c0_i32 to %0 step %c1_i32  : i32 {
      %cst_10 = arith.constant 0.000000e+00 : f32
      %15 = vector.broadcast %cst_10 : f32 to vector<16x16xf32>
      %c0_i32_11 = arith.constant 0 : i32
      %16 = arith.addi %arg6, %c0_i32_11 : i32
      %c0_12 = arith.constant 0 : index
      %17 = arith.index_cast %16 : i32 to index
      %c0_13 = arith.constant 0 : index
      %c0_14 = arith.constant 0 : index
      %18 = vector.load %arg1[%c0_12, %17, %c0_13, %c0_14] : memref<4x17x17x3xbf16, #tpu.memory_space<vmem>>, vector<1x1x16x3xbf16>
      %19 = vector.shape_cast %18 : vector<1x1x16x3xbf16> to vector<16x3xbf16>
      %c0_15 = arith.constant 0 : index
      %c0_16 = arith.constant 0 : index
      %c0_17 = arith.constant 0 : index
      %20 = vector.load %arg2[%c0_15, %c0_16, %c0_17] : memref<16x3x16xbf16, #tpu.memory_space<vmem>>, vector<1x3x16xbf16>
      %21 = vector.shape_cast %20 : vector<1x3x16xbf16> to vector<3x16xbf16>
      %cst_18 = arith.constant dense<0.000000e+00> : vector<16x16xf32>
      %22 = tpu.matmul %19, %21, %cst_18 {dimension_numbers = #tpu.dot_dimension_numbers<[1], [0], [0], [1], [0, 0, 1, 1], [], []>} : vector<16x3xbf16>, vector<3x16xbf16>, vector<16x16xf32> -> vector<16x16xf32>
      %23 = arith.addf %15, %22 : vector<16x16xf32>
      %c0_i32_19 = arith.constant 0 : i32
      %24 = arith.addi %arg6, %c0_i32_19 : i32
      %c1 = arith.constant 1 : index
      %25 = arith.index_cast %24 : i32 to index
      %c0_20 = arith.constant 0 : index
      %c0_21 = arith.constant 0 : index
      %26 = vector.load %arg1[%c1, %25, %c0_20, %c0_21] : memref<4x17x17x3xbf16, #tpu.memory_space<vmem>>, vector<1x1x16x3xbf16>
      %27 = vector.shape_cast %26 : vector<1x1x16x3xbf16> to vector<16x3xbf16>
      %c1_22 = arith.constant 1 : index
      %c0_23 = arith.constant 0 : index
      %c0_24 = arith.constant 0 : index
      %28 = vector.load %arg2[%c1_22, %c0_23, %c0_24] : memref<16x3x16xbf16, #tpu.memory_space<vmem>>, vector<1x3x16xbf16>
      %29 = vector.shape_cast %28 : vector<1x3x16xbf16> to vector<3x16xbf16>
      %cst_25 = arith.constant dense<0.000000e+00> : vector<16x16xf32>
      %30 = tpu.matmul %27, %29, %cst_25 {dimension_numbers = #tpu.dot_dimension_numbers<[1], [0], [0], [1], [0, 0, 1, 1], [], []>} : vector<16x3xbf16>, vector<3x16xbf16>, vector<16x16xf32> -> vector<16x16xf32>
      %31 = arith.addf %23, %30 : vector<16x16xf32>
      %c0_i32_26 = arith.constant 0 : i32
      %32 = arith.addi %arg6, %c0_i32_26 : i32
      %c0_27 = arith.constant 0 : index
      %33 = arith.index_cast %32 : i32 to index
      %c1_28 = arith.constant 1 : index
      %c0_29 = arith.constant 0 : index
      %34 = vector.load %arg1[%c0_27, %33, %c1_28, %c0_29] : memref<4x17x17x3xbf16, #tpu.memory_space<vmem>>, vector<1x1x16x3xbf16>
      %35 = vector.shape_cast %34 : vector<1x1x16x3xbf16> to vector<16x3xbf16>
      %c2 = arith.constant 2 : index
      %c0_30 = arith.constant 0 : index
      %c0_31 = arith.constant 0 : index
      %36 = vector.load %arg2[%c2, %c0_30, %c0_31] : memref<16x3x16xbf16, #tpu.memory_space<vmem>>, vector<1x3x16xbf16>
      %37 = vector.shape_cast %36 : vector<1x3x16xbf16> to vector<3x16xbf16>
      %cst_32 = arith.constant dense<0.000000e+00> : vector<16x16xf32>
      %38 = tpu.matmul %35, %37, %cst_32 {dimension_numbers = #tpu.dot_dimension_numbers<[1], [0], [0], [1], [0, 0, 1, 1], [], []>} : vector<16x3xbf16>, vector<3x16xbf16>, vector<16x16xf32> -> vector<16x16xf32>
      %39 = arith.addf %31, %38 : vector<16x16xf32>
      %c0_i32_33 = arith.constant 0 : i32
      %40 = arith.addi %arg6, %c0_i32_33 : i32
      %c1_34 = arith.constant 1 : index
      %41 = arith.index_cast %40 : i32 to index
      %c1_35 = arith.constant 1 : index
      %c0_36 = arith.constant 0 : index
      %42 = vector.load %arg1[%c1_34, %41, %c1_35, %c0_36] : memref<4x17x17x3xbf16, #tpu.memory_space<vmem>>, vector<1x1x16x3xbf16>
      %43 = vector.shape_cast %42 : vector<1x1x16x3xbf16> to vector<16x3xbf16>
      %c3 = arith.constant 3 : index
      %c0_37 = arith.constant 0 : index
      %c0_38 = arith.constant 0 : index
      %44 = vector.load %arg2[%c3, %c0_37, %c0_38] : memref<16x3x16xbf16, #tpu.memory_space<vmem>>, vector<1x3x16xbf16>
      %45 = vector.shape_cast %44 : vector<1x3x16xbf16> to vector<3x16xbf16>
      %cst_39 = arith.constant dense<0.000000e+00> : vector<16x16xf32>
      %46 = tpu.matmul %43, %45, %cst_39 {dimension_numbers = #tpu.dot_dimension_numbers<[1], [0], [0], [1], [0, 0, 1, 1], [], []>} : vector<16x3xbf16>, vector<3x16xbf16>, vector<16x16xf32> -> vector<16x16xf32>
      %47 = arith.addf %39, %46 : vector<16x16xf32>
      %c0_i32_40 = arith.constant 0 : i32
      %48 = arith.addi %arg6, %c0_i32_40 : i32
      %c2_41 = arith.constant 2 : index
      %49 = arith.index_cast %48 : i32 to index
      %c0_42 = arith.constant 0 : index
      %c0_43 = arith.constant 0 : index
      %50 = vector.load %arg1[%c2_41, %49, %c0_42, %c0_43] : memref<4x17x17x3xbf16, #tpu.memory_space<vmem>>, vector<1x1x16x3xbf16>
      %51 = vector.shape_cast %50 : vector<1x1x16x3xbf16> to vector<16x3xbf16>
      %c4 = arith.constant 4 : index
      %c0_44 = arith.constant 0 : index
      %c0_45 = arith.constant 0 : index
      %52 = vector.load %arg2[%c4, %c0_44, %c0_45] : memref<16x3x16xbf16, #tpu.memory_space<vmem>>, vector<1x3x16xbf16>
      %53 = vector.shape_cast %52 : vector<1x3x16xbf16> to vector<3x16xbf16>
      %cst_46 = arith.constant dense<0.000000e+00> : vector<16x16xf32>
      %54 = tpu.matmul %51, %53, %cst_46 {dimension_numbers = #tpu.dot_dimension_numbers<[1], [0], [0], [1], [0, 0, 1, 1], [], []>} : vector<16x3xbf16>, vector<3x16xbf16>, vector<16x16xf32> -> vector<16x16xf32>
      %55 = arith.addf %47, %54 : vector<16x16xf32>
      %c0_i32_47 = arith.constant 0 : i32
      %56 = arith.addi %arg6, %c0_i32_47 : i32
      %c3_48 = arith.constant 3 : index
      %57 = arith.index_cast %56 : i32 to index
      %c0_49 = arith.constant 0 : index
      %c0_50 = arith.constant 0 : index
      %58 = vector.load %arg1[%c3_48, %57, %c0_49, %c0_50] : memref<4x17x17x3xbf16, #tpu.memory_space<vmem>>, vector<1x1x16x3xbf16>
      %59 = vector.shape_cast %58 : vector<1x1x16x3xbf16> to vector<16x3xbf16>
      %c5 = arith.constant 5 : index
      %c0_51 = arith.constant 0 : index
      %c0_52 = arith.constant 0 : index
      %60 = vector.load %arg2[%c5, %c0_51, %c0_52] : memref<16x3x16xbf16, #tpu.memory_space<vmem>>, vector<1x3x16xbf16>
      %61 = vector.shape_cast %60 : vector<1x3x16xbf16> to vector<3x16xbf16>
      %cst_53 = arith.constant dense<0.000000e+00> : vector<16x16xf32>
      %62 = tpu.matmul %59, %61, %cst_53 {dimension_numbers = #tpu.dot_dimension_numbers<[1], [0], [0], [1], [0, 0, 1, 1], [], []>} : vector<16x3xbf16>, vector<3x16xbf16>, vector<16x16xf32> -> vector<16x16xf32>
      %63 = arith.addf %55, %62 : vector<16x16xf32>
      %c0_i32_54 = arith.constant 0 : i32
      %64 = arith.addi %arg6, %c0_i32_54 : i32
      %c2_55 = arith.constant 2 : index
      %65 = arith.index_cast %64 : i32 to index
      %c1_56 = arith.constant 1 : index
      %c0_57 = arith.constant 0 : index
      %66 = vector.load %arg1[%c2_55, %65, %c1_56, %c0_57] : memref<4x17x17x3xbf16, #tpu.memory_space<vmem>>, vector<1x1x16x3xbf16>
      %67 = vector.shape_cast %66 : vector<1x1x16x3xbf16> to vector<16x3xbf16>
      %c6 = arith.constant 6 : index
      %c0_58 = arith.constant 0 : index
      %c0_59 = arith.constant 0 : index
      %68 = vector.load %arg2[%c6, %c0_58, %c0_59] : memref<16x3x16xbf16, #tpu.memory_space<vmem>>, vector<1x3x16xbf16>
      %69 = vector.shape_cast %68 : vector<1x3x16xbf16> to vector<3x16xbf16>
      %cst_60 = arith.constant dense<0.000000e+00> : vector<16x16xf32>
      %70 = tpu.matmul %67, %69, %cst_60 {dimension_numbers = #tpu.dot_dimension_numbers<[1], [0], [0], [1], [0, 0, 1, 1], [], []>} : vector<16x3xbf16>, vector<3x16xbf16>, vector<16x16xf32> -> vector<16x16xf32>
      %71 = arith.addf %63, %70 : vector<16x16xf32>
      %c0_i32_61 = arith.constant 0 : i32
      %72 = arith.addi %arg6, %c0_i32_61 : i32
      %c3_62 = arith.constant 3 : index
      %73 = arith.index_cast %72 : i32 to index
      %c1_63 = arith.constant 1 : index
      %c0_64 = arith.constant 0 : index
      %74 = vector.load %arg1[%c3_62, %73, %c1_63, %c0_64] : memref<4x17x17x3xbf16, #tpu.memory_space<vmem>>, vector<1x1x16x3xbf16>
      %75 = vector.shape_cast %74 : vector<1x1x16x3xbf16> to vector<16x3xbf16>
      %c7 = arith.constant 7 : index
      %c0_65 = arith.constant 0 : index
      %c0_66 = arith.constant 0 : index
      %76 = vector.load %arg2[%c7, %c0_65, %c0_66] : memref<16x3x16xbf16, #tpu.memory_space<vmem>>, vector<1x3x16xbf16>
      %77 = vector.shape_cast %76 : vector<1x3x16xbf16> to vector<3x16xbf16>
      %cst_67 = arith.constant dense<0.000000e+00> : vector<16x16xf32>
      %78 = tpu.matmul %75, %77, %cst_67 {dimension_numbers = #tpu.dot_dimension_numbers<[1], [0], [0], [1], [0, 0, 1, 1], [], []>} : vector<16x3xbf16>, vector<3x16xbf16>, vector<16x16xf32> -> vector<16x16xf32>
      %79 = arith.addf %71, %78 : vector<16x16xf32>
      %c1_i32_68 = arith.constant 1 : i32
      %80 = arith.addi %arg6, %c1_i32_68 : i32
      %c0_69 = arith.constant 0 : index
      %81 = arith.index_cast %80 : i32 to index
      %c0_70 = arith.constant 0 : index
      %c0_71 = arith.constant 0 : index
      %82 = vector.load %arg1[%c0_69, %81, %c0_70, %c0_71] : memref<4x17x17x3xbf16, #tpu.memory_space<vmem>>, vector<1x1x16x3xbf16>
      %83 = vector.shape_cast %82 : vector<1x1x16x3xbf16> to vector<16x3xbf16>
      %c8 = arith.constant 8 : index
      %c0_72 = arith.constant 0 : index
      %c0_73 = arith.constant 0 : index
      %84 = vector.load %arg2[%c8, %c0_72, %c0_73] : memref<16x3x16xbf16, #tpu.memory_space<vmem>>, vector<1x3x16xbf16>
      %85 = vector.shape_cast %84 : vector<1x3x16xbf16> to vector<3x16xbf16>
      %cst_74 = arith.constant dense<0.000000e+00> : vector<16x16xf32>
      %86 = tpu.matmul %83, %85, %cst_74 {dimension_numbers = #tpu.dot_dimension_numbers<[1], [0], [0], [1], [0, 0, 1, 1], [], []>} : vector<16x3xbf16>, vector<3x16xbf16>, vector<16x16xf32> -> vector<16x16xf32>
      %87 = arith.addf %79, %86 : vector<16x16xf32>
      %c1_i32_75 = arith.constant 1 : i32
      %88 = arith.addi %arg6, %c1_i32_75 : i32
      %c1_76 = arith.constant 1 : index
      %89 = arith.index_cast %88 : i32 to index
      %c0_77 = arith.constant 0 : index
      %c0_78 = arith.constant 0 : index
      %90 = vector.load %arg1[%c1_76, %89, %c0_77, %c0_78] : memref<4x17x17x3xbf16, #tpu.memory_space<vmem>>, vector<1x1x16x3xbf16>
      %91 = vector.shape_cast %90 : vector<1x1x16x3xbf16> to vector<16x3xbf16>
      %c9 = arith.constant 9 : index
      %c0_79 = arith.constant 0 : index
      %c0_80 = arith.constant 0 : index
      %92 = vector.load %arg2[%c9, %c0_79, %c0_80] : memref<16x3x16xbf16, #tpu.memory_space<vmem>>, vector<1x3x16xbf16>
      %93 = vector.shape_cast %92 : vector<1x3x16xbf16> to vector<3x16xbf16>
      %cst_81 = arith.constant dense<0.000000e+00> : vector<16x16xf32>
      %94 = tpu.matmul %91, %93, %cst_81 {dimension_numbers = #tpu.dot_dimension_numbers<[1], [0], [0], [1], [0, 0, 1, 1], [], []>} : vector<16x3xbf16>, vector<3x16xbf16>, vector<16x16xf32> -> vector<16x16xf32>
      %95 = arith.addf %87, %94 : vector<16x16xf32>
      %c1_i32_82 = arith.constant 1 : i32
      %96 = arith.addi %arg6, %c1_i32_82 : i32
      %c0_83 = arith.constant 0 : index
      %97 = arith.index_cast %96 : i32 to index
      %c1_84 = arith.constant 1 : index
      %c0_85 = arith.constant 0 : index
      %98 = vector.load %arg1[%c0_83, %97, %c1_84, %c0_85] : memref<4x17x17x3xbf16, #tpu.memory_space<vmem>>, vector<1x1x16x3xbf16>
      %99 = vector.shape_cast %98 : vector<1x1x16x3xbf16> to vector<16x3xbf16>
      %c10 = arith.constant 10 : index
      %c0_86 = arith.constant 0 : index
      %c0_87 = arith.constant 0 : index
      %100 = vector.load %arg2[%c10, %c0_86, %c0_87] : memref<16x3x16xbf16, #tpu.memory_space<vmem>>, vector<1x3x16xbf16>
      %101 = vector.shape_cast %100 : vector<1x3x16xbf16> to vector<3x16xbf16>
      %cst_88 = arith.constant dense<0.000000e+00> : vector<16x16xf32>
      %102 = tpu.matmul %99, %101, %cst_88 {dimension_numbers = #tpu.dot_dimension_numbers<[1], [0], [0], [1], [0, 0, 1, 1], [], []>} : vector<16x3xbf16>, vector<3x16xbf16>, vector<16x16xf32> -> vector<16x16xf32>
      %103 = arith.addf %95, %102 : vector<16x16xf32>
      %c1_i32_89 = arith.constant 1 : i32
      %104 = arith.addi %arg6, %c1_i32_89 : i32
      %c1_90 = arith.constant 1 : index
      %105 = arith.index_cast %104 : i32 to index
      %c1_91 = arith.constant 1 : index
      %c0_92 = arith.constant 0 : index
      %106 = vector.load %arg1[%c1_90, %105, %c1_91, %c0_92] : memref<4x17x17x3xbf16, #tpu.memory_space<vmem>>, vector<1x1x16x3xbf16>
      %107 = vector.shape_cast %106 : vector<1x1x16x3xbf16> to vector<16x3xbf16>
      %c11 = arith.constant 11 : index
      %c0_93 = arith.constant 0 : index
      %c0_94 = arith.constant 0 : index
      %108 = vector.load %arg2[%c11, %c0_93, %c0_94] : memref<16x3x16xbf16, #tpu.memory_space<vmem>>, vector<1x3x16xbf16>
      %109 = vector.shape_cast %108 : vector<1x3x16xbf16> to vector<3x16xbf16>
      %cst_95 = arith.constant dense<0.000000e+00> : vector<16x16xf32>
      %110 = tpu.matmul %107, %109, %cst_95 {dimension_numbers = #tpu.dot_dimension_numbers<[1], [0], [0], [1], [0, 0, 1, 1], [], []>} : vector<16x3xbf16>, vector<3x16xbf16>, vector<16x16xf32> -> vector<16x16xf32>
      %111 = arith.addf %103, %110 : vector<16x16xf32>
      %c1_i32_96 = arith.constant 1 : i32
      %112 = arith.addi %arg6, %c1_i32_96 : i32
      %c2_97 = arith.constant 2 : index
      %113 = arith.index_cast %112 : i32 to index
      %c0_98 = arith.constant 0 : index
      %c0_99 = arith.constant 0 : index
      %114 = vector.load %arg1[%c2_97, %113, %c0_98, %c0_99] : memref<4x17x17x3xbf16, #tpu.memory_space<vmem>>, vector<1x1x16x3xbf16>
      %115 = vector.shape_cast %114 : vector<1x1x16x3xbf16> to vector<16x3xbf16>
      %c12 = arith.constant 12 : index
      %c0_100 = arith.constant 0 : index
      %c0_101 = arith.constant 0 : index
      %116 = vector.load %arg2[%c12, %c0_100, %c0_101] : memref<16x3x16xbf16, #tpu.memory_space<vmem>>, vector<1x3x16xbf16>
      %117 = vector.shape_cast %116 : vector<1x3x16xbf16> to vector<3x16xbf16>
      %cst_102 = arith.constant dense<0.000000e+00> : vector<16x16xf32>
      %118 = tpu.matmul %115, %117, %cst_102 {dimension_numbers = #tpu.dot_dimension_numbers<[1], [0], [0], [1], [0, 0, 1, 1], [], []>} : vector<16x3xbf16>, vector<3x16xbf16>, vector<16x16xf32> -> vector<16x16xf32>
      %119 = arith.addf %111, %118 : vector<16x16xf32>
      %c1_i32_103 = arith.constant 1 : i32
      %120 = arith.addi %arg6, %c1_i32_103 : i32
      %c3_104 = arith.constant 3 : index
      %121 = arith.index_cast %120 : i32 to index
      %c0_105 = arith.constant 0 : index
      %c0_106 = arith.constant 0 : index
      %122 = vector.load %arg1[%c3_104, %121, %c0_105, %c0_106] : memref<4x17x17x3xbf16, #tpu.memory_space<vmem>>, vector<1x1x16x3xbf16>
      %123 = vector.shape_cast %122 : vector<1x1x16x3xbf16> to vector<16x3xbf16>
      %c13 = arith.constant 13 : index
      %c0_107 = arith.constant 0 : index
      %c0_108 = arith.constant 0 : index
      %124 = vector.load %arg2[%c13, %c0_107, %c0_108] : memref<16x3x16xbf16, #tpu.memory_space<vmem>>, vector<1x3x16xbf16>
      %125 = vector.shape_cast %124 : vector<1x3x16xbf16> to vector<3x16xbf16>
      %cst_109 = arith.constant dense<0.000000e+00> : vector<16x16xf32>
      %126 = tpu.matmul %123, %125, %cst_109 {dimension_numbers = #tpu.dot_dimension_numbers<[1], [0], [0], [1], [0, 0, 1, 1], [], []>} : vector<16x3xbf16>, vector<3x16xbf16>, vector<16x16xf32> -> vector<16x16xf32>
      %127 = arith.addf %119, %126 : vector<16x16xf32>
      %c1_i32_110 = arith.constant 1 : i32
      %128 = arith.addi %arg6, %c1_i32_110 : i32
      %c2_111 = arith.constant 2 : index
      %129 = arith.index_cast %128 : i32 to index
      %c1_112 = arith.constant 1 : index
      %c0_113 = arith.constant 0 : index
      %130 = vector.load %arg1[%c2_111, %129, %c1_112, %c0_113] : memref<4x17x17x3xbf16, #tpu.memory_space<vmem>>, vector<1x1x16x3xbf16>
      %131 = vector.shape_cast %130 : vector<1x1x16x3xbf16> to vector<16x3xbf16>
      %c14 = arith.constant 14 : index
      %c0_114 = arith.constant 0 : index
      %c0_115 = arith.constant 0 : index
      %132 = vector.load %arg2[%c14, %c0_114, %c0_115] : memref<16x3x16xbf16, #tpu.memory_space<vmem>>, vector<1x3x16xbf16>
      %133 = vector.shape_cast %132 : vector<1x3x16xbf16> to vector<3x16xbf16>
      %cst_116 = arith.constant dense<0.000000e+00> : vector<16x16xf32>
      %134 = tpu.matmul %131, %133, %cst_116 {dimension_numbers = #tpu.dot_dimension_numbers<[1], [0], [0], [1], [0, 0, 1, 1], [], []>} : vector<16x3xbf16>, vector<3x16xbf16>, vector<16x16xf32> -> vector<16x16xf32>
      %135 = arith.addf %127, %134 : vector<16x16xf32>
      %c1_i32_117 = arith.constant 1 : i32
      %136 = arith.addi %arg6, %c1_i32_117 : i32
      %c3_118 = arith.constant 3 : index
      %137 = arith.index_cast %136 : i32 to index
      %c1_119 = arith.constant 1 : index
      %c0_120 = arith.constant 0 : index
      %138 = vector.load %arg1[%c3_118, %137, %c1_119, %c0_120] : memref<4x17x17x3xbf16, #tpu.memory_space<vmem>>, vector<1x1x16x3xbf16>
      %139 = vector.shape_cast %138 : vector<1x1x16x3xbf16> to vector<16x3xbf16>
      %c15 = arith.constant 15 : index
      %c0_121 = arith.constant 0 : index
      %c0_122 = arith.constant 0 : index
      %140 = vector.load %arg2[%c15, %c0_121, %c0_122] : memref<16x3x16xbf16, #tpu.memory_space<vmem>>, vector<1x3x16xbf16>
      %141 = vector.shape_cast %140 : vector<1x3x16xbf16> to vector<3x16xbf16>
      %cst_123 = arith.constant dense<0.000000e+00> : vector<16x16xf32>
      %142 = tpu.matmul %139, %141, %cst_123 {dimension_numbers = #tpu.dot_dimension_numbers<[1], [0], [0], [1], [0, 0, 1, 1], [], []>} : vector<16x3xbf16>, vector<3x16xbf16>, vector<16x16xf32> -> vector<16x16xf32>
      %143 = arith.addf %135, %142 : vector<16x16xf32>
      %144 = arith.index_cast %arg6 : i32 to index
      %c0_124 = arith.constant 0 : index
      %c0_125 = arith.constant 0 : index
      %145 = vector.load %arg5[%144, %c0_124, %c0_125] : memref<16x16x16xf32, #tpu.memory_space<vmem>>, vector<1x16x16xf32>
      %146 = vector.shape_cast %145 : vector<1x16x16xf32> to vector<16x16xf32>
      %147 = vector.shape_cast %143 : vector<16x16xf32> to vector<1x16x16xf32>
      tpu.vector_store %arg5[%144, %c0_124, %c0_125], %147 {strides = array<i32>} : memref<16x16x16xf32, #tpu.memory_space<vmem>>, vector<1x16x16xf32>,
    }
    %c16_i32_0 = arith.constant 16 : i32
    %c0 = arith.constant 0 : index
    %c0_1 = arith.constant 0 : index
    %c0_2 = arith.constant 0 : index
    %1 = vector.load %arg5[%c0, %c0_1, %c0_2] : memref<16x16x16xf32, #tpu.memory_space<vmem>>, vector<16x16x16xf32>
    %c0_3 = arith.constant 0 : index
    %c0_4 = arith.constant 0 : index
    %2 = vector.load %arg3[%c0_3, %c0_4] : memref<1x16xf32, #tpu.memory_space<vmem>>, vector<1x16xf32>
    %3 = vector.shape_cast %2 : vector<1x16xf32> to vector<1x1x16xf32>
    %4 = vector.broadcast %3 : vector<1x1x16xf32> to vector<16x16x16xf32>
    %5 = arith.addf %1, %4 : vector<16x16x16xf32>
    %cst = arith.constant 0.000000e+00 : f32
    %6 = vector.broadcast %cst : f32 to vector<16x16x16xf32>
    %7 = arith.cmpf oge, %5, %6 : vector<16x16x16xf32>
    %cst_5 = arith.constant 2.000000e-01 : f32
    %8 = vector.broadcast %cst_5 : f32 to vector<16x16x16xf32>
    %9 = arith.mulf %8, %5 : vector<16x16x16xf32>
    %10 = arith.select %7, %5, %9 : vector<16x16x16xi1>, vector<16x16x16xf32>
    %11 = arith.truncf %10 : vector<16x16x16xf32> to vector<16x16x16xbf16>
    %c0_6 = arith.constant 0 : index
    %c0_7 = arith.constant 0 : index
    %c0_8 = arith.constant 0 : index
    %c0_9 = arith.constant 0 : index
    %12 = vector.load %arg4[%c0_6, %c0_7, %c0_8, %c0_9] : memref<1x16x16x16xbf16, #tpu.memory_space<vmem>>, vector<1x16x16x16xbf16>
    %13 = vector.shape_cast %12 : vector<1x16x16x16xbf16> to vector<16x16x16xbf16>
    %14 = vector.shape_cast %11 : vector<16x16x16xbf16> to vector<1x16x16x16xbf16>
    tpu.vector_store %arg4[%c0_6, %c0_7, %c0_8, %c0_9], %14 {strides = array<i32>} : memref<1x16x16x16xbf16, #tpu.memory_space<vmem>>, vector<1x16x16x16xbf16>,
    return
  }
  func.func @transform_0(%arg0: i32) -> (i32, i32, i32, i32) {
    %c0_i32 = arith.constant 0 : i32
    %c0_i32_0 = arith.constant 0 : i32
    %c0_i32_1 = arith.constant 0 : i32
    %c0_i32_2 = arith.constant 0 : i32
    return %arg0, %c0_i32, %c0_i32_0, %c0_i32_1 : i32, i32, i32, i32
  }
  func.func @transform_1(%arg0: i32) -> (i32, i32, i32) {
    %c0_i32 = arith.constant 0 : i32
    %c0_i32_0 = arith.constant 0 : i32
    %c0_i32_1 = arith.constant 0 : i32
    %c0_i32_2 = arith.constant 0 : i32
    return %c0_i32, %c0_i32_0, %c0_i32_1 : i32, i32, i32
  }
  func.func @transform_2(%arg0: i32) -> (i32, i32) {
    %c0_i32 = arith.constant 0 : i32
    %c0_i32_0 = arith.constant 0 : i32
    %c0_i32_1 = arith.constant 0 : i32
    return %c0_i32, %c0_i32_0 : i32, i32
  }
  func.func @transform_3(%arg0: i32) -> (i32, i32, i32, i32) {
    %c0_i32 = arith.constant 0 : i32
    %c0_i32_0 = arith.constant 0 : i32
    %c0_i32_1 = arith.constant 0 : i32
    %c0_i32_2 = arith.constant 0 : i32
    return %arg0, %c0_i32, %c0_i32_0, %c0_i32_1 : i32, i32, i32, i32
  }
}

module attributes {stable_mosaic.version = 11 : i64} {
  func.func @_conv_block_kernel(%arg0: i32, %arg1: memref<4x9x9x16xbf16, #tpu.memory_space<vmem>>, %arg2: memref<16x16x32xbf16, #tpu.memory_space<vmem>>, %arg3: memref<1x32xf32, #tpu.memory_space<vmem>>, %arg4: memref<1x8x8x32xbf16, #tpu.memory_space<vmem>>, %arg5: memref<8x8x32xf32, #tpu.memory_space<vmem>>) attributes {dimension_semantics = [#tpu.dimension_semantics<parallel>], iteration_bounds = array<i64: 2>, scalar_prefetch = 0 : i64, scratch_operands = 1 : i64, tpu.core_type = #tpu.core_type<tc>, window_params = [{transform_indices = @transform_0, window_bounds = array<i64: 4, 9, 9, 16>}, {pipeline_mode = #tpu.pipeline_mode<synchronous>, transform_indices = @transform_1, window_bounds = array<i64: 16, 16, 32>}, {pipeline_mode = #tpu.pipeline_mode<synchronous>, transform_indices = @transform_2, window_bounds = array<i64: 1, 32>}, {transform_indices = @transform_3, window_bounds = array<i64: 1, 8, 8, 32>}]} {
    %c0_i32 = arith.constant 0 : i32
    %c8_i32 = arith.constant 8 : i32
    %0 = arith.addi %c0_i32, %c8_i32 : i32
    %c1_i32 = arith.constant 1 : i32
    scf.for %arg6 = %c0_i32 to %0 step %c1_i32  : i32 {
      %cst_19 = arith.constant 0.000000e+00 : f32
      %39 = vector.broadcast %cst_19 : f32 to vector<8x32xf32>
      %c0_i32_20 = arith.constant 0 : i32
      %40 = arith.addi %arg6, %c0_i32_20 : i32
      %c0_21 = arith.constant 0 : index
      %41 = arith.index_cast %40 : i32 to index
      %c0_22 = arith.constant 0 : index
      %c0_23 = arith.constant 0 : index
      %42 = vector.load %arg1[%c0_21, %41, %c0_22, %c0_23] : memref<4x9x9x16xbf16, #tpu.memory_space<vmem>>, vector<1x1x8x16xbf16>
      %43 = vector.shape_cast %42 : vector<1x1x8x16xbf16> to vector<8x16xbf16>
      %c0_24 = arith.constant 0 : index
      %c0_25 = arith.constant 0 : index
      %c0_26 = arith.constant 0 : index
      %44 = vector.load %arg2[%c0_24, %c0_25, %c0_26] : memref<16x16x32xbf16, #tpu.memory_space<vmem>>, vector<1x16x32xbf16>
      %45 = vector.shape_cast %44 : vector<1x16x32xbf16> to vector<16x32xbf16>
      %cst_27 = arith.constant dense<0.000000e+00> : vector<8x32xf32>
      %46 = tpu.matmul %43, %45, %cst_27 {dimension_numbers = #tpu.dot_dimension_numbers<[1], [0], [0], [1], [0, 0, 1, 1], [], []>} : vector<8x16xbf16>, vector<16x32xbf16>, vector<8x32xf32> -> vector<8x32xf32>
      %47 = arith.addf %39, %46 : vector<8x32xf32>
      %c0_i32_28 = arith.constant 0 : i32
      %48 = arith.addi %arg6, %c0_i32_28 : i32
      %c1 = arith.constant 1 : index
      %49 = arith.index_cast %48 : i32 to index
      %c0_29 = arith.constant 0 : index
      %c0_30 = arith.constant 0 : index
      %50 = vector.load %arg1[%c1, %49, %c0_29, %c0_30] : memref<4x9x9x16xbf16, #tpu.memory_space<vmem>>, vector<1x1x8x16xbf16>
      %51 = vector.shape_cast %50 : vector<1x1x8x16xbf16> to vector<8x16xbf16>
      %c1_31 = arith.constant 1 : index
      %c0_32 = arith.constant 0 : index
      %c0_33 = arith.constant 0 : index
      %52 = vector.load %arg2[%c1_31, %c0_32, %c0_33] : memref<16x16x32xbf16, #tpu.memory_space<vmem>>, vector<1x16x32xbf16>
      %53 = vector.shape_cast %52 : vector<1x16x32xbf16> to vector<16x32xbf16>
      %cst_34 = arith.constant dense<0.000000e+00> : vector<8x32xf32>
      %54 = tpu.matmul %51, %53, %cst_34 {dimension_numbers = #tpu.dot_dimension_numbers<[1], [0], [0], [1], [0, 0, 1, 1], [], []>} : vector<8x16xbf16>, vector<16x32xbf16>, vector<8x32xf32> -> vector<8x32xf32>
      %55 = arith.addf %47, %54 : vector<8x32xf32>
      %c0_i32_35 = arith.constant 0 : i32
      %56 = arith.addi %arg6, %c0_i32_35 : i32
      %c0_36 = arith.constant 0 : index
      %57 = arith.index_cast %56 : i32 to index
      %c1_37 = arith.constant 1 : index
      %c0_38 = arith.constant 0 : index
      %58 = vector.load %arg1[%c0_36, %57, %c1_37, %c0_38] : memref<4x9x9x16xbf16, #tpu.memory_space<vmem>>, vector<1x1x8x16xbf16>
      %59 = vector.shape_cast %58 : vector<1x1x8x16xbf16> to vector<8x16xbf16>
      %c2 = arith.constant 2 : index
      %c0_39 = arith.constant 0 : index
      %c0_40 = arith.constant 0 : index
      %60 = vector.load %arg2[%c2, %c0_39, %c0_40] : memref<16x16x32xbf16, #tpu.memory_space<vmem>>, vector<1x16x32xbf16>
      %61 = vector.shape_cast %60 : vector<1x16x32xbf16> to vector<16x32xbf16>
      %cst_41 = arith.constant dense<0.000000e+00> : vector<8x32xf32>
      %62 = tpu.matmul %59, %61, %cst_41 {dimension_numbers = #tpu.dot_dimension_numbers<[1], [0], [0], [1], [0, 0, 1, 1], [], []>} : vector<8x16xbf16>, vector<16x32xbf16>, vector<8x32xf32> -> vector<8x32xf32>
      %63 = arith.addf %55, %62 : vector<8x32xf32>
      %c0_i32_42 = arith.constant 0 : i32
      %64 = arith.addi %arg6, %c0_i32_42 : i32
      %c1_43 = arith.constant 1 : index
      %65 = arith.index_cast %64 : i32 to index
      %c1_44 = arith.constant 1 : index
      %c0_45 = arith.constant 0 : index
      %66 = vector.load %arg1[%c1_43, %65, %c1_44, %c0_45] : memref<4x9x9x16xbf16, #tpu.memory_space<vmem>>, vector<1x1x8x16xbf16>
      %67 = vector.shape_cast %66 : vector<1x1x8x16xbf16> to vector<8x16xbf16>
      %c3 = arith.constant 3 : index
      %c0_46 = arith.constant 0 : index
      %c0_47 = arith.constant 0 : index
      %68 = vector.load %arg2[%c3, %c0_46, %c0_47] : memref<16x16x32xbf16, #tpu.memory_space<vmem>>, vector<1x16x32xbf16>
      %69 = vector.shape_cast %68 : vector<1x16x32xbf16> to vector<16x32xbf16>
      %cst_48 = arith.constant dense<0.000000e+00> : vector<8x32xf32>
      %70 = tpu.matmul %67, %69, %cst_48 {dimension_numbers = #tpu.dot_dimension_numbers<[1], [0], [0], [1], [0, 0, 1, 1], [], []>} : vector<8x16xbf16>, vector<16x32xbf16>, vector<8x32xf32> -> vector<8x32xf32>
      %71 = arith.addf %63, %70 : vector<8x32xf32>
      %c0_i32_49 = arith.constant 0 : i32
      %72 = arith.addi %arg6, %c0_i32_49 : i32
      %c2_50 = arith.constant 2 : index
      %73 = arith.index_cast %72 : i32 to index
      %c0_51 = arith.constant 0 : index
      %c0_52 = arith.constant 0 : index
      %74 = vector.load %arg1[%c2_50, %73, %c0_51, %c0_52] : memref<4x9x9x16xbf16, #tpu.memory_space<vmem>>, vector<1x1x8x16xbf16>
      %75 = vector.shape_cast %74 : vector<1x1x8x16xbf16> to vector<8x16xbf16>
      %c4 = arith.constant 4 : index
      %c0_53 = arith.constant 0 : index
      %c0_54 = arith.constant 0 : index
      %76 = vector.load %arg2[%c4, %c0_53, %c0_54] : memref<16x16x32xbf16, #tpu.memory_space<vmem>>, vector<1x16x32xbf16>
      %77 = vector.shape_cast %76 : vector<1x16x32xbf16> to vector<16x32xbf16>
      %cst_55 = arith.constant dense<0.000000e+00> : vector<8x32xf32>
      %78 = tpu.matmul %75, %77, %cst_55 {dimension_numbers = #tpu.dot_dimension_numbers<[1], [0], [0], [1], [0, 0, 1, 1], [], []>} : vector<8x16xbf16>, vector<16x32xbf16>, vector<8x32xf32> -> vector<8x32xf32>
      %79 = arith.addf %71, %78 : vector<8x32xf32>
      %c0_i32_56 = arith.constant 0 : i32
      %80 = arith.addi %arg6, %c0_i32_56 : i32
      %c3_57 = arith.constant 3 : index
      %81 = arith.index_cast %80 : i32 to index
      %c0_58 = arith.constant 0 : index
      %c0_59 = arith.constant 0 : index
      %82 = vector.load %arg1[%c3_57, %81, %c0_58, %c0_59] : memref<4x9x9x16xbf16, #tpu.memory_space<vmem>>, vector<1x1x8x16xbf16>
      %83 = vector.shape_cast %82 : vector<1x1x8x16xbf16> to vector<8x16xbf16>
      %c5 = arith.constant 5 : index
      %c0_60 = arith.constant 0 : index
      %c0_61 = arith.constant 0 : index
      %84 = vector.load %arg2[%c5, %c0_60, %c0_61] : memref<16x16x32xbf16, #tpu.memory_space<vmem>>, vector<1x16x32xbf16>
      %85 = vector.shape_cast %84 : vector<1x16x32xbf16> to vector<16x32xbf16>
      %cst_62 = arith.constant dense<0.000000e+00> : vector<8x32xf32>
      %86 = tpu.matmul %83, %85, %cst_62 {dimension_numbers = #tpu.dot_dimension_numbers<[1], [0], [0], [1], [0, 0, 1, 1], [], []>} : vector<8x16xbf16>, vector<16x32xbf16>, vector<8x32xf32> -> vector<8x32xf32>
      %87 = arith.addf %79, %86 : vector<8x32xf32>
      %c0_i32_63 = arith.constant 0 : i32
      %88 = arith.addi %arg6, %c0_i32_63 : i32
      %c2_64 = arith.constant 2 : index
      %89 = arith.index_cast %88 : i32 to index
      %c1_65 = arith.constant 1 : index
      %c0_66 = arith.constant 0 : index
      %90 = vector.load %arg1[%c2_64, %89, %c1_65, %c0_66] : memref<4x9x9x16xbf16, #tpu.memory_space<vmem>>, vector<1x1x8x16xbf16>
      %91 = vector.shape_cast %90 : vector<1x1x8x16xbf16> to vector<8x16xbf16>
      %c6 = arith.constant 6 : index
      %c0_67 = arith.constant 0 : index
      %c0_68 = arith.constant 0 : index
      %92 = vector.load %arg2[%c6, %c0_67, %c0_68] : memref<16x16x32xbf16, #tpu.memory_space<vmem>>, vector<1x16x32xbf16>
      %93 = vector.shape_cast %92 : vector<1x16x32xbf16> to vector<16x32xbf16>
      %cst_69 = arith.constant dense<0.000000e+00> : vector<8x32xf32>
      %94 = tpu.matmul %91, %93, %cst_69 {dimension_numbers = #tpu.dot_dimension_numbers<[1], [0], [0], [1], [0, 0, 1, 1], [], []>} : vector<8x16xbf16>, vector<16x32xbf16>, vector<8x32xf32> -> vector<8x32xf32>
      %95 = arith.addf %87, %94 : vector<8x32xf32>
      %c0_i32_70 = arith.constant 0 : i32
      %96 = arith.addi %arg6, %c0_i32_70 : i32
      %c3_71 = arith.constant 3 : index
      %97 = arith.index_cast %96 : i32 to index
      %c1_72 = arith.constant 1 : index
      %c0_73 = arith.constant 0 : index
      %98 = vector.load %arg1[%c3_71, %97, %c1_72, %c0_73] : memref<4x9x9x16xbf16, #tpu.memory_space<vmem>>, vector<1x1x8x16xbf16>
      %99 = vector.shape_cast %98 : vector<1x1x8x16xbf16> to vector<8x16xbf16>
      %c7 = arith.constant 7 : index
      %c0_74 = arith.constant 0 : index
      %c0_75 = arith.constant 0 : index
      %100 = vector.load %arg2[%c7, %c0_74, %c0_75] : memref<16x16x32xbf16, #tpu.memory_space<vmem>>, vector<1x16x32xbf16>
      %101 = vector.shape_cast %100 : vector<1x16x32xbf16> to vector<16x32xbf16>
      %cst_76 = arith.constant dense<0.000000e+00> : vector<8x32xf32>
      %102 = tpu.matmul %99, %101, %cst_76 {dimension_numbers = #tpu.dot_dimension_numbers<[1], [0], [0], [1], [0, 0, 1, 1], [], []>} : vector<8x16xbf16>, vector<16x32xbf16>, vector<8x32xf32> -> vector<8x32xf32>
      %103 = arith.addf %95, %102 : vector<8x32xf32>
      %c1_i32_77 = arith.constant 1 : i32
      %104 = arith.addi %arg6, %c1_i32_77 : i32
      %c0_78 = arith.constant 0 : index
      %105 = arith.index_cast %104 : i32 to index
      %c0_79 = arith.constant 0 : index
      %c0_80 = arith.constant 0 : index
      %106 = vector.load %arg1[%c0_78, %105, %c0_79, %c0_80] : memref<4x9x9x16xbf16, #tpu.memory_space<vmem>>, vector<1x1x8x16xbf16>
      %107 = vector.shape_cast %106 : vector<1x1x8x16xbf16> to vector<8x16xbf16>
      %c8 = arith.constant 8 : index
      %c0_81 = arith.constant 0 : index
      %c0_82 = arith.constant 0 : index
      %108 = vector.load %arg2[%c8, %c0_81, %c0_82] : memref<16x16x32xbf16, #tpu.memory_space<vmem>>, vector<1x16x32xbf16>
      %109 = vector.shape_cast %108 : vector<1x16x32xbf16> to vector<16x32xbf16>
      %cst_83 = arith.constant dense<0.000000e+00> : vector<8x32xf32>
      %110 = tpu.matmul %107, %109, %cst_83 {dimension_numbers = #tpu.dot_dimension_numbers<[1], [0], [0], [1], [0, 0, 1, 1], [], []>} : vector<8x16xbf16>, vector<16x32xbf16>, vector<8x32xf32> -> vector<8x32xf32>
      %111 = arith.addf %103, %110 : vector<8x32xf32>
      %c1_i32_84 = arith.constant 1 : i32
      %112 = arith.addi %arg6, %c1_i32_84 : i32
      %c1_85 = arith.constant 1 : index
      %113 = arith.index_cast %112 : i32 to index
      %c0_86 = arith.constant 0 : index
      %c0_87 = arith.constant 0 : index
      %114 = vector.load %arg1[%c1_85, %113, %c0_86, %c0_87] : memref<4x9x9x16xbf16, #tpu.memory_space<vmem>>, vector<1x1x8x16xbf16>
      %115 = vector.shape_cast %114 : vector<1x1x8x16xbf16> to vector<8x16xbf16>
      %c9 = arith.constant 9 : index
      %c0_88 = arith.constant 0 : index
      %c0_89 = arith.constant 0 : index
      %116 = vector.load %arg2[%c9, %c0_88, %c0_89] : memref<16x16x32xbf16, #tpu.memory_space<vmem>>, vector<1x16x32xbf16>
      %117 = vector.shape_cast %116 : vector<1x16x32xbf16> to vector<16x32xbf16>
      %cst_90 = arith.constant dense<0.000000e+00> : vector<8x32xf32>
      %118 = tpu.matmul %115, %117, %cst_90 {dimension_numbers = #tpu.dot_dimension_numbers<[1], [0], [0], [1], [0, 0, 1, 1], [], []>} : vector<8x16xbf16>, vector<16x32xbf16>, vector<8x32xf32> -> vector<8x32xf32>
      %119 = arith.addf %111, %118 : vector<8x32xf32>
      %c1_i32_91 = arith.constant 1 : i32
      %120 = arith.addi %arg6, %c1_i32_91 : i32
      %c0_92 = arith.constant 0 : index
      %121 = arith.index_cast %120 : i32 to index
      %c1_93 = arith.constant 1 : index
      %c0_94 = arith.constant 0 : index
      %122 = vector.load %arg1[%c0_92, %121, %c1_93, %c0_94] : memref<4x9x9x16xbf16, #tpu.memory_space<vmem>>, vector<1x1x8x16xbf16>
      %123 = vector.shape_cast %122 : vector<1x1x8x16xbf16> to vector<8x16xbf16>
      %c10 = arith.constant 10 : index
      %c0_95 = arith.constant 0 : index
      %c0_96 = arith.constant 0 : index
      %124 = vector.load %arg2[%c10, %c0_95, %c0_96] : memref<16x16x32xbf16, #tpu.memory_space<vmem>>, vector<1x16x32xbf16>
      %125 = vector.shape_cast %124 : vector<1x16x32xbf16> to vector<16x32xbf16>
      %cst_97 = arith.constant dense<0.000000e+00> : vector<8x32xf32>
      %126 = tpu.matmul %123, %125, %cst_97 {dimension_numbers = #tpu.dot_dimension_numbers<[1], [0], [0], [1], [0, 0, 1, 1], [], []>} : vector<8x16xbf16>, vector<16x32xbf16>, vector<8x32xf32> -> vector<8x32xf32>
      %127 = arith.addf %119, %126 : vector<8x32xf32>
      %c1_i32_98 = arith.constant 1 : i32
      %128 = arith.addi %arg6, %c1_i32_98 : i32
      %c1_99 = arith.constant 1 : index
      %129 = arith.index_cast %128 : i32 to index
      %c1_100 = arith.constant 1 : index
      %c0_101 = arith.constant 0 : index
      %130 = vector.load %arg1[%c1_99, %129, %c1_100, %c0_101] : memref<4x9x9x16xbf16, #tpu.memory_space<vmem>>, vector<1x1x8x16xbf16>
      %131 = vector.shape_cast %130 : vector<1x1x8x16xbf16> to vector<8x16xbf16>
      %c11 = arith.constant 11 : index
      %c0_102 = arith.constant 0 : index
      %c0_103 = arith.constant 0 : index
      %132 = vector.load %arg2[%c11, %c0_102, %c0_103] : memref<16x16x32xbf16, #tpu.memory_space<vmem>>, vector<1x16x32xbf16>
      %133 = vector.shape_cast %132 : vector<1x16x32xbf16> to vector<16x32xbf16>
      %cst_104 = arith.constant dense<0.000000e+00> : vector<8x32xf32>
      %134 = tpu.matmul %131, %133, %cst_104 {dimension_numbers = #tpu.dot_dimension_numbers<[1], [0], [0], [1], [0, 0, 1, 1], [], []>} : vector<8x16xbf16>, vector<16x32xbf16>, vector<8x32xf32> -> vector<8x32xf32>
      %135 = arith.addf %127, %134 : vector<8x32xf32>
      %c1_i32_105 = arith.constant 1 : i32
      %136 = arith.addi %arg6, %c1_i32_105 : i32
      %c2_106 = arith.constant 2 : index
      %137 = arith.index_cast %136 : i32 to index
      %c0_107 = arith.constant 0 : index
      %c0_108 = arith.constant 0 : index
      %138 = vector.load %arg1[%c2_106, %137, %c0_107, %c0_108] : memref<4x9x9x16xbf16, #tpu.memory_space<vmem>>, vector<1x1x8x16xbf16>
      %139 = vector.shape_cast %138 : vector<1x1x8x16xbf16> to vector<8x16xbf16>
      %c12 = arith.constant 12 : index
      %c0_109 = arith.constant 0 : index
      %c0_110 = arith.constant 0 : index
      %140 = vector.load %arg2[%c12, %c0_109, %c0_110] : memref<16x16x32xbf16, #tpu.memory_space<vmem>>, vector<1x16x32xbf16>
      %141 = vector.shape_cast %140 : vector<1x16x32xbf16> to vector<16x32xbf16>
      %cst_111 = arith.constant dense<0.000000e+00> : vector<8x32xf32>
      %142 = tpu.matmul %139, %141, %cst_111 {dimension_numbers = #tpu.dot_dimension_numbers<[1], [0], [0], [1], [0, 0, 1, 1], [], []>} : vector<8x16xbf16>, vector<16x32xbf16>, vector<8x32xf32> -> vector<8x32xf32>
      %143 = arith.addf %135, %142 : vector<8x32xf32>
      %c1_i32_112 = arith.constant 1 : i32
      %144 = arith.addi %arg6, %c1_i32_112 : i32
      %c3_113 = arith.constant 3 : index
      %145 = arith.index_cast %144 : i32 to index
      %c0_114 = arith.constant 0 : index
      %c0_115 = arith.constant 0 : index
      %146 = vector.load %arg1[%c3_113, %145, %c0_114, %c0_115] : memref<4x9x9x16xbf16, #tpu.memory_space<vmem>>, vector<1x1x8x16xbf16>
      %147 = vector.shape_cast %146 : vector<1x1x8x16xbf16> to vector<8x16xbf16>
      %c13 = arith.constant 13 : index
      %c0_116 = arith.constant 0 : index
      %c0_117 = arith.constant 0 : index
      %148 = vector.load %arg2[%c13, %c0_116, %c0_117] : memref<16x16x32xbf16, #tpu.memory_space<vmem>>, vector<1x16x32xbf16>
      %149 = vector.shape_cast %148 : vector<1x16x32xbf16> to vector<16x32xbf16>
      %cst_118 = arith.constant dense<0.000000e+00> : vector<8x32xf32>
      %150 = tpu.matmul %147, %149, %cst_118 {dimension_numbers = #tpu.dot_dimension_numbers<[1], [0], [0], [1], [0, 0, 1, 1], [], []>} : vector<8x16xbf16>, vector<16x32xbf16>, vector<8x32xf32> -> vector<8x32xf32>
      %151 = arith.addf %143, %150 : vector<8x32xf32>
      %c1_i32_119 = arith.constant 1 : i32
      %152 = arith.addi %arg6, %c1_i32_119 : i32
      %c2_120 = arith.constant 2 : index
      %153 = arith.index_cast %152 : i32 to index
      %c1_121 = arith.constant 1 : index
      %c0_122 = arith.constant 0 : index
      %154 = vector.load %arg1[%c2_120, %153, %c1_121, %c0_122] : memref<4x9x9x16xbf16, #tpu.memory_space<vmem>>, vector<1x1x8x16xbf16>
      %155 = vector.shape_cast %154 : vector<1x1x8x16xbf16> to vector<8x16xbf16>
      %c14 = arith.constant 14 : index
      %c0_123 = arith.constant 0 : index
      %c0_124 = arith.constant 0 : index
      %156 = vector.load %arg2[%c14, %c0_123, %c0_124] : memref<16x16x32xbf16, #tpu.memory_space<vmem>>, vector<1x16x32xbf16>
      %157 = vector.shape_cast %156 : vector<1x16x32xbf16> to vector<16x32xbf16>
      %cst_125 = arith.constant dense<0.000000e+00> : vector<8x32xf32>
      %158 = tpu.matmul %155, %157, %cst_125 {dimension_numbers = #tpu.dot_dimension_numbers<[1], [0], [0], [1], [0, 0, 1, 1], [], []>} : vector<8x16xbf16>, vector<16x32xbf16>, vector<8x32xf32> -> vector<8x32xf32>
      %159 = arith.addf %151, %158 : vector<8x32xf32>
      %c1_i32_126 = arith.constant 1 : i32
      %160 = arith.addi %arg6, %c1_i32_126 : i32
      %c3_127 = arith.constant 3 : index
      %161 = arith.index_cast %160 : i32 to index
      %c1_128 = arith.constant 1 : index
      %c0_129 = arith.constant 0 : index
      %162 = vector.load %arg1[%c3_127, %161, %c1_128, %c0_129] : memref<4x9x9x16xbf16, #tpu.memory_space<vmem>>, vector<1x1x8x16xbf16>
      %163 = vector.shape_cast %162 : vector<1x1x8x16xbf16> to vector<8x16xbf16>
      %c15 = arith.constant 15 : index
      %c0_130 = arith.constant 0 : index
      %c0_131 = arith.constant 0 : index
      %164 = vector.load %arg2[%c15, %c0_130, %c0_131] : memref<16x16x32xbf16, #tpu.memory_space<vmem>>, vector<1x16x32xbf16>
      %165 = vector.shape_cast %164 : vector<1x16x32xbf16> to vector<16x32xbf16>
      %cst_132 = arith.constant dense<0.000000e+00> : vector<8x32xf32>
      %166 = tpu.matmul %163, %165, %cst_132 {dimension_numbers = #tpu.dot_dimension_numbers<[1], [0], [0], [1], [0, 0, 1, 1], [], []>} : vector<8x16xbf16>, vector<16x32xbf16>, vector<8x32xf32> -> vector<8x32xf32>
      %167 = arith.addf %159, %166 : vector<8x32xf32>
      %168 = arith.index_cast %arg6 : i32 to index
      %c0_133 = arith.constant 0 : index
      %c0_134 = arith.constant 0 : index
      %169 = vector.load %arg5[%168, %c0_133, %c0_134] : memref<8x8x32xf32, #tpu.memory_space<vmem>>, vector<1x8x32xf32>
      %170 = vector.shape_cast %169 : vector<1x8x32xf32> to vector<8x32xf32>
      %171 = vector.shape_cast %167 : vector<8x32xf32> to vector<1x8x32xf32>
      tpu.vector_store %arg5[%168, %c0_133, %c0_134], %171 {strides = array<i32>} : memref<8x8x32xf32, #tpu.memory_space<vmem>>, vector<1x8x32xf32>,
    }
    %c8_i32_0 = arith.constant 8 : i32
    %c0 = arith.constant 0 : index
    %c0_1 = arith.constant 0 : index
    %c0_2 = arith.constant 0 : index
    %1 = vector.load %arg5[%c0, %c0_1, %c0_2] : memref<8x8x32xf32, #tpu.memory_space<vmem>>, vector<8x8x32xf32>
    %c0_3 = arith.constant 0 : index
    %c0_4 = arith.constant 0 : index
    %2 = vector.load %arg3[%c0_3, %c0_4] : memref<1x32xf32, #tpu.memory_space<vmem>>, vector<1x32xf32>
    %3 = vector.shape_cast %2 : vector<1x32xf32> to vector<1x1x32xf32>
    %4 = vector.broadcast %3 : vector<1x1x32xf32> to vector<8x8x32xf32>
    %5 = arith.addf %1, %4 : vector<8x8x32xf32>
    %cst = arith.constant dense<0.000000e+00> : vector<8x32xf32>
    %6 = vector.multi_reduction <add>, %5, %cst [0] : vector<8x8x32xf32> to vector<8x32xf32>
    %7 = vector.shape_cast %6 : vector<8x32xf32> to vector<1x8x32xf32>
    %cst_5 = arith.constant 8.000000e+00 : f32
    %8 = vector.broadcast %cst_5 : f32 to vector<1x8x32xf32>
    %9 = arith.divf %7, %8 : vector<1x8x32xf32>
    %cst_6 = arith.constant dense<0.000000e+00> : vector<1x32xf32>
    %10 = vector.multi_reduction <add>, %9, %cst_6 [1] : vector<1x8x32xf32> to vector<1x32xf32>
    %11 = vector.shape_cast %10 : vector<1x32xf32> to vector<1x1x32xf32>
    %cst_7 = arith.constant 8.000000e+00 : f32
    %12 = vector.broadcast %cst_7 : f32 to vector<1x1x32xf32>
    %13 = arith.divf %11, %12 : vector<1x1x32xf32>
    %14 = vector.broadcast %13 : vector<1x1x32xf32> to vector<8x8x32xf32>
    %15 = arith.subf %5, %14 : vector<8x8x32xf32>
    %16 = arith.mulf %15, %15 : vector<8x8x32xf32>
    %cst_8 = arith.constant dense<0.000000e+00> : vector<8x32xf32>
    %17 = vector.multi_reduction <add>, %16, %cst_8 [0] : vector<8x8x32xf32> to vector<8x32xf32>
    %18 = vector.shape_cast %17 : vector<8x32xf32> to vector<1x8x32xf32>
    %cst_9 = arith.constant 8.000000e+00 : f32
    %19 = vector.broadcast %cst_9 : f32 to vector<1x8x32xf32>
    %20 = arith.divf %18, %19 : vector<1x8x32xf32>
    %cst_10 = arith.constant dense<0.000000e+00> : vector<1x32xf32>
    %21 = vector.multi_reduction <add>, %20, %cst_10 [1] : vector<1x8x32xf32> to vector<1x32xf32>
    %22 = vector.shape_cast %21 : vector<1x32xf32> to vector<1x1x32xf32>
    %cst_11 = arith.constant 8.000000e+00 : f32
    %23 = vector.broadcast %cst_11 : f32 to vector<1x1x32xf32>
    %24 = arith.divf %22, %23 : vector<1x1x32xf32>
    %cst_12 = arith.constant 9.99999974E-6 : f32
    %25 = vector.broadcast %cst_12 : f32 to vector<1x1x32xf32>
    %26 = arith.addf %24, %25 : vector<1x1x32xf32>
    %27 = math.rsqrt %26 : vector<1x1x32xf32>
    %28 = vector.broadcast %27 : vector<1x1x32xf32> to vector<8x8x32xf32>
    %29 = arith.mulf %15, %28 : vector<8x8x32xf32>
    %cst_13 = arith.constant 0.000000e+00 : f32
    %30 = vector.broadcast %cst_13 : f32 to vector<8x8x32xf32>
    %31 = arith.cmpf oge, %29, %30 : vector<8x8x32xf32>
    %cst_14 = arith.constant 2.000000e-01 : f32
    %32 = vector.broadcast %cst_14 : f32 to vector<8x8x32xf32>
    %33 = arith.mulf %32, %29 : vector<8x8x32xf32>
    %34 = arith.select %31, %29, %33 : vector<8x8x32xi1>, vector<8x8x32xf32>
    %35 = arith.truncf %34 : vector<8x8x32xf32> to vector<8x8x32xbf16>
    %c0_15 = arith.constant 0 : index
    %c0_16 = arith.constant 0 : index
    %c0_17 = arith.constant 0 : index
    %c0_18 = arith.constant 0 : index
    %36 = vector.load %arg4[%c0_15, %c0_16, %c0_17, %c0_18] : memref<1x8x8x32xbf16, #tpu.memory_space<vmem>>, vector<1x8x8x32xbf16>
    %37 = vector.shape_cast %36 : vector<1x8x8x32xbf16> to vector<8x8x32xbf16>
    %38 = vector.shape_cast %35 : vector<8x8x32xbf16> to vector<1x8x8x32xbf16>
    tpu.vector_store %arg4[%c0_15, %c0_16, %c0_17, %c0_18], %38 {strides = array<i32>} : memref<1x8x8x32xbf16, #tpu.memory_space<vmem>>, vector<1x8x8x32xbf16>,
    return
  }
  func.func @transform_0(%arg0: i32) -> (i32, i32, i32, i32) {
    %c0_i32 = arith.constant 0 : i32
    %c0_i32_0 = arith.constant 0 : i32
    %c0_i32_1 = arith.constant 0 : i32
    %c0_i32_2 = arith.constant 0 : i32
    return %arg0, %c0_i32, %c0_i32_0, %c0_i32_1 : i32, i32, i32, i32
  }
  func.func @transform_1(%arg0: i32) -> (i32, i32, i32) {
    %c0_i32 = arith.constant 0 : i32
    %c0_i32_0 = arith.constant 0 : i32
    %c0_i32_1 = arith.constant 0 : i32
    %c0_i32_2 = arith.constant 0 : i32
    return %c0_i32, %c0_i32_0, %c0_i32_1 : i32, i32, i32
  }
  func.func @transform_2(%arg0: i32) -> (i32, i32) {
    %c0_i32 = arith.constant 0 : i32
    %c0_i32_0 = arith.constant 0 : i32
    %c0_i32_1 = arith.constant 0 : i32
    return %c0_i32, %c0_i32_0 : i32, i32
  }
  func.func @transform_3(%arg0: i32) -> (i32, i32, i32, i32) {
    %c0_i32 = arith.constant 0 : i32
    %c0_i32_0 = arith.constant 0 : i32
    %c0_i32_1 = arith.constant 0 : i32
    %c0_i32_2 = arith.constant 0 : i32
    return %arg0, %c0_i32, %c0_i32_0, %c0_i32_1 : i32, i32, i32, i32
  }
}

module attributes {stable_mosaic.version = 11 : i64} {
  func.func @_conv_block_kernel(%arg0: i32, %arg1: memref<4x5x5x32xbf16, #tpu.memory_space<vmem>>, %arg2: memref<16x32x64xbf16, #tpu.memory_space<vmem>>, %arg3: memref<1x64xf32, #tpu.memory_space<vmem>>, %arg4: memref<1x4x4x64xbf16, #tpu.memory_space<vmem>>, %arg5: memref<4x4x64xf32, #tpu.memory_space<vmem>>) attributes {dimension_semantics = [#tpu.dimension_semantics<parallel>], iteration_bounds = array<i64: 2>, scalar_prefetch = 0 : i64, scratch_operands = 1 : i64, tpu.core_type = #tpu.core_type<tc>, window_params = [{transform_indices = @transform_0, window_bounds = array<i64: 4, 5, 5, 32>}, {pipeline_mode = #tpu.pipeline_mode<synchronous>, transform_indices = @transform_1, window_bounds = array<i64: 16, 32, 64>}, {pipeline_mode = #tpu.pipeline_mode<synchronous>, transform_indices = @transform_2, window_bounds = array<i64: 1, 64>}, {transform_indices = @transform_3, window_bounds = array<i64: 1, 4, 4, 64>}]} {
    %c0_i32 = arith.constant 0 : i32
    %c4_i32 = arith.constant 4 : i32
    %0 = arith.addi %c0_i32, %c4_i32 : i32
    %c1_i32 = arith.constant 1 : i32
    scf.for %arg6 = %c0_i32 to %0 step %c1_i32  : i32 {
      %cst_19 = arith.constant 0.000000e+00 : f32
      %39 = vector.broadcast %cst_19 : f32 to vector<4x64xf32>
      %c0_i32_20 = arith.constant 0 : i32
      %40 = arith.addi %arg6, %c0_i32_20 : i32
      %c0_21 = arith.constant 0 : index
      %41 = arith.index_cast %40 : i32 to index
      %c0_22 = arith.constant 0 : index
      %c0_23 = arith.constant 0 : index
      %42 = vector.load %arg1[%c0_21, %41, %c0_22, %c0_23] : memref<4x5x5x32xbf16, #tpu.memory_space<vmem>>, vector<1x1x4x32xbf16>
      %43 = vector.shape_cast %42 : vector<1x1x4x32xbf16> to vector<4x32xbf16>
      %c0_24 = arith.constant 0 : index
      %c0_25 = arith.constant 0 : index
      %c0_26 = arith.constant 0 : index
      %44 = vector.load %arg2[%c0_24, %c0_25, %c0_26] : memref<16x32x64xbf16, #tpu.memory_space<vmem>>, vector<1x32x64xbf16>
      %45 = vector.shape_cast %44 : vector<1x32x64xbf16> to vector<32x64xbf16>
      %cst_27 = arith.constant dense<0.000000e+00> : vector<4x64xf32>
      %46 = tpu.matmul %43, %45, %cst_27 {dimension_numbers = #tpu.dot_dimension_numbers<[1], [0], [0], [1], [0, 0, 1, 1], [], []>} : vector<4x32xbf16>, vector<32x64xbf16>, vector<4x64xf32> -> vector<4x64xf32>
      %47 = arith.addf %39, %46 : vector<4x64xf32>
      %c0_i32_28 = arith.constant 0 : i32
      %48 = arith.addi %arg6, %c0_i32_28 : i32
      %c1 = arith.constant 1 : index
      %49 = arith.index_cast %48 : i32 to index
      %c0_29 = arith.constant 0 : index
      %c0_30 = arith.constant 0 : index
      %50 = vector.load %arg1[%c1, %49, %c0_29, %c0_30] : memref<4x5x5x32xbf16, #tpu.memory_space<vmem>>, vector<1x1x4x32xbf16>
      %51 = vector.shape_cast %50 : vector<1x1x4x32xbf16> to vector<4x32xbf16>
      %c1_31 = arith.constant 1 : index
      %c0_32 = arith.constant 0 : index
      %c0_33 = arith.constant 0 : index
      %52 = vector.load %arg2[%c1_31, %c0_32, %c0_33] : memref<16x32x64xbf16, #tpu.memory_space<vmem>>, vector<1x32x64xbf16>
      %53 = vector.shape_cast %52 : vector<1x32x64xbf16> to vector<32x64xbf16>
      %cst_34 = arith.constant dense<0.000000e+00> : vector<4x64xf32>
      %54 = tpu.matmul %51, %53, %cst_34 {dimension_numbers = #tpu.dot_dimension_numbers<[1], [0], [0], [1], [0, 0, 1, 1], [], []>} : vector<4x32xbf16>, vector<32x64xbf16>, vector<4x64xf32> -> vector<4x64xf32>
      %55 = arith.addf %47, %54 : vector<4x64xf32>
      %c0_i32_35 = arith.constant 0 : i32
      %56 = arith.addi %arg6, %c0_i32_35 : i32
      %c0_36 = arith.constant 0 : index
      %57 = arith.index_cast %56 : i32 to index
      %c1_37 = arith.constant 1 : index
      %c0_38 = arith.constant 0 : index
      %58 = vector.load %arg1[%c0_36, %57, %c1_37, %c0_38] : memref<4x5x5x32xbf16, #tpu.memory_space<vmem>>, vector<1x1x4x32xbf16>
      %59 = vector.shape_cast %58 : vector<1x1x4x32xbf16> to vector<4x32xbf16>
      %c2 = arith.constant 2 : index
      %c0_39 = arith.constant 0 : index
      %c0_40 = arith.constant 0 : index
      %60 = vector.load %arg2[%c2, %c0_39, %c0_40] : memref<16x32x64xbf16, #tpu.memory_space<vmem>>, vector<1x32x64xbf16>
      %61 = vector.shape_cast %60 : vector<1x32x64xbf16> to vector<32x64xbf16>
      %cst_41 = arith.constant dense<0.000000e+00> : vector<4x64xf32>
      %62 = tpu.matmul %59, %61, %cst_41 {dimension_numbers = #tpu.dot_dimension_numbers<[1], [0], [0], [1], [0, 0, 1, 1], [], []>} : vector<4x32xbf16>, vector<32x64xbf16>, vector<4x64xf32> -> vector<4x64xf32>
      %63 = arith.addf %55, %62 : vector<4x64xf32>
      %c0_i32_42 = arith.constant 0 : i32
      %64 = arith.addi %arg6, %c0_i32_42 : i32
      %c1_43 = arith.constant 1 : index
      %65 = arith.index_cast %64 : i32 to index
      %c1_44 = arith.constant 1 : index
      %c0_45 = arith.constant 0 : index
      %66 = vector.load %arg1[%c1_43, %65, %c1_44, %c0_45] : memref<4x5x5x32xbf16, #tpu.memory_space<vmem>>, vector<1x1x4x32xbf16>
      %67 = vector.shape_cast %66 : vector<1x1x4x32xbf16> to vector<4x32xbf16>
      %c3 = arith.constant 3 : index
      %c0_46 = arith.constant 0 : index
      %c0_47 = arith.constant 0 : index
      %68 = vector.load %arg2[%c3, %c0_46, %c0_47] : memref<16x32x64xbf16, #tpu.memory_space<vmem>>, vector<1x32x64xbf16>
      %69 = vector.shape_cast %68 : vector<1x32x64xbf16> to vector<32x64xbf16>
      %cst_48 = arith.constant dense<0.000000e+00> : vector<4x64xf32>
      %70 = tpu.matmul %67, %69, %cst_48 {dimension_numbers = #tpu.dot_dimension_numbers<[1], [0], [0], [1], [0, 0, 1, 1], [], []>} : vector<4x32xbf16>, vector<32x64xbf16>, vector<4x64xf32> -> vector<4x64xf32>
      %71 = arith.addf %63, %70 : vector<4x64xf32>
      %c0_i32_49 = arith.constant 0 : i32
      %72 = arith.addi %arg6, %c0_i32_49 : i32
      %c2_50 = arith.constant 2 : index
      %73 = arith.index_cast %72 : i32 to index
      %c0_51 = arith.constant 0 : index
      %c0_52 = arith.constant 0 : index
      %74 = vector.load %arg1[%c2_50, %73, %c0_51, %c0_52] : memref<4x5x5x32xbf16, #tpu.memory_space<vmem>>, vector<1x1x4x32xbf16>
      %75 = vector.shape_cast %74 : vector<1x1x4x32xbf16> to vector<4x32xbf16>
      %c4 = arith.constant 4 : index
      %c0_53 = arith.constant 0 : index
      %c0_54 = arith.constant 0 : index
      %76 = vector.load %arg2[%c4, %c0_53, %c0_54] : memref<16x32x64xbf16, #tpu.memory_space<vmem>>, vector<1x32x64xbf16>
      %77 = vector.shape_cast %76 : vector<1x32x64xbf16> to vector<32x64xbf16>
      %cst_55 = arith.constant dense<0.000000e+00> : vector<4x64xf32>
      %78 = tpu.matmul %75, %77, %cst_55 {dimension_numbers = #tpu.dot_dimension_numbers<[1], [0], [0], [1], [0, 0, 1, 1], [], []>} : vector<4x32xbf16>, vector<32x64xbf16>, vector<4x64xf32> -> vector<4x64xf32>
      %79 = arith.addf %71, %78 : vector<4x64xf32>
      %c0_i32_56 = arith.constant 0 : i32
      %80 = arith.addi %arg6, %c0_i32_56 : i32
      %c3_57 = arith.constant 3 : index
      %81 = arith.index_cast %80 : i32 to index
      %c0_58 = arith.constant 0 : index
      %c0_59 = arith.constant 0 : index
      %82 = vector.load %arg1[%c3_57, %81, %c0_58, %c0_59] : memref<4x5x5x32xbf16, #tpu.memory_space<vmem>>, vector<1x1x4x32xbf16>
      %83 = vector.shape_cast %82 : vector<1x1x4x32xbf16> to vector<4x32xbf16>
      %c5 = arith.constant 5 : index
      %c0_60 = arith.constant 0 : index
      %c0_61 = arith.constant 0 : index
      %84 = vector.load %arg2[%c5, %c0_60, %c0_61] : memref<16x32x64xbf16, #tpu.memory_space<vmem>>, vector<1x32x64xbf16>
      %85 = vector.shape_cast %84 : vector<1x32x64xbf16> to vector<32x64xbf16>
      %cst_62 = arith.constant dense<0.000000e+00> : vector<4x64xf32>
      %86 = tpu.matmul %83, %85, %cst_62 {dimension_numbers = #tpu.dot_dimension_numbers<[1], [0], [0], [1], [0, 0, 1, 1], [], []>} : vector<4x32xbf16>, vector<32x64xbf16>, vector<4x64xf32> -> vector<4x64xf32>
      %87 = arith.addf %79, %86 : vector<4x64xf32>
      %c0_i32_63 = arith.constant 0 : i32
      %88 = arith.addi %arg6, %c0_i32_63 : i32
      %c2_64 = arith.constant 2 : index
      %89 = arith.index_cast %88 : i32 to index
      %c1_65 = arith.constant 1 : index
      %c0_66 = arith.constant 0 : index
      %90 = vector.load %arg1[%c2_64, %89, %c1_65, %c0_66] : memref<4x5x5x32xbf16, #tpu.memory_space<vmem>>, vector<1x1x4x32xbf16>
      %91 = vector.shape_cast %90 : vector<1x1x4x32xbf16> to vector<4x32xbf16>
      %c6 = arith.constant 6 : index
      %c0_67 = arith.constant 0 : index
      %c0_68 = arith.constant 0 : index
      %92 = vector.load %arg2[%c6, %c0_67, %c0_68] : memref<16x32x64xbf16, #tpu.memory_space<vmem>>, vector<1x32x64xbf16>
      %93 = vector.shape_cast %92 : vector<1x32x64xbf16> to vector<32x64xbf16>
      %cst_69 = arith.constant dense<0.000000e+00> : vector<4x64xf32>
      %94 = tpu.matmul %91, %93, %cst_69 {dimension_numbers = #tpu.dot_dimension_numbers<[1], [0], [0], [1], [0, 0, 1, 1], [], []>} : vector<4x32xbf16>, vector<32x64xbf16>, vector<4x64xf32> -> vector<4x64xf32>
      %95 = arith.addf %87, %94 : vector<4x64xf32>
      %c0_i32_70 = arith.constant 0 : i32
      %96 = arith.addi %arg6, %c0_i32_70 : i32
      %c3_71 = arith.constant 3 : index
      %97 = arith.index_cast %96 : i32 to index
      %c1_72 = arith.constant 1 : index
      %c0_73 = arith.constant 0 : index
      %98 = vector.load %arg1[%c3_71, %97, %c1_72, %c0_73] : memref<4x5x5x32xbf16, #tpu.memory_space<vmem>>, vector<1x1x4x32xbf16>
      %99 = vector.shape_cast %98 : vector<1x1x4x32xbf16> to vector<4x32xbf16>
      %c7 = arith.constant 7 : index
      %c0_74 = arith.constant 0 : index
      %c0_75 = arith.constant 0 : index
      %100 = vector.load %arg2[%c7, %c0_74, %c0_75] : memref<16x32x64xbf16, #tpu.memory_space<vmem>>, vector<1x32x64xbf16>
      %101 = vector.shape_cast %100 : vector<1x32x64xbf16> to vector<32x64xbf16>
      %cst_76 = arith.constant dense<0.000000e+00> : vector<4x64xf32>
      %102 = tpu.matmul %99, %101, %cst_76 {dimension_numbers = #tpu.dot_dimension_numbers<[1], [0], [0], [1], [0, 0, 1, 1], [], []>} : vector<4x32xbf16>, vector<32x64xbf16>, vector<4x64xf32> -> vector<4x64xf32>
      %103 = arith.addf %95, %102 : vector<4x64xf32>
      %c1_i32_77 = arith.constant 1 : i32
      %104 = arith.addi %arg6, %c1_i32_77 : i32
      %c0_78 = arith.constant 0 : index
      %105 = arith.index_cast %104 : i32 to index
      %c0_79 = arith.constant 0 : index
      %c0_80 = arith.constant 0 : index
      %106 = vector.load %arg1[%c0_78, %105, %c0_79, %c0_80] : memref<4x5x5x32xbf16, #tpu.memory_space<vmem>>, vector<1x1x4x32xbf16>
      %107 = vector.shape_cast %106 : vector<1x1x4x32xbf16> to vector<4x32xbf16>
      %c8 = arith.constant 8 : index
      %c0_81 = arith.constant 0 : index
      %c0_82 = arith.constant 0 : index
      %108 = vector.load %arg2[%c8, %c0_81, %c0_82] : memref<16x32x64xbf16, #tpu.memory_space<vmem>>, vector<1x32x64xbf16>
      %109 = vector.shape_cast %108 : vector<1x32x64xbf16> to vector<32x64xbf16>
      %cst_83 = arith.constant dense<0.000000e+00> : vector<4x64xf32>
      %110 = tpu.matmul %107, %109, %cst_83 {dimension_numbers = #tpu.dot_dimension_numbers<[1], [0], [0], [1], [0, 0, 1, 1], [], []>} : vector<4x32xbf16>, vector<32x64xbf16>, vector<4x64xf32> -> vector<4x64xf32>
      %111 = arith.addf %103, %110 : vector<4x64xf32>
      %c1_i32_84 = arith.constant 1 : i32
      %112 = arith.addi %arg6, %c1_i32_84 : i32
      %c1_85 = arith.constant 1 : index
      %113 = arith.index_cast %112 : i32 to index
      %c0_86 = arith.constant 0 : index
      %c0_87 = arith.constant 0 : index
      %114 = vector.load %arg1[%c1_85, %113, %c0_86, %c0_87] : memref<4x5x5x32xbf16, #tpu.memory_space<vmem>>, vector<1x1x4x32xbf16>
      %115 = vector.shape_cast %114 : vector<1x1x4x32xbf16> to vector<4x32xbf16>
      %c9 = arith.constant 9 : index
      %c0_88 = arith.constant 0 : index
      %c0_89 = arith.constant 0 : index
      %116 = vector.load %arg2[%c9, %c0_88, %c0_89] : memref<16x32x64xbf16, #tpu.memory_space<vmem>>, vector<1x32x64xbf16>
      %117 = vector.shape_cast %116 : vector<1x32x64xbf16> to vector<32x64xbf16>
      %cst_90 = arith.constant dense<0.000000e+00> : vector<4x64xf32>
      %118 = tpu.matmul %115, %117, %cst_90 {dimension_numbers = #tpu.dot_dimension_numbers<[1], [0], [0], [1], [0, 0, 1, 1], [], []>} : vector<4x32xbf16>, vector<32x64xbf16>, vector<4x64xf32> -> vector<4x64xf32>
      %119 = arith.addf %111, %118 : vector<4x64xf32>
      %c1_i32_91 = arith.constant 1 : i32
      %120 = arith.addi %arg6, %c1_i32_91 : i32
      %c0_92 = arith.constant 0 : index
      %121 = arith.index_cast %120 : i32 to index
      %c1_93 = arith.constant 1 : index
      %c0_94 = arith.constant 0 : index
      %122 = vector.load %arg1[%c0_92, %121, %c1_93, %c0_94] : memref<4x5x5x32xbf16, #tpu.memory_space<vmem>>, vector<1x1x4x32xbf16>
      %123 = vector.shape_cast %122 : vector<1x1x4x32xbf16> to vector<4x32xbf16>
      %c10 = arith.constant 10 : index
      %c0_95 = arith.constant 0 : index
      %c0_96 = arith.constant 0 : index
      %124 = vector.load %arg2[%c10, %c0_95, %c0_96] : memref<16x32x64xbf16, #tpu.memory_space<vmem>>, vector<1x32x64xbf16>
      %125 = vector.shape_cast %124 : vector<1x32x64xbf16> to vector<32x64xbf16>
      %cst_97 = arith.constant dense<0.000000e+00> : vector<4x64xf32>
      %126 = tpu.matmul %123, %125, %cst_97 {dimension_numbers = #tpu.dot_dimension_numbers<[1], [0], [0], [1], [0, 0, 1, 1], [], []>} : vector<4x32xbf16>, vector<32x64xbf16>, vector<4x64xf32> -> vector<4x64xf32>
      %127 = arith.addf %119, %126 : vector<4x64xf32>
      %c1_i32_98 = arith.constant 1 : i32
      %128 = arith.addi %arg6, %c1_i32_98 : i32
      %c1_99 = arith.constant 1 : index
      %129 = arith.index_cast %128 : i32 to index
      %c1_100 = arith.constant 1 : index
      %c0_101 = arith.constant 0 : index
      %130 = vector.load %arg1[%c1_99, %129, %c1_100, %c0_101] : memref<4x5x5x32xbf16, #tpu.memory_space<vmem>>, vector<1x1x4x32xbf16>
      %131 = vector.shape_cast %130 : vector<1x1x4x32xbf16> to vector<4x32xbf16>
      %c11 = arith.constant 11 : index
      %c0_102 = arith.constant 0 : index
      %c0_103 = arith.constant 0 : index
      %132 = vector.load %arg2[%c11, %c0_102, %c0_103] : memref<16x32x64xbf16, #tpu.memory_space<vmem>>, vector<1x32x64xbf16>
      %133 = vector.shape_cast %132 : vector<1x32x64xbf16> to vector<32x64xbf16>
      %cst_104 = arith.constant dense<0.000000e+00> : vector<4x64xf32>
      %134 = tpu.matmul %131, %133, %cst_104 {dimension_numbers = #tpu.dot_dimension_numbers<[1], [0], [0], [1], [0, 0, 1, 1], [], []>} : vector<4x32xbf16>, vector<32x64xbf16>, vector<4x64xf32> -> vector<4x64xf32>
      %135 = arith.addf %127, %134 : vector<4x64xf32>
      %c1_i32_105 = arith.constant 1 : i32
      %136 = arith.addi %arg6, %c1_i32_105 : i32
      %c2_106 = arith.constant 2 : index
      %137 = arith.index_cast %136 : i32 to index
      %c0_107 = arith.constant 0 : index
      %c0_108 = arith.constant 0 : index
      %138 = vector.load %arg1[%c2_106, %137, %c0_107, %c0_108] : memref<4x5x5x32xbf16, #tpu.memory_space<vmem>>, vector<1x1x4x32xbf16>
      %139 = vector.shape_cast %138 : vector<1x1x4x32xbf16> to vector<4x32xbf16>
      %c12 = arith.constant 12 : index
      %c0_109 = arith.constant 0 : index
      %c0_110 = arith.constant 0 : index
      %140 = vector.load %arg2[%c12, %c0_109, %c0_110] : memref<16x32x64xbf16, #tpu.memory_space<vmem>>, vector<1x32x64xbf16>
      %141 = vector.shape_cast %140 : vector<1x32x64xbf16> to vector<32x64xbf16>
      %cst_111 = arith.constant dense<0.000000e+00> : vector<4x64xf32>
      %142 = tpu.matmul %139, %141, %cst_111 {dimension_numbers = #tpu.dot_dimension_numbers<[1], [0], [0], [1], [0, 0, 1, 1], [], []>} : vector<4x32xbf16>, vector<32x64xbf16>, vector<4x64xf32> -> vector<4x64xf32>
      %143 = arith.addf %135, %142 : vector<4x64xf32>
      %c1_i32_112 = arith.constant 1 : i32
      %144 = arith.addi %arg6, %c1_i32_112 : i32
      %c3_113 = arith.constant 3 : index
      %145 = arith.index_cast %144 : i32 to index
      %c0_114 = arith.constant 0 : index
      %c0_115 = arith.constant 0 : index
      %146 = vector.load %arg1[%c3_113, %145, %c0_114, %c0_115] : memref<4x5x5x32xbf16, #tpu.memory_space<vmem>>, vector<1x1x4x32xbf16>
      %147 = vector.shape_cast %146 : vector<1x1x4x32xbf16> to vector<4x32xbf16>
      %c13 = arith.constant 13 : index
      %c0_116 = arith.constant 0 : index
      %c0_117 = arith.constant 0 : index
      %148 = vector.load %arg2[%c13, %c0_116, %c0_117] : memref<16x32x64xbf16, #tpu.memory_space<vmem>>, vector<1x32x64xbf16>
      %149 = vector.shape_cast %148 : vector<1x32x64xbf16> to vector<32x64xbf16>
      %cst_118 = arith.constant dense<0.000000e+00> : vector<4x64xf32>
      %150 = tpu.matmul %147, %149, %cst_118 {dimension_numbers = #tpu.dot_dimension_numbers<[1], [0], [0], [1], [0, 0, 1, 1], [], []>} : vector<4x32xbf16>, vector<32x64xbf16>, vector<4x64xf32> -> vector<4x64xf32>
      %151 = arith.addf %143, %150 : vector<4x64xf32>
      %c1_i32_119 = arith.constant 1 : i32
      %152 = arith.addi %arg6, %c1_i32_119 : i32
      %c2_120 = arith.constant 2 : index
      %153 = arith.index_cast %152 : i32 to index
      %c1_121 = arith.constant 1 : index
      %c0_122 = arith.constant 0 : index
      %154 = vector.load %arg1[%c2_120, %153, %c1_121, %c0_122] : memref<4x5x5x32xbf16, #tpu.memory_space<vmem>>, vector<1x1x4x32xbf16>
      %155 = vector.shape_cast %154 : vector<1x1x4x32xbf16> to vector<4x32xbf16>
      %c14 = arith.constant 14 : index
      %c0_123 = arith.constant 0 : index
      %c0_124 = arith.constant 0 : index
      %156 = vector.load %arg2[%c14, %c0_123, %c0_124] : memref<16x32x64xbf16, #tpu.memory_space<vmem>>, vector<1x32x64xbf16>
      %157 = vector.shape_cast %156 : vector<1x32x64xbf16> to vector<32x64xbf16>
      %cst_125 = arith.constant dense<0.000000e+00> : vector<4x64xf32>
      %158 = tpu.matmul %155, %157, %cst_125 {dimension_numbers = #tpu.dot_dimension_numbers<[1], [0], [0], [1], [0, 0, 1, 1], [], []>} : vector<4x32xbf16>, vector<32x64xbf16>, vector<4x64xf32> -> vector<4x64xf32>
      %159 = arith.addf %151, %158 : vector<4x64xf32>
      %c1_i32_126 = arith.constant 1 : i32
      %160 = arith.addi %arg6, %c1_i32_126 : i32
      %c3_127 = arith.constant 3 : index
      %161 = arith.index_cast %160 : i32 to index
      %c1_128 = arith.constant 1 : index
      %c0_129 = arith.constant 0 : index
      %162 = vector.load %arg1[%c3_127, %161, %c1_128, %c0_129] : memref<4x5x5x32xbf16, #tpu.memory_space<vmem>>, vector<1x1x4x32xbf16>
      %163 = vector.shape_cast %162 : vector<1x1x4x32xbf16> to vector<4x32xbf16>
      %c15 = arith.constant 15 : index
      %c0_130 = arith.constant 0 : index
      %c0_131 = arith.constant 0 : index
      %164 = vector.load %arg2[%c15, %c0_130, %c0_131] : memref<16x32x64xbf16, #tpu.memory_space<vmem>>, vector<1x32x64xbf16>
      %165 = vector.shape_cast %164 : vector<1x32x64xbf16> to vector<32x64xbf16>
      %cst_132 = arith.constant dense<0.000000e+00> : vector<4x64xf32>
      %166 = tpu.matmul %163, %165, %cst_132 {dimension_numbers = #tpu.dot_dimension_numbers<[1], [0], [0], [1], [0, 0, 1, 1], [], []>} : vector<4x32xbf16>, vector<32x64xbf16>, vector<4x64xf32> -> vector<4x64xf32>
      %167 = arith.addf %159, %166 : vector<4x64xf32>
      %168 = arith.index_cast %arg6 : i32 to index
      %c0_133 = arith.constant 0 : index
      %c0_134 = arith.constant 0 : index
      %169 = vector.load %arg5[%168, %c0_133, %c0_134] : memref<4x4x64xf32, #tpu.memory_space<vmem>>, vector<1x4x64xf32>
      %170 = vector.shape_cast %169 : vector<1x4x64xf32> to vector<4x64xf32>
      %171 = vector.shape_cast %167 : vector<4x64xf32> to vector<1x4x64xf32>
      tpu.vector_store %arg5[%168, %c0_133, %c0_134], %171 {strides = array<i32>} : memref<4x4x64xf32, #tpu.memory_space<vmem>>, vector<1x4x64xf32>,
    }
    %c4_i32_0 = arith.constant 4 : i32
    %c0 = arith.constant 0 : index
    %c0_1 = arith.constant 0 : index
    %c0_2 = arith.constant 0 : index
    %1 = vector.load %arg5[%c0, %c0_1, %c0_2] : memref<4x4x64xf32, #tpu.memory_space<vmem>>, vector<4x4x64xf32>
    %c0_3 = arith.constant 0 : index
    %c0_4 = arith.constant 0 : index
    %2 = vector.load %arg3[%c0_3, %c0_4] : memref<1x64xf32, #tpu.memory_space<vmem>>, vector<1x64xf32>
    %3 = vector.shape_cast %2 : vector<1x64xf32> to vector<1x1x64xf32>
    %4 = vector.broadcast %3 : vector<1x1x64xf32> to vector<4x4x64xf32>
    %5 = arith.addf %1, %4 : vector<4x4x64xf32>
    %cst = arith.constant dense<0.000000e+00> : vector<4x64xf32>
    %6 = vector.multi_reduction <add>, %5, %cst [0] : vector<4x4x64xf32> to vector<4x64xf32>
    %7 = vector.shape_cast %6 : vector<4x64xf32> to vector<1x4x64xf32>
    %cst_5 = arith.constant 4.000000e+00 : f32
    %8 = vector.broadcast %cst_5 : f32 to vector<1x4x64xf32>
    %9 = arith.divf %7, %8 : vector<1x4x64xf32>
    %cst_6 = arith.constant dense<0.000000e+00> : vector<1x64xf32>
    %10 = vector.multi_reduction <add>, %9, %cst_6 [1] : vector<1x4x64xf32> to vector<1x64xf32>
    %11 = vector.shape_cast %10 : vector<1x64xf32> to vector<1x1x64xf32>
    %cst_7 = arith.constant 4.000000e+00 : f32
    %12 = vector.broadcast %cst_7 : f32 to vector<1x1x64xf32>
    %13 = arith.divf %11, %12 : vector<1x1x64xf32>
    %14 = vector.broadcast %13 : vector<1x1x64xf32> to vector<4x4x64xf32>
    %15 = arith.subf %5, %14 : vector<4x4x64xf32>
    %16 = arith.mulf %15, %15 : vector<4x4x64xf32>
    %cst_8 = arith.constant dense<0.000000e+00> : vector<4x64xf32>
    %17 = vector.multi_reduction <add>, %16, %cst_8 [0] : vector<4x4x64xf32> to vector<4x64xf32>
    %18 = vector.shape_cast %17 : vector<4x64xf32> to vector<1x4x64xf32>
    %cst_9 = arith.constant 4.000000e+00 : f32
    %19 = vector.broadcast %cst_9 : f32 to vector<1x4x64xf32>
    %20 = arith.divf %18, %19 : vector<1x4x64xf32>
    %cst_10 = arith.constant dense<0.000000e+00> : vector<1x64xf32>
    %21 = vector.multi_reduction <add>, %20, %cst_10 [1] : vector<1x4x64xf32> to vector<1x64xf32>
    %22 = vector.shape_cast %21 : vector<1x64xf32> to vector<1x1x64xf32>
    %cst_11 = arith.constant 4.000000e+00 : f32
    %23 = vector.broadcast %cst_11 : f32 to vector<1x1x64xf32>
    %24 = arith.divf %22, %23 : vector<1x1x64xf32>
    %cst_12 = arith.constant 9.99999974E-6 : f32
    %25 = vector.broadcast %cst_12 : f32 to vector<1x1x64xf32>
    %26 = arith.addf %24, %25 : vector<1x1x64xf32>
    %27 = math.rsqrt %26 : vector<1x1x64xf32>
    %28 = vector.broadcast %27 : vector<1x1x64xf32> to vector<4x4x64xf32>
    %29 = arith.mulf %15, %28 : vector<4x4x64xf32>
    %cst_13 = arith.constant 0.000000e+00 : f32
    %30 = vector.broadcast %cst_13 : f32 to vector<4x4x64xf32>
    %31 = arith.cmpf oge, %29, %30 : vector<4x4x64xf32>
    %cst_14 = arith.constant 2.000000e-01 : f32
    %32 = vector.broadcast %cst_14 : f32 to vector<4x4x64xf32>
    %33 = arith.mulf %32, %29 : vector<4x4x64xf32>
    %34 = arith.select %31, %29, %33 : vector<4x4x64xi1>, vector<4x4x64xf32>
    %35 = arith.truncf %34 : vector<4x4x64xf32> to vector<4x4x64xbf16>
    %c0_15 = arith.constant 0 : index
    %c0_16 = arith.constant 0 : index
    %c0_17 = arith.constant 0 : index
    %c0_18 = arith.constant 0 : index
    %36 = vector.load %arg4[%c0_15, %c0_16, %c0_17, %c0_18] : memref<1x4x4x64xbf16, #tpu.memory_space<vmem>>, vector<1x4x4x64xbf16>
    %37 = vector.shape_cast %36 : vector<1x4x4x64xbf16> to vector<4x4x64xbf16>
    %38 = vector.shape_cast %35 : vector<4x4x64xbf16> to vector<1x4x4x64xbf16>
    tpu.vector_store %arg4[%c0_15, %c0_16, %c0_17, %c0_18], %38 {strides = array<i32>} : memref<1x4x4x64xbf16, #tpu.memory_space<vmem>>, vector<1x4x4x64xbf16>,
    return
  }
  func.func @transform_0(%arg0: i32) -> (i32, i32, i32, i32) {
    %c0_i32 = arith.constant 0 : i32
    %c0_i32_0 = arith.constant 0 : i32
    %c0_i32_1 = arith.constant 0 : i32
    %c0_i32_2 = arith.constant 0 : i32
    return %arg0, %c0_i32, %c0_i32_0, %c0_i32_1 : i32, i32, i32, i32
  }
  func.func @transform_1(%arg0: i32) -> (i32, i32, i32) {
    %c0_i32 = arith.constant 0 : i32
    %c0_i32_0 = arith.constant 0 : i32
    %c0_i32_1 = arith.constant 0 : i32
    %c0_i32_2 = arith.constant 0 : i32
    return %c0_i32, %c0_i32_0, %c0_i32_1 : i32, i32, i32
  }
  func.func @transform_2(%arg0: i32) -> (i32, i32) {
    %c0_i32 = arith.constant 0 : i32
    %c0_i32_0 = arith.constant 0 : i32
    %c0_i32_1 = arith.constant 0 : i32
    return %c0_i32, %c0_i32_0 : i32, i32
  }
  func.func @transform_3(%arg0: i32) -> (i32, i32, i32, i32) {
    %c0_i32 = arith.constant 0 : i32
    %c0_i32_0 = arith.constant 0 : i32
    %c0_i32_1 = arith.constant 0 : i32
    %c0_i32_2 = arith.constant 0 : i32
    return %arg0, %c0_i32, %c0_i32_0, %c0_i32_1 : i32, i32, i32, i32
  }
}

module attributes {stable_mosaic.version = 11 : i64} {
  func.func @_conv_block_kernel(%arg0: i32, %arg1: memref<1x6x6x64xbf16, #tpu.memory_space<vmem>>, %arg2: memref<16x64x128xbf16, #tpu.memory_space<vmem>>, %arg3: memref<1x128xf32, #tpu.memory_space<vmem>>, %arg4: memref<1x3x3x128xbf16, #tpu.memory_space<vmem>>, %arg5: memref<3x3x128xf32, #tpu.memory_space<vmem>>) attributes {dimension_semantics = [#tpu.dimension_semantics<parallel>], iteration_bounds = array<i64: 2>, scalar_prefetch = 0 : i64, scratch_operands = 1 : i64, tpu.core_type = #tpu.core_type<tc>, window_params = [{transform_indices = @transform_0, window_bounds = array<i64: 1, 6, 6, 64>}, {pipeline_mode = #tpu.pipeline_mode<synchronous>, transform_indices = @transform_1, window_bounds = array<i64: 16, 64, 128>}, {pipeline_mode = #tpu.pipeline_mode<synchronous>, transform_indices = @transform_2, window_bounds = array<i64: 1, 128>}, {transform_indices = @transform_3, window_bounds = array<i64: 1, 3, 3, 128>}]} {
    %c0_i32 = arith.constant 0 : i32
    %c3_i32 = arith.constant 3 : i32
    %0 = arith.addi %c0_i32, %c3_i32 : i32
    %c1_i32 = arith.constant 1 : i32
    scf.for %arg6 = %c0_i32 to %0 step %c1_i32  : i32 {
      %cst_19 = arith.constant 0.000000e+00 : f32
      %39 = vector.broadcast %cst_19 : f32 to vector<3x128xf32>
      %c0_i32_20 = arith.constant 0 : i32
      %40 = arith.addi %arg6, %c0_i32_20 : i32
      %c0_21 = arith.constant 0 : index
      %41 = arith.index_cast %40 : i32 to index
      %c0_22 = arith.constant 0 : index
      %c0_23 = arith.constant 0 : index
      %42 = vector.load %arg1[%c0_21, %41, %c0_22, %c0_23] : memref<1x6x6x64xbf16, #tpu.memory_space<vmem>>, vector<1x1x3x64xbf16>
      %43 = vector.shape_cast %42 : vector<1x1x3x64xbf16> to vector<3x64xbf16>
      %c0_24 = arith.constant 0 : index
      %c0_25 = arith.constant 0 : index
      %c0_26 = arith.constant 0 : index
      %44 = vector.load %arg2[%c0_24, %c0_25, %c0_26] : memref<16x64x128xbf16, #tpu.memory_space<vmem>>, vector<1x64x128xbf16>
      %45 = vector.shape_cast %44 : vector<1x64x128xbf16> to vector<64x128xbf16>
      %cst_27 = arith.constant dense<0.000000e+00> : vector<3x128xf32>
      %46 = tpu.matmul %43, %45, %cst_27 {dimension_numbers = #tpu.dot_dimension_numbers<[1], [0], [0], [1], [0, 0, 1, 1], [], []>} : vector<3x64xbf16>, vector<64x128xbf16>, vector<3x128xf32> -> vector<3x128xf32>
      %47 = arith.addf %39, %46 : vector<3x128xf32>
      %c0_i32_28 = arith.constant 0 : i32
      %48 = arith.addi %arg6, %c0_i32_28 : i32
      %c0_29 = arith.constant 0 : index
      %49 = arith.index_cast %48 : i32 to index
      %c1 = arith.constant 1 : index
      %c0_30 = arith.constant 0 : index
      %50 = vector.load %arg1[%c0_29, %49, %c1, %c0_30] : memref<1x6x6x64xbf16, #tpu.memory_space<vmem>>, vector<1x1x3x64xbf16>
      %51 = vector.shape_cast %50 : vector<1x1x3x64xbf16> to vector<3x64xbf16>
      %c1_31 = arith.constant 1 : index
      %c0_32 = arith.constant 0 : index
      %c0_33 = arith.constant 0 : index
      %52 = vector.load %arg2[%c1_31, %c0_32, %c0_33] : memref<16x64x128xbf16, #tpu.memory_space<vmem>>, vector<1x64x128xbf16>
      %53 = vector.shape_cast %52 : vector<1x64x128xbf16> to vector<64x128xbf16>
      %cst_34 = arith.constant dense<0.000000e+00> : vector<3x128xf32>
      %54 = tpu.matmul %51, %53, %cst_34 {dimension_numbers = #tpu.dot_dimension_numbers<[1], [0], [0], [1], [0, 0, 1, 1], [], []>} : vector<3x64xbf16>, vector<64x128xbf16>, vector<3x128xf32> -> vector<3x128xf32>
      %55 = arith.addf %47, %54 : vector<3x128xf32>
      %c0_i32_35 = arith.constant 0 : i32
      %56 = arith.addi %arg6, %c0_i32_35 : i32
      %c0_36 = arith.constant 0 : index
      %57 = arith.index_cast %56 : i32 to index
      %c2 = arith.constant 2 : index
      %c0_37 = arith.constant 0 : index
      %58 = vector.load %arg1[%c0_36, %57, %c2, %c0_37] : memref<1x6x6x64xbf16, #tpu.memory_space<vmem>>, vector<1x1x3x64xbf16>
      %59 = vector.shape_cast %58 : vector<1x1x3x64xbf16> to vector<3x64xbf16>
      %c2_38 = arith.constant 2 : index
      %c0_39 = arith.constant 0 : index
      %c0_40 = arith.constant 0 : index
      %60 = vector.load %arg2[%c2_38, %c0_39, %c0_40] : memref<16x64x128xbf16, #tpu.memory_space<vmem>>, vector<1x64x128xbf16>
      %61 = vector.shape_cast %60 : vector<1x64x128xbf16> to vector<64x128xbf16>
      %cst_41 = arith.constant dense<0.000000e+00> : vector<3x128xf32>
      %62 = tpu.matmul %59, %61, %cst_41 {dimension_numbers = #tpu.dot_dimension_numbers<[1], [0], [0], [1], [0, 0, 1, 1], [], []>} : vector<3x64xbf16>, vector<64x128xbf16>, vector<3x128xf32> -> vector<3x128xf32>
      %63 = arith.addf %55, %62 : vector<3x128xf32>
      %c0_i32_42 = arith.constant 0 : i32
      %64 = arith.addi %arg6, %c0_i32_42 : i32
      %c0_43 = arith.constant 0 : index
      %65 = arith.index_cast %64 : i32 to index
      %c3 = arith.constant 3 : index
      %c0_44 = arith.constant 0 : index
      %66 = vector.load %arg1[%c0_43, %65, %c3, %c0_44] : memref<1x6x6x64xbf16, #tpu.memory_space<vmem>>, vector<1x1x3x64xbf16>
      %67 = vector.shape_cast %66 : vector<1x1x3x64xbf16> to vector<3x64xbf16>
      %c3_45 = arith.constant 3 : index
      %c0_46 = arith.constant 0 : index
      %c0_47 = arith.constant 0 : index
      %68 = vector.load %arg2[%c3_45, %c0_46, %c0_47] : memref<16x64x128xbf16, #tpu.memory_space<vmem>>, vector<1x64x128xbf16>
      %69 = vector.shape_cast %68 : vector<1x64x128xbf16> to vector<64x128xbf16>
      %cst_48 = arith.constant dense<0.000000e+00> : vector<3x128xf32>
      %70 = tpu.matmul %67, %69, %cst_48 {dimension_numbers = #tpu.dot_dimension_numbers<[1], [0], [0], [1], [0, 0, 1, 1], [], []>} : vector<3x64xbf16>, vector<64x128xbf16>, vector<3x128xf32> -> vector<3x128xf32>
      %71 = arith.addf %63, %70 : vector<3x128xf32>
      %c1_i32_49 = arith.constant 1 : i32
      %72 = arith.addi %arg6, %c1_i32_49 : i32
      %c0_50 = arith.constant 0 : index
      %73 = arith.index_cast %72 : i32 to index
      %c0_51 = arith.constant 0 : index
      %c0_52 = arith.constant 0 : index
      %74 = vector.load %arg1[%c0_50, %73, %c0_51, %c0_52] : memref<1x6x6x64xbf16, #tpu.memory_space<vmem>>, vector<1x1x3x64xbf16>
      %75 = vector.shape_cast %74 : vector<1x1x3x64xbf16> to vector<3x64xbf16>
      %c4 = arith.constant 4 : index
      %c0_53 = arith.constant 0 : index
      %c0_54 = arith.constant 0 : index
      %76 = vector.load %arg2[%c4, %c0_53, %c0_54] : memref<16x64x128xbf16, #tpu.memory_space<vmem>>, vector<1x64x128xbf16>
      %77 = vector.shape_cast %76 : vector<1x64x128xbf16> to vector<64x128xbf16>
      %cst_55 = arith.constant dense<0.000000e+00> : vector<3x128xf32>
      %78 = tpu.matmul %75, %77, %cst_55 {dimension_numbers = #tpu.dot_dimension_numbers<[1], [0], [0], [1], [0, 0, 1, 1], [], []>} : vector<3x64xbf16>, vector<64x128xbf16>, vector<3x128xf32> -> vector<3x128xf32>
      %79 = arith.addf %71, %78 : vector<3x128xf32>
      %c1_i32_56 = arith.constant 1 : i32
      %80 = arith.addi %arg6, %c1_i32_56 : i32
      %c0_57 = arith.constant 0 : index
      %81 = arith.index_cast %80 : i32 to index
      %c1_58 = arith.constant 1 : index
      %c0_59 = arith.constant 0 : index
      %82 = vector.load %arg1[%c0_57, %81, %c1_58, %c0_59] : memref<1x6x6x64xbf16, #tpu.memory_space<vmem>>, vector<1x1x3x64xbf16>
      %83 = vector.shape_cast %82 : vector<1x1x3x64xbf16> to vector<3x64xbf16>
      %c5 = arith.constant 5 : index
      %c0_60 = arith.constant 0 : index
      %c0_61 = arith.constant 0 : index
      %84 = vector.load %arg2[%c5, %c0_60, %c0_61] : memref<16x64x128xbf16, #tpu.memory_space<vmem>>, vector<1x64x128xbf16>
      %85 = vector.shape_cast %84 : vector<1x64x128xbf16> to vector<64x128xbf16>
      %cst_62 = arith.constant dense<0.000000e+00> : vector<3x128xf32>
      %86 = tpu.matmul %83, %85, %cst_62 {dimension_numbers = #tpu.dot_dimension_numbers<[1], [0], [0], [1], [0, 0, 1, 1], [], []>} : vector<3x64xbf16>, vector<64x128xbf16>, vector<3x128xf32> -> vector<3x128xf32>
      %87 = arith.addf %79, %86 : vector<3x128xf32>
      %c1_i32_63 = arith.constant 1 : i32
      %88 = arith.addi %arg6, %c1_i32_63 : i32
      %c0_64 = arith.constant 0 : index
      %89 = arith.index_cast %88 : i32 to index
      %c2_65 = arith.constant 2 : index
      %c0_66 = arith.constant 0 : index
      %90 = vector.load %arg1[%c0_64, %89, %c2_65, %c0_66] : memref<1x6x6x64xbf16, #tpu.memory_space<vmem>>, vector<1x1x3x64xbf16>
      %91 = vector.shape_cast %90 : vector<1x1x3x64xbf16> to vector<3x64xbf16>
      %c6 = arith.constant 6 : index
      %c0_67 = arith.constant 0 : index
      %c0_68 = arith.constant 0 : index
      %92 = vector.load %arg2[%c6, %c0_67, %c0_68] : memref<16x64x128xbf16, #tpu.memory_space<vmem>>, vector<1x64x128xbf16>
      %93 = vector.shape_cast %92 : vector<1x64x128xbf16> to vector<64x128xbf16>
      %cst_69 = arith.constant dense<0.000000e+00> : vector<3x128xf32>
      %94 = tpu.matmul %91, %93, %cst_69 {dimension_numbers = #tpu.dot_dimension_numbers<[1], [0], [0], [1], [0, 0, 1, 1], [], []>} : vector<3x64xbf16>, vector<64x128xbf16>, vector<3x128xf32> -> vector<3x128xf32>
      %95 = arith.addf %87, %94 : vector<3x128xf32>
      %c1_i32_70 = arith.constant 1 : i32
      %96 = arith.addi %arg6, %c1_i32_70 : i32
      %c0_71 = arith.constant 0 : index
      %97 = arith.index_cast %96 : i32 to index
      %c3_72 = arith.constant 3 : index
      %c0_73 = arith.constant 0 : index
      %98 = vector.load %arg1[%c0_71, %97, %c3_72, %c0_73] : memref<1x6x6x64xbf16, #tpu.memory_space<vmem>>, vector<1x1x3x64xbf16>
      %99 = vector.shape_cast %98 : vector<1x1x3x64xbf16> to vector<3x64xbf16>
      %c7 = arith.constant 7 : index
      %c0_74 = arith.constant 0 : index
      %c0_75 = arith.constant 0 : index
      %100 = vector.load %arg2[%c7, %c0_74, %c0_75] : memref<16x64x128xbf16, #tpu.memory_space<vmem>>, vector<1x64x128xbf16>
      %101 = vector.shape_cast %100 : vector<1x64x128xbf16> to vector<64x128xbf16>
      %cst_76 = arith.constant dense<0.000000e+00> : vector<3x128xf32>
      %102 = tpu.matmul %99, %101, %cst_76 {dimension_numbers = #tpu.dot_dimension_numbers<[1], [0], [0], [1], [0, 0, 1, 1], [], []>} : vector<3x64xbf16>, vector<64x128xbf16>, vector<3x128xf32> -> vector<3x128xf32>
      %103 = arith.addf %95, %102 : vector<3x128xf32>
      %c2_i32 = arith.constant 2 : i32
      %104 = arith.addi %arg6, %c2_i32 : i32
      %c0_77 = arith.constant 0 : index
      %105 = arith.index_cast %104 : i32 to index
      %c0_78 = arith.constant 0 : index
      %c0_79 = arith.constant 0 : index
      %106 = vector.load %arg1[%c0_77, %105, %c0_78, %c0_79] : memref<1x6x6x64xbf16, #tpu.memory_space<vmem>>, vector<1x1x3x64xbf16>
      %107 = vector.shape_cast %106 : vector<1x1x3x64xbf16> to vector<3x64xbf16>
      %c8 = arith.constant 8 : index
      %c0_80 = arith.constant 0 : index
      %c0_81 = arith.constant 0 : index
      %108 = vector.load %arg2[%c8, %c0_80, %c0_81] : memref<16x64x128xbf16, #tpu.memory_space<vmem>>, vector<1x64x128xbf16>
      %109 = vector.shape_cast %108 : vector<1x64x128xbf16> to vector<64x128xbf16>
      %cst_82 = arith.constant dense<0.000000e+00> : vector<3x128xf32>
      %110 = tpu.matmul %107, %109, %cst_82 {dimension_numbers = #tpu.dot_dimension_numbers<[1], [0], [0], [1], [0, 0, 1, 1], [], []>} : vector<3x64xbf16>, vector<64x128xbf16>, vector<3x128xf32> -> vector<3x128xf32>
      %111 = arith.addf %103, %110 : vector<3x128xf32>
      %c2_i32_83 = arith.constant 2 : i32
      %112 = arith.addi %arg6, %c2_i32_83 : i32
      %c0_84 = arith.constant 0 : index
      %113 = arith.index_cast %112 : i32 to index
      %c1_85 = arith.constant 1 : index
      %c0_86 = arith.constant 0 : index
      %114 = vector.load %arg1[%c0_84, %113, %c1_85, %c0_86] : memref<1x6x6x64xbf16, #tpu.memory_space<vmem>>, vector<1x1x3x64xbf16>
      %115 = vector.shape_cast %114 : vector<1x1x3x64xbf16> to vector<3x64xbf16>
      %c9 = arith.constant 9 : index
      %c0_87 = arith.constant 0 : index
      %c0_88 = arith.constant 0 : index
      %116 = vector.load %arg2[%c9, %c0_87, %c0_88] : memref<16x64x128xbf16, #tpu.memory_space<vmem>>, vector<1x64x128xbf16>
      %117 = vector.shape_cast %116 : vector<1x64x128xbf16> to vector<64x128xbf16>
      %cst_89 = arith.constant dense<0.000000e+00> : vector<3x128xf32>
      %118 = tpu.matmul %115, %117, %cst_89 {dimension_numbers = #tpu.dot_dimension_numbers<[1], [0], [0], [1], [0, 0, 1, 1], [], []>} : vector<3x64xbf16>, vector<64x128xbf16>, vector<3x128xf32> -> vector<3x128xf32>
      %119 = arith.addf %111, %118 : vector<3x128xf32>
      %c2_i32_90 = arith.constant 2 : i32
      %120 = arith.addi %arg6, %c2_i32_90 : i32
      %c0_91 = arith.constant 0 : index
      %121 = arith.index_cast %120 : i32 to index
      %c2_92 = arith.constant 2 : index
      %c0_93 = arith.constant 0 : index
      %122 = vector.load %arg1[%c0_91, %121, %c2_92, %c0_93] : memref<1x6x6x64xbf16, #tpu.memory_space<vmem>>, vector<1x1x3x64xbf16>
      %123 = vector.shape_cast %122 : vector<1x1x3x64xbf16> to vector<3x64xbf16>
      %c10 = arith.constant 10 : index
      %c0_94 = arith.constant 0 : index
      %c0_95 = arith.constant 0 : index
      %124 = vector.load %arg2[%c10, %c0_94, %c0_95] : memref<16x64x128xbf16, #tpu.memory_space<vmem>>, vector<1x64x128xbf16>
      %125 = vector.shape_cast %124 : vector<1x64x128xbf16> to vector<64x128xbf16>
      %cst_96 = arith.constant dense<0.000000e+00> : vector<3x128xf32>
      %126 = tpu.matmul %123, %125, %cst_96 {dimension_numbers = #tpu.dot_dimension_numbers<[1], [0], [0], [1], [0, 0, 1, 1], [], []>} : vector<3x64xbf16>, vector<64x128xbf16>, vector<3x128xf32> -> vector<3x128xf32>
      %127 = arith.addf %119, %126 : vector<3x128xf32>
      %c2_i32_97 = arith.constant 2 : i32
      %128 = arith.addi %arg6, %c2_i32_97 : i32
      %c0_98 = arith.constant 0 : index
      %129 = arith.index_cast %128 : i32 to index
      %c3_99 = arith.constant 3 : index
      %c0_100 = arith.constant 0 : index
      %130 = vector.load %arg1[%c0_98, %129, %c3_99, %c0_100] : memref<1x6x6x64xbf16, #tpu.memory_space<vmem>>, vector<1x1x3x64xbf16>
      %131 = vector.shape_cast %130 : vector<1x1x3x64xbf16> to vector<3x64xbf16>
      %c11 = arith.constant 11 : index
      %c0_101 = arith.constant 0 : index
      %c0_102 = arith.constant 0 : index
      %132 = vector.load %arg2[%c11, %c0_101, %c0_102] : memref<16x64x128xbf16, #tpu.memory_space<vmem>>, vector<1x64x128xbf16>
      %133 = vector.shape_cast %132 : vector<1x64x128xbf16> to vector<64x128xbf16>
      %cst_103 = arith.constant dense<0.000000e+00> : vector<3x128xf32>
      %134 = tpu.matmul %131, %133, %cst_103 {dimension_numbers = #tpu.dot_dimension_numbers<[1], [0], [0], [1], [0, 0, 1, 1], [], []>} : vector<3x64xbf16>, vector<64x128xbf16>, vector<3x128xf32> -> vector<3x128xf32>
      %135 = arith.addf %127, %134 : vector<3x128xf32>
      %c3_i32_104 = arith.constant 3 : i32
      %136 = arith.addi %arg6, %c3_i32_104 : i32
      %c0_105 = arith.constant 0 : index
      %137 = arith.index_cast %136 : i32 to index
      %c0_106 = arith.constant 0 : index
      %c0_107 = arith.constant 0 : index
      %138 = vector.load %arg1[%c0_105, %137, %c0_106, %c0_107] : memref<1x6x6x64xbf16, #tpu.memory_space<vmem>>, vector<1x1x3x64xbf16>
      %139 = vector.shape_cast %138 : vector<1x1x3x64xbf16> to vector<3x64xbf16>
      %c12 = arith.constant 12 : index
      %c0_108 = arith.constant 0 : index
      %c0_109 = arith.constant 0 : index
      %140 = vector.load %arg2[%c12, %c0_108, %c0_109] : memref<16x64x128xbf16, #tpu.memory_space<vmem>>, vector<1x64x128xbf16>
      %141 = vector.shape_cast %140 : vector<1x64x128xbf16> to vector<64x128xbf16>
      %cst_110 = arith.constant dense<0.000000e+00> : vector<3x128xf32>
      %142 = tpu.matmul %139, %141, %cst_110 {dimension_numbers = #tpu.dot_dimension_numbers<[1], [0], [0], [1], [0, 0, 1, 1], [], []>} : vector<3x64xbf16>, vector<64x128xbf16>, vector<3x128xf32> -> vector<3x128xf32>
      %143 = arith.addf %135, %142 : vector<3x128xf32>
      %c3_i32_111 = arith.constant 3 : i32
      %144 = arith.addi %arg6, %c3_i32_111 : i32
      %c0_112 = arith.constant 0 : index
      %145 = arith.index_cast %144 : i32 to index
      %c1_113 = arith.constant 1 : index
      %c0_114 = arith.constant 0 : index
      %146 = vector.load %arg1[%c0_112, %145, %c1_113, %c0_114] : memref<1x6x6x64xbf16, #tpu.memory_space<vmem>>, vector<1x1x3x64xbf16>
      %147 = vector.shape_cast %146 : vector<1x1x3x64xbf16> to vector<3x64xbf16>
      %c13 = arith.constant 13 : index
      %c0_115 = arith.constant 0 : index
      %c0_116 = arith.constant 0 : index
      %148 = vector.load %arg2[%c13, %c0_115, %c0_116] : memref<16x64x128xbf16, #tpu.memory_space<vmem>>, vector<1x64x128xbf16>
      %149 = vector.shape_cast %148 : vector<1x64x128xbf16> to vector<64x128xbf16>
      %cst_117 = arith.constant dense<0.000000e+00> : vector<3x128xf32>
      %150 = tpu.matmul %147, %149, %cst_117 {dimension_numbers = #tpu.dot_dimension_numbers<[1], [0], [0], [1], [0, 0, 1, 1], [], []>} : vector<3x64xbf16>, vector<64x128xbf16>, vector<3x128xf32> -> vector<3x128xf32>
      %151 = arith.addf %143, %150 : vector<3x128xf32>
      %c3_i32_118 = arith.constant 3 : i32
      %152 = arith.addi %arg6, %c3_i32_118 : i32
      %c0_119 = arith.constant 0 : index
      %153 = arith.index_cast %152 : i32 to index
      %c2_120 = arith.constant 2 : index
      %c0_121 = arith.constant 0 : index
      %154 = vector.load %arg1[%c0_119, %153, %c2_120, %c0_121] : memref<1x6x6x64xbf16, #tpu.memory_space<vmem>>, vector<1x1x3x64xbf16>
      %155 = vector.shape_cast %154 : vector<1x1x3x64xbf16> to vector<3x64xbf16>
      %c14 = arith.constant 14 : index
      %c0_122 = arith.constant 0 : index
      %c0_123 = arith.constant 0 : index
      %156 = vector.load %arg2[%c14, %c0_122, %c0_123] : memref<16x64x128xbf16, #tpu.memory_space<vmem>>, vector<1x64x128xbf16>
      %157 = vector.shape_cast %156 : vector<1x64x128xbf16> to vector<64x128xbf16>
      %cst_124 = arith.constant dense<0.000000e+00> : vector<3x128xf32>
      %158 = tpu.matmul %155, %157, %cst_124 {dimension_numbers = #tpu.dot_dimension_numbers<[1], [0], [0], [1], [0, 0, 1, 1], [], []>} : vector<3x64xbf16>, vector<64x128xbf16>, vector<3x128xf32> -> vector<3x128xf32>
      %159 = arith.addf %151, %158 : vector<3x128xf32>
      %c3_i32_125 = arith.constant 3 : i32
      %160 = arith.addi %arg6, %c3_i32_125 : i32
      %c0_126 = arith.constant 0 : index
      %161 = arith.index_cast %160 : i32 to index
      %c3_127 = arith.constant 3 : index
      %c0_128 = arith.constant 0 : index
      %162 = vector.load %arg1[%c0_126, %161, %c3_127, %c0_128] : memref<1x6x6x64xbf16, #tpu.memory_space<vmem>>, vector<1x1x3x64xbf16>
      %163 = vector.shape_cast %162 : vector<1x1x3x64xbf16> to vector<3x64xbf16>
      %c15 = arith.constant 15 : index
      %c0_129 = arith.constant 0 : index
      %c0_130 = arith.constant 0 : index
      %164 = vector.load %arg2[%c15, %c0_129, %c0_130] : memref<16x64x128xbf16, #tpu.memory_space<vmem>>, vector<1x64x128xbf16>
      %165 = vector.shape_cast %164 : vector<1x64x128xbf16> to vector<64x128xbf16>
      %cst_131 = arith.constant dense<0.000000e+00> : vector<3x128xf32>
      %166 = tpu.matmul %163, %165, %cst_131 {dimension_numbers = #tpu.dot_dimension_numbers<[1], [0], [0], [1], [0, 0, 1, 1], [], []>} : vector<3x64xbf16>, vector<64x128xbf16>, vector<3x128xf32> -> vector<3x128xf32>
      %167 = arith.addf %159, %166 : vector<3x128xf32>
      %168 = arith.index_cast %arg6 : i32 to index
      %c0_132 = arith.constant 0 : index
      %c0_133 = arith.constant 0 : index
      %169 = vector.load %arg5[%168, %c0_132, %c0_133] : memref<3x3x128xf32, #tpu.memory_space<vmem>>, vector<1x3x128xf32>
      %170 = vector.shape_cast %169 : vector<1x3x128xf32> to vector<3x128xf32>
      %171 = vector.shape_cast %167 : vector<3x128xf32> to vector<1x3x128xf32>
      tpu.vector_store %arg5[%168, %c0_132, %c0_133], %171 {strides = array<i32>} : memref<3x3x128xf32, #tpu.memory_space<vmem>>, vector<1x3x128xf32>,
    }
    %c3_i32_0 = arith.constant 3 : i32
    %c0 = arith.constant 0 : index
    %c0_1 = arith.constant 0 : index
    %c0_2 = arith.constant 0 : index
    %1 = vector.load %arg5[%c0, %c0_1, %c0_2] : memref<3x3x128xf32, #tpu.memory_space<vmem>>, vector<3x3x128xf32>
    %c0_3 = arith.constant 0 : index
    %c0_4 = arith.constant 0 : index
    %2 = vector.load %arg3[%c0_3, %c0_4] : memref<1x128xf32, #tpu.memory_space<vmem>>, vector<1x128xf32>
    %3 = vector.shape_cast %2 : vector<1x128xf32> to vector<1x1x128xf32>
    %4 = vector.broadcast %3 : vector<1x1x128xf32> to vector<3x3x128xf32>
    %5 = arith.addf %1, %4 : vector<3x3x128xf32>
    %cst = arith.constant dense<0.000000e+00> : vector<3x128xf32>
    %6 = vector.multi_reduction <add>, %5, %cst [0] : vector<3x3x128xf32> to vector<3x128xf32>
    %7 = vector.shape_cast %6 : vector<3x128xf32> to vector<1x3x128xf32>
    %cst_5 = arith.constant 3.000000e+00 : f32
    %8 = vector.broadcast %cst_5 : f32 to vector<1x3x128xf32>
    %9 = arith.divf %7, %8 : vector<1x3x128xf32>
    %cst_6 = arith.constant dense<0.000000e+00> : vector<1x128xf32>
    %10 = vector.multi_reduction <add>, %9, %cst_6 [1] : vector<1x3x128xf32> to vector<1x128xf32>
    %11 = vector.shape_cast %10 : vector<1x128xf32> to vector<1x1x128xf32>
    %cst_7 = arith.constant 3.000000e+00 : f32
    %12 = vector.broadcast %cst_7 : f32 to vector<1x1x128xf32>
    %13 = arith.divf %11, %12 : vector<1x1x128xf32>
    %14 = vector.broadcast %13 : vector<1x1x128xf32> to vector<3x3x128xf32>
    %15 = arith.subf %5, %14 : vector<3x3x128xf32>
    %16 = arith.mulf %15, %15 : vector<3x3x128xf32>
    %cst_8 = arith.constant dense<0.000000e+00> : vector<3x128xf32>
    %17 = vector.multi_reduction <add>, %16, %cst_8 [0] : vector<3x3x128xf32> to vector<3x128xf32>
    %18 = vector.shape_cast %17 : vector<3x128xf32> to vector<1x3x128xf32>
    %cst_9 = arith.constant 3.000000e+00 : f32
    %19 = vector.broadcast %cst_9 : f32 to vector<1x3x128xf32>
    %20 = arith.divf %18, %19 : vector<1x3x128xf32>
    %cst_10 = arith.constant dense<0.000000e+00> : vector<1x128xf32>
    %21 = vector.multi_reduction <add>, %20, %cst_10 [1] : vector<1x3x128xf32> to vector<1x128xf32>
    %22 = vector.shape_cast %21 : vector<1x128xf32> to vector<1x1x128xf32>
    %cst_11 = arith.constant 3.000000e+00 : f32
    %23 = vector.broadcast %cst_11 : f32 to vector<1x1x128xf32>
    %24 = arith.divf %22, %23 : vector<1x1x128xf32>
    %cst_12 = arith.constant 9.99999974E-6 : f32
    %25 = vector.broadcast %cst_12 : f32 to vector<1x1x128xf32>
    %26 = arith.addf %24, %25 : vector<1x1x128xf32>
    %27 = math.rsqrt %26 : vector<1x1x128xf32>
    %28 = vector.broadcast %27 : vector<1x1x128xf32> to vector<3x3x128xf32>
    %29 = arith.mulf %15, %28 : vector<3x3x128xf32>
    %cst_13 = arith.constant 0.000000e+00 : f32
    %30 = vector.broadcast %cst_13 : f32 to vector<3x3x128xf32>
    %31 = arith.cmpf oge, %29, %30 : vector<3x3x128xf32>
    %cst_14 = arith.constant 2.000000e-01 : f32
    %32 = vector.broadcast %cst_14 : f32 to vector<3x3x128xf32>
    %33 = arith.mulf %32, %29 : vector<3x3x128xf32>
    %34 = arith.select %31, %29, %33 : vector<3x3x128xi1>, vector<3x3x128xf32>
    %35 = arith.truncf %34 : vector<3x3x128xf32> to vector<3x3x128xbf16>
    %c0_15 = arith.constant 0 : index
    %c0_16 = arith.constant 0 : index
    %c0_17 = arith.constant 0 : index
    %c0_18 = arith.constant 0 : index
    %36 = vector.load %arg4[%c0_15, %c0_16, %c0_17, %c0_18] : memref<1x3x3x128xbf16, #tpu.memory_space<vmem>>, vector<1x3x3x128xbf16>
    %37 = vector.shape_cast %36 : vector<1x3x3x128xbf16> to vector<3x3x128xbf16>
    %38 = vector.shape_cast %35 : vector<3x3x128xbf16> to vector<1x3x3x128xbf16>
    tpu.vector_store %arg4[%c0_15, %c0_16, %c0_17, %c0_18], %38 {strides = array<i32>} : memref<1x3x3x128xbf16, #tpu.memory_space<vmem>>, vector<1x3x3x128xbf16>,
    return
  }
  func.func @transform_0(%arg0: i32) -> (i32, i32, i32, i32) {
    %c0_i32 = arith.constant 0 : i32
    %c0_i32_0 = arith.constant 0 : i32
    %c0_i32_1 = arith.constant 0 : i32
    %c0_i32_2 = arith.constant 0 : i32
    return %arg0, %c0_i32, %c0_i32_0, %c0_i32_1 : i32, i32, i32, i32
  }
  func.func @transform_1(%arg0: i32) -> (i32, i32, i32) {
    %c0_i32 = arith.constant 0 : i32
    %c0_i32_0 = arith.constant 0 : i32
    %c0_i32_1 = arith.constant 0 : i32
    %c0_i32_2 = arith.constant 0 : i32
    return %c0_i32, %c0_i32_0, %c0_i32_1 : i32, i32, i32
  }
  func.func @transform_2(%arg0: i32) -> (i32, i32) {
    %c0_i32 = arith.constant 0 : i32
    %c0_i32_0 = arith.constant 0 : i32
    %c0_i32_1 = arith.constant 0 : i32
    return %c0_i32, %c0_i32_0 : i32, i32
  }
  func.func @transform_3(%arg0: i32) -> (i32, i32, i32, i32) {
    %c0_i32 = arith.constant 0 : i32
    %c0_i32_0 = arith.constant 0 : i32
    %c0_i32_1 = arith.constant 0 : i32
    %c0_i32_2 = arith.constant 0 : i32
    return %arg0, %c0_i32, %c0_i32_0, %c0_i32_1 : i32, i32, i32, i32
  }
}

module attributes {stable_mosaic.version = 11 : i64} {
  func.func @_conv_block_kernel(%arg0: i32, %arg1: memref<1x5x5x128xbf16, #tpu.memory_space<vmem>>, %arg2: memref<16x128x1xbf16, #tpu.memory_space<vmem>>, %arg3: memref<1x1xf32, #tpu.memory_space<vmem>>, %arg4: memref<1x2x2x1xf32, #tpu.memory_space<vmem>>, %arg5: memref<2x2x1xf32, #tpu.memory_space<vmem>>) attributes {dimension_semantics = [#tpu.dimension_semantics<parallel>], iteration_bounds = array<i64: 2>, scalar_prefetch = 0 : i64, scratch_operands = 1 : i64, tpu.core_type = #tpu.core_type<tc>, window_params = [{transform_indices = @transform_0, window_bounds = array<i64: 1, 5, 5, 128>}, {pipeline_mode = #tpu.pipeline_mode<synchronous>, transform_indices = @transform_1, window_bounds = array<i64: 16, 128, 1>}, {pipeline_mode = #tpu.pipeline_mode<synchronous>, transform_indices = @transform_2, window_bounds = array<i64: 1, 1>}, {transform_indices = @transform_3, window_bounds = array<i64: 1, 2, 2, 1>}]} {
    %c0_i32 = arith.constant 0 : i32
    %c2_i32 = arith.constant 2 : i32
    %0 = arith.addi %c0_i32, %c2_i32 : i32
    %c1_i32 = arith.constant 1 : i32
    scf.for %arg6 = %c0_i32 to %0 step %c1_i32  : i32 {
      %cst = arith.constant 0.000000e+00 : f32
      %9 = vector.broadcast %cst : f32 to vector<2x1xf32>
      %c0_i32_9 = arith.constant 0 : i32
      %10 = arith.addi %arg6, %c0_i32_9 : i32
      %c0_10 = arith.constant 0 : index
      %11 = arith.index_cast %10 : i32 to index
      %c0_11 = arith.constant 0 : index
      %c0_12 = arith.constant 0 : index
      %12 = vector.load %arg1[%c0_10, %11, %c0_11, %c0_12] : memref<1x5x5x128xbf16, #tpu.memory_space<vmem>>, vector<1x1x2x128xbf16>
      %13 = vector.shape_cast %12 : vector<1x1x2x128xbf16> to vector<2x128xbf16>
      %c0_13 = arith.constant 0 : index
      %c0_14 = arith.constant 0 : index
      %c0_15 = arith.constant 0 : index
      %14 = vector.load %arg2[%c0_13, %c0_14, %c0_15] : memref<16x128x1xbf16, #tpu.memory_space<vmem>>, vector<1x128x1xbf16>
      %15 = vector.shape_cast %14 : vector<1x128x1xbf16> to vector<128x1xbf16>
      %cst_16 = arith.constant dense<0.000000e+00> : vector<2x1xf32>
      %16 = tpu.matmul %13, %15, %cst_16 {dimension_numbers = #tpu.dot_dimension_numbers<[1], [0], [0], [1], [0, 0, 1, 1], [], []>} : vector<2x128xbf16>, vector<128x1xbf16>, vector<2x1xf32> -> vector<2x1xf32>
      %17 = arith.addf %9, %16 : vector<2x1xf32>
      %c0_i32_17 = arith.constant 0 : i32
      %18 = arith.addi %arg6, %c0_i32_17 : i32
      %c0_18 = arith.constant 0 : index
      %19 = arith.index_cast %18 : i32 to index
      %c1 = arith.constant 1 : index
      %c0_19 = arith.constant 0 : index
      %20 = vector.load %arg1[%c0_18, %19, %c1, %c0_19] : memref<1x5x5x128xbf16, #tpu.memory_space<vmem>>, vector<1x1x2x128xbf16>
      %21 = vector.shape_cast %20 : vector<1x1x2x128xbf16> to vector<2x128xbf16>
      %c1_20 = arith.constant 1 : index
      %c0_21 = arith.constant 0 : index
      %c0_22 = arith.constant 0 : index
      %22 = vector.load %arg2[%c1_20, %c0_21, %c0_22] : memref<16x128x1xbf16, #tpu.memory_space<vmem>>, vector<1x128x1xbf16>
      %23 = vector.shape_cast %22 : vector<1x128x1xbf16> to vector<128x1xbf16>
      %cst_23 = arith.constant dense<0.000000e+00> : vector<2x1xf32>
      %24 = tpu.matmul %21, %23, %cst_23 {dimension_numbers = #tpu.dot_dimension_numbers<[1], [0], [0], [1], [0, 0, 1, 1], [], []>} : vector<2x128xbf16>, vector<128x1xbf16>, vector<2x1xf32> -> vector<2x1xf32>
      %25 = arith.addf %17, %24 : vector<2x1xf32>
      %c0_i32_24 = arith.constant 0 : i32
      %26 = arith.addi %arg6, %c0_i32_24 : i32
      %c0_25 = arith.constant 0 : index
      %27 = arith.index_cast %26 : i32 to index
      %c2 = arith.constant 2 : index
      %c0_26 = arith.constant 0 : index
      %28 = vector.load %arg1[%c0_25, %27, %c2, %c0_26] : memref<1x5x5x128xbf16, #tpu.memory_space<vmem>>, vector<1x1x2x128xbf16>
      %29 = vector.shape_cast %28 : vector<1x1x2x128xbf16> to vector<2x128xbf16>
      %c2_27 = arith.constant 2 : index
      %c0_28 = arith.constant 0 : index
      %c0_29 = arith.constant 0 : index
      %30 = vector.load %arg2[%c2_27, %c0_28, %c0_29] : memref<16x128x1xbf16, #tpu.memory_space<vmem>>, vector<1x128x1xbf16>
      %31 = vector.shape_cast %30 : vector<1x128x1xbf16> to vector<128x1xbf16>
      %cst_30 = arith.constant dense<0.000000e+00> : vector<2x1xf32>
      %32 = tpu.matmul %29, %31, %cst_30 {dimension_numbers = #tpu.dot_dimension_numbers<[1], [0], [0], [1], [0, 0, 1, 1], [], []>} : vector<2x128xbf16>, vector<128x1xbf16>, vector<2x1xf32> -> vector<2x1xf32>
      %33 = arith.addf %25, %32 : vector<2x1xf32>
      %c0_i32_31 = arith.constant 0 : i32
      %34 = arith.addi %arg6, %c0_i32_31 : i32
      %c0_32 = arith.constant 0 : index
      %35 = arith.index_cast %34 : i32 to index
      %c3 = arith.constant 3 : index
      %c0_33 = arith.constant 0 : index
      %36 = vector.load %arg1[%c0_32, %35, %c3, %c0_33] : memref<1x5x5x128xbf16, #tpu.memory_space<vmem>>, vector<1x1x2x128xbf16>
      %37 = vector.shape_cast %36 : vector<1x1x2x128xbf16> to vector<2x128xbf16>
      %c3_34 = arith.constant 3 : index
      %c0_35 = arith.constant 0 : index
      %c0_36 = arith.constant 0 : index
      %38 = vector.load %arg2[%c3_34, %c0_35, %c0_36] : memref<16x128x1xbf16, #tpu.memory_space<vmem>>, vector<1x128x1xbf16>
      %39 = vector.shape_cast %38 : vector<1x128x1xbf16> to vector<128x1xbf16>
      %cst_37 = arith.constant dense<0.000000e+00> : vector<2x1xf32>
      %40 = tpu.matmul %37, %39, %cst_37 {dimension_numbers = #tpu.dot_dimension_numbers<[1], [0], [0], [1], [0, 0, 1, 1], [], []>} : vector<2x128xbf16>, vector<128x1xbf16>, vector<2x1xf32> -> vector<2x1xf32>
      %41 = arith.addf %33, %40 : vector<2x1xf32>
      %c1_i32_38 = arith.constant 1 : i32
      %42 = arith.addi %arg6, %c1_i32_38 : i32
      %c0_39 = arith.constant 0 : index
      %43 = arith.index_cast %42 : i32 to index
      %c0_40 = arith.constant 0 : index
      %c0_41 = arith.constant 0 : index
      %44 = vector.load %arg1[%c0_39, %43, %c0_40, %c0_41] : memref<1x5x5x128xbf16, #tpu.memory_space<vmem>>, vector<1x1x2x128xbf16>
      %45 = vector.shape_cast %44 : vector<1x1x2x128xbf16> to vector<2x128xbf16>
      %c4 = arith.constant 4 : index
      %c0_42 = arith.constant 0 : index
      %c0_43 = arith.constant 0 : index
      %46 = vector.load %arg2[%c4, %c0_42, %c0_43] : memref<16x128x1xbf16, #tpu.memory_space<vmem>>, vector<1x128x1xbf16>
      %47 = vector.shape_cast %46 : vector<1x128x1xbf16> to vector<128x1xbf16>
      %cst_44 = arith.constant dense<0.000000e+00> : vector<2x1xf32>
      %48 = tpu.matmul %45, %47, %cst_44 {dimension_numbers = #tpu.dot_dimension_numbers<[1], [0], [0], [1], [0, 0, 1, 1], [], []>} : vector<2x128xbf16>, vector<128x1xbf16>, vector<2x1xf32> -> vector<2x1xf32>
      %49 = arith.addf %41, %48 : vector<2x1xf32>
      %c1_i32_45 = arith.constant 1 : i32
      %50 = arith.addi %arg6, %c1_i32_45 : i32
      %c0_46 = arith.constant 0 : index
      %51 = arith.index_cast %50 : i32 to index
      %c1_47 = arith.constant 1 : index
      %c0_48 = arith.constant 0 : index
      %52 = vector.load %arg1[%c0_46, %51, %c1_47, %c0_48] : memref<1x5x5x128xbf16, #tpu.memory_space<vmem>>, vector<1x1x2x128xbf16>
      %53 = vector.shape_cast %52 : vector<1x1x2x128xbf16> to vector<2x128xbf16>
      %c5 = arith.constant 5 : index
      %c0_49 = arith.constant 0 : index
      %c0_50 = arith.constant 0 : index
      %54 = vector.load %arg2[%c5, %c0_49, %c0_50] : memref<16x128x1xbf16, #tpu.memory_space<vmem>>, vector<1x128x1xbf16>
      %55 = vector.shape_cast %54 : vector<1x128x1xbf16> to vector<128x1xbf16>
      %cst_51 = arith.constant dense<0.000000e+00> : vector<2x1xf32>
      %56 = tpu.matmul %53, %55, %cst_51 {dimension_numbers = #tpu.dot_dimension_numbers<[1], [0], [0], [1], [0, 0, 1, 1], [], []>} : vector<2x128xbf16>, vector<128x1xbf16>, vector<2x1xf32> -> vector<2x1xf32>
      %57 = arith.addf %49, %56 : vector<2x1xf32>
      %c1_i32_52 = arith.constant 1 : i32
      %58 = arith.addi %arg6, %c1_i32_52 : i32
      %c0_53 = arith.constant 0 : index
      %59 = arith.index_cast %58 : i32 to index
      %c2_54 = arith.constant 2 : index
      %c0_55 = arith.constant 0 : index
      %60 = vector.load %arg1[%c0_53, %59, %c2_54, %c0_55] : memref<1x5x5x128xbf16, #tpu.memory_space<vmem>>, vector<1x1x2x128xbf16>
      %61 = vector.shape_cast %60 : vector<1x1x2x128xbf16> to vector<2x128xbf16>
      %c6 = arith.constant 6 : index
      %c0_56 = arith.constant 0 : index
      %c0_57 = arith.constant 0 : index
      %62 = vector.load %arg2[%c6, %c0_56, %c0_57] : memref<16x128x1xbf16, #tpu.memory_space<vmem>>, vector<1x128x1xbf16>
      %63 = vector.shape_cast %62 : vector<1x128x1xbf16> to vector<128x1xbf16>
      %cst_58 = arith.constant dense<0.000000e+00> : vector<2x1xf32>
      %64 = tpu.matmul %61, %63, %cst_58 {dimension_numbers = #tpu.dot_dimension_numbers<[1], [0], [0], [1], [0, 0, 1, 1], [], []>} : vector<2x128xbf16>, vector<128x1xbf16>, vector<2x1xf32> -> vector<2x1xf32>
      %65 = arith.addf %57, %64 : vector<2x1xf32>
      %c1_i32_59 = arith.constant 1 : i32
      %66 = arith.addi %arg6, %c1_i32_59 : i32
      %c0_60 = arith.constant 0 : index
      %67 = arith.index_cast %66 : i32 to index
      %c3_61 = arith.constant 3 : index
      %c0_62 = arith.constant 0 : index
      %68 = vector.load %arg1[%c0_60, %67, %c3_61, %c0_62] : memref<1x5x5x128xbf16, #tpu.memory_space<vmem>>, vector<1x1x2x128xbf16>
      %69 = vector.shape_cast %68 : vector<1x1x2x128xbf16> to vector<2x128xbf16>
      %c7 = arith.constant 7 : index
      %c0_63 = arith.constant 0 : index
      %c0_64 = arith.constant 0 : index
      %70 = vector.load %arg2[%c7, %c0_63, %c0_64] : memref<16x128x1xbf16, #tpu.memory_space<vmem>>, vector<1x128x1xbf16>
      %71 = vector.shape_cast %70 : vector<1x128x1xbf16> to vector<128x1xbf16>
      %cst_65 = arith.constant dense<0.000000e+00> : vector<2x1xf32>
      %72 = tpu.matmul %69, %71, %cst_65 {dimension_numbers = #tpu.dot_dimension_numbers<[1], [0], [0], [1], [0, 0, 1, 1], [], []>} : vector<2x128xbf16>, vector<128x1xbf16>, vector<2x1xf32> -> vector<2x1xf32>
      %73 = arith.addf %65, %72 : vector<2x1xf32>
      %c2_i32_66 = arith.constant 2 : i32
      %74 = arith.addi %arg6, %c2_i32_66 : i32
      %c0_67 = arith.constant 0 : index
      %75 = arith.index_cast %74 : i32 to index
      %c0_68 = arith.constant 0 : index
      %c0_69 = arith.constant 0 : index
      %76 = vector.load %arg1[%c0_67, %75, %c0_68, %c0_69] : memref<1x5x5x128xbf16, #tpu.memory_space<vmem>>, vector<1x1x2x128xbf16>
      %77 = vector.shape_cast %76 : vector<1x1x2x128xbf16> to vector<2x128xbf16>
      %c8 = arith.constant 8 : index
      %c0_70 = arith.constant 0 : index
      %c0_71 = arith.constant 0 : index
      %78 = vector.load %arg2[%c8, %c0_70, %c0_71] : memref<16x128x1xbf16, #tpu.memory_space<vmem>>, vector<1x128x1xbf16>
      %79 = vector.shape_cast %78 : vector<1x128x1xbf16> to vector<128x1xbf16>
      %cst_72 = arith.constant dense<0.000000e+00> : vector<2x1xf32>
      %80 = tpu.matmul %77, %79, %cst_72 {dimension_numbers = #tpu.dot_dimension_numbers<[1], [0], [0], [1], [0, 0, 1, 1], [], []>} : vector<2x128xbf16>, vector<128x1xbf16>, vector<2x1xf32> -> vector<2x1xf32>
      %81 = arith.addf %73, %80 : vector<2x1xf32>
      %c2_i32_73 = arith.constant 2 : i32
      %82 = arith.addi %arg6, %c2_i32_73 : i32
      %c0_74 = arith.constant 0 : index
      %83 = arith.index_cast %82 : i32 to index
      %c1_75 = arith.constant 1 : index
      %c0_76 = arith.constant 0 : index
      %84 = vector.load %arg1[%c0_74, %83, %c1_75, %c0_76] : memref<1x5x5x128xbf16, #tpu.memory_space<vmem>>, vector<1x1x2x128xbf16>
      %85 = vector.shape_cast %84 : vector<1x1x2x128xbf16> to vector<2x128xbf16>
      %c9 = arith.constant 9 : index
      %c0_77 = arith.constant 0 : index
      %c0_78 = arith.constant 0 : index
      %86 = vector.load %arg2[%c9, %c0_77, %c0_78] : memref<16x128x1xbf16, #tpu.memory_space<vmem>>, vector<1x128x1xbf16>
      %87 = vector.shape_cast %86 : vector<1x128x1xbf16> to vector<128x1xbf16>
      %cst_79 = arith.constant dense<0.000000e+00> : vector<2x1xf32>
      %88 = tpu.matmul %85, %87, %cst_79 {dimension_numbers = #tpu.dot_dimension_numbers<[1], [0], [0], [1], [0, 0, 1, 1], [], []>} : vector<2x128xbf16>, vector<128x1xbf16>, vector<2x1xf32> -> vector<2x1xf32>
      %89 = arith.addf %81, %88 : vector<2x1xf32>
      %c2_i32_80 = arith.constant 2 : i32
      %90 = arith.addi %arg6, %c2_i32_80 : i32
      %c0_81 = arith.constant 0 : index
      %91 = arith.index_cast %90 : i32 to index
      %c2_82 = arith.constant 2 : index
      %c0_83 = arith.constant 0 : index
      %92 = vector.load %arg1[%c0_81, %91, %c2_82, %c0_83] : memref<1x5x5x128xbf16, #tpu.memory_space<vmem>>, vector<1x1x2x128xbf16>
      %93 = vector.shape_cast %92 : vector<1x1x2x128xbf16> to vector<2x128xbf16>
      %c10 = arith.constant 10 : index
      %c0_84 = arith.constant 0 : index
      %c0_85 = arith.constant 0 : index
      %94 = vector.load %arg2[%c10, %c0_84, %c0_85] : memref<16x128x1xbf16, #tpu.memory_space<vmem>>, vector<1x128x1xbf16>
      %95 = vector.shape_cast %94 : vector<1x128x1xbf16> to vector<128x1xbf16>
      %cst_86 = arith.constant dense<0.000000e+00> : vector<2x1xf32>
      %96 = tpu.matmul %93, %95, %cst_86 {dimension_numbers = #tpu.dot_dimension_numbers<[1], [0], [0], [1], [0, 0, 1, 1], [], []>} : vector<2x128xbf16>, vector<128x1xbf16>, vector<2x1xf32> -> vector<2x1xf32>
      %97 = arith.addf %89, %96 : vector<2x1xf32>
      %c2_i32_87 = arith.constant 2 : i32
      %98 = arith.addi %arg6, %c2_i32_87 : i32
      %c0_88 = arith.constant 0 : index
      %99 = arith.index_cast %98 : i32 to index
      %c3_89 = arith.constant 3 : index
      %c0_90 = arith.constant 0 : index
      %100 = vector.load %arg1[%c0_88, %99, %c3_89, %c0_90] : memref<1x5x5x128xbf16, #tpu.memory_space<vmem>>, vector<1x1x2x128xbf16>
      %101 = vector.shape_cast %100 : vector<1x1x2x128xbf16> to vector<2x128xbf16>
      %c11 = arith.constant 11 : index
      %c0_91 = arith.constant 0 : index
      %c0_92 = arith.constant 0 : index
      %102 = vector.load %arg2[%c11, %c0_91, %c0_92] : memref<16x128x1xbf16, #tpu.memory_space<vmem>>, vector<1x128x1xbf16>
      %103 = vector.shape_cast %102 : vector<1x128x1xbf16> to vector<128x1xbf16>
      %cst_93 = arith.constant dense<0.000000e+00> : vector<2x1xf32>
      %104 = tpu.matmul %101, %103, %cst_93 {dimension_numbers = #tpu.dot_dimension_numbers<[1], [0], [0], [1], [0, 0, 1, 1], [], []>} : vector<2x128xbf16>, vector<128x1xbf16>, vector<2x1xf32> -> vector<2x1xf32>
      %105 = arith.addf %97, %104 : vector<2x1xf32>
      %c3_i32 = arith.constant 3 : i32
      %106 = arith.addi %arg6, %c3_i32 : i32
      %c0_94 = arith.constant 0 : index
      %107 = arith.index_cast %106 : i32 to index
      %c0_95 = arith.constant 0 : index
      %c0_96 = arith.constant 0 : index
      %108 = vector.load %arg1[%c0_94, %107, %c0_95, %c0_96] : memref<1x5x5x128xbf16, #tpu.memory_space<vmem>>, vector<1x1x2x128xbf16>
      %109 = vector.shape_cast %108 : vector<1x1x2x128xbf16> to vector<2x128xbf16>
      %c12 = arith.constant 12 : index
      %c0_97 = arith.constant 0 : index
      %c0_98 = arith.constant 0 : index
      %110 = vector.load %arg2[%c12, %c0_97, %c0_98] : memref<16x128x1xbf16, #tpu.memory_space<vmem>>, vector<1x128x1xbf16>
      %111 = vector.shape_cast %110 : vector<1x128x1xbf16> to vector<128x1xbf16>
      %cst_99 = arith.constant dense<0.000000e+00> : vector<2x1xf32>
      %112 = tpu.matmul %109, %111, %cst_99 {dimension_numbers = #tpu.dot_dimension_numbers<[1], [0], [0], [1], [0, 0, 1, 1], [], []>} : vector<2x128xbf16>, vector<128x1xbf16>, vector<2x1xf32> -> vector<2x1xf32>
      %113 = arith.addf %105, %112 : vector<2x1xf32>
      %c3_i32_100 = arith.constant 3 : i32
      %114 = arith.addi %arg6, %c3_i32_100 : i32
      %c0_101 = arith.constant 0 : index
      %115 = arith.index_cast %114 : i32 to index
      %c1_102 = arith.constant 1 : index
      %c0_103 = arith.constant 0 : index
      %116 = vector.load %arg1[%c0_101, %115, %c1_102, %c0_103] : memref<1x5x5x128xbf16, #tpu.memory_space<vmem>>, vector<1x1x2x128xbf16>
      %117 = vector.shape_cast %116 : vector<1x1x2x128xbf16> to vector<2x128xbf16>
      %c13 = arith.constant 13 : index
      %c0_104 = arith.constant 0 : index
      %c0_105 = arith.constant 0 : index
      %118 = vector.load %arg2[%c13, %c0_104, %c0_105] : memref<16x128x1xbf16, #tpu.memory_space<vmem>>, vector<1x128x1xbf16>
      %119 = vector.shape_cast %118 : vector<1x128x1xbf16> to vector<128x1xbf16>
      %cst_106 = arith.constant dense<0.000000e+00> : vector<2x1xf32>
      %120 = tpu.matmul %117, %119, %cst_106 {dimension_numbers = #tpu.dot_dimension_numbers<[1], [0], [0], [1], [0, 0, 1, 1], [], []>} : vector<2x128xbf16>, vector<128x1xbf16>, vector<2x1xf32> -> vector<2x1xf32>
      %121 = arith.addf %113, %120 : vector<2x1xf32>
      %c3_i32_107 = arith.constant 3 : i32
      %122 = arith.addi %arg6, %c3_i32_107 : i32
      %c0_108 = arith.constant 0 : index
      %123 = arith.index_cast %122 : i32 to index
      %c2_109 = arith.constant 2 : index
      %c0_110 = arith.constant 0 : index
      %124 = vector.load %arg1[%c0_108, %123, %c2_109, %c0_110] : memref<1x5x5x128xbf16, #tpu.memory_space<vmem>>, vector<1x1x2x128xbf16>
      %125 = vector.shape_cast %124 : vector<1x1x2x128xbf16> to vector<2x128xbf16>
      %c14 = arith.constant 14 : index
      %c0_111 = arith.constant 0 : index
      %c0_112 = arith.constant 0 : index
      %126 = vector.load %arg2[%c14, %c0_111, %c0_112] : memref<16x128x1xbf16, #tpu.memory_space<vmem>>, vector<1x128x1xbf16>
      %127 = vector.shape_cast %126 : vector<1x128x1xbf16> to vector<128x1xbf16>
      %cst_113 = arith.constant dense<0.000000e+00> : vector<2x1xf32>
      %128 = tpu.matmul %125, %127, %cst_113 {dimension_numbers = #tpu.dot_dimension_numbers<[1], [0], [0], [1], [0, 0, 1, 1], [], []>} : vector<2x128xbf16>, vector<128x1xbf16>, vector<2x1xf32> -> vector<2x1xf32>
      %129 = arith.addf %121, %128 : vector<2x1xf32>
      %c3_i32_114 = arith.constant 3 : i32
      %130 = arith.addi %arg6, %c3_i32_114 : i32
      %c0_115 = arith.constant 0 : index
      %131 = arith.index_cast %130 : i32 to index
      %c3_116 = arith.constant 3 : index
      %c0_117 = arith.constant 0 : index
      %132 = vector.load %arg1[%c0_115, %131, %c3_116, %c0_117] : memref<1x5x5x128xbf16, #tpu.memory_space<vmem>>, vector<1x1x2x128xbf16>
      %133 = vector.shape_cast %132 : vector<1x1x2x128xbf16> to vector<2x128xbf16>
      %c15 = arith.constant 15 : index
      %c0_118 = arith.constant 0 : index
      %c0_119 = arith.constant 0 : index
      %134 = vector.load %arg2[%c15, %c0_118, %c0_119] : memref<16x128x1xbf16, #tpu.memory_space<vmem>>, vector<1x128x1xbf16>
      %135 = vector.shape_cast %134 : vector<1x128x1xbf16> to vector<128x1xbf16>
      %cst_120 = arith.constant dense<0.000000e+00> : vector<2x1xf32>
      %136 = tpu.matmul %133, %135, %cst_120 {dimension_numbers = #tpu.dot_dimension_numbers<[1], [0], [0], [1], [0, 0, 1, 1], [], []>} : vector<2x128xbf16>, vector<128x1xbf16>, vector<2x1xf32> -> vector<2x1xf32>
      %137 = arith.addf %129, %136 : vector<2x1xf32>
      %138 = arith.index_cast %arg6 : i32 to index
      %c0_121 = arith.constant 0 : index
      %c0_122 = arith.constant 0 : index
      %139 = vector.load %arg5[%138, %c0_121, %c0_122] : memref<2x2x1xf32, #tpu.memory_space<vmem>>, vector<1x2x1xf32>
      %140 = vector.shape_cast %139 : vector<1x2x1xf32> to vector<2x1xf32>
      %141 = vector.shape_cast %137 : vector<2x1xf32> to vector<1x2x1xf32>
      tpu.vector_store %arg5[%138, %c0_121, %c0_122], %141 {strides = array<i32>} : memref<2x2x1xf32, #tpu.memory_space<vmem>>, vector<1x2x1xf32>,
    }
    %c2_i32_0 = arith.constant 2 : i32
    %c0 = arith.constant 0 : index
    %c0_1 = arith.constant 0 : index
    %c0_2 = arith.constant 0 : index
    %1 = vector.load %arg5[%c0, %c0_1, %c0_2] : memref<2x2x1xf32, #tpu.memory_space<vmem>>, vector<2x2x1xf32>
    %c0_3 = arith.constant 0 : index
    %c0_4 = arith.constant 0 : index
    %2 = vector.load %arg3[%c0_3, %c0_4] : memref<1x1xf32, #tpu.memory_space<vmem>>, vector<1x1xf32>
    %3 = vector.shape_cast %2 : vector<1x1xf32> to vector<1x1x1xf32>
    %4 = vector.broadcast %3 : vector<1x1x1xf32> to vector<2x2x1xf32>
    %5 = arith.addf %1, %4 : vector<2x2x1xf32>
    %c0_5 = arith.constant 0 : index
    %c0_6 = arith.constant 0 : index
    %c0_7 = arith.constant 0 : index
    %c0_8 = arith.constant 0 : index
    %6 = vector.load %arg4[%c0_5, %c0_6, %c0_7, %c0_8] : memref<1x2x2x1xf32, #tpu.memory_space<vmem>>, vector<1x2x2x1xf32>
    %7 = vector.shape_cast %6 : vector<1x2x2x1xf32> to vector<2x2x1xf32>
    %8 = vector.shape_cast %5 : vector<2x2x1xf32> to vector<1x2x2x1xf32>
    tpu.vector_store %arg4[%c0_5, %c0_6, %c0_7, %c0_8], %8 {strides = array<i32>} : memref<1x2x2x1xf32, #tpu.memory_space<vmem>>, vector<1x2x2x1xf32>,
    return
  }
  func.func @transform_0(%arg0: i32) -> (i32, i32, i32, i32) {
    %c0_i32 = arith.constant 0 : i32
    %c0_i32_0 = arith.constant 0 : i32
    %c0_i32_1 = arith.constant 0 : i32
    %c0_i32_2 = arith.constant 0 : i32
    return %arg0, %c0_i32, %c0_i32_0, %c0_i32_1 : i32, i32, i32, i32
  }
  func.func @transform_1(%arg0: i32) -> (i32, i32, i32) {
    %c0_i32 = arith.constant 0 : i32
    %c0_i32_0 = arith.constant 0 : i32
    %c0_i32_1 = arith.constant 0 : i32
    %c0_i32_2 = arith.constant 0 : i32
    return %c0_i32, %c0_i32_0, %c0_i32_1 : i32, i32, i32
  }
  func.func @transform_2(%arg0: i32) -> (i32, i32) {
    %c0_i32 = arith.constant 0 : i32
    %c0_i32_0 = arith.constant 0 : i32
    %c0_i32_1 = arith.constant 0 : i32
    return %c0_i32, %c0_i32_0 : i32, i32
  }
  func.func @transform_3(%arg0: i32) -> (i32, i32, i32, i32) {
    %c0_i32 = arith.constant 0 : i32
    %c0_i32_0 = arith.constant 0 : i32
    %c0_i32_1 = arith.constant 0 : i32
    %c0_i32_2 = arith.constant 0 : i32
    return %arg0, %c0_i32, %c0_i32_0, %c0_i32_1 : i32, i32, i32, i32
  }
}

</mosaic_0001>

<bundles_post_ra>
// kernel: _lambda_.5
= control target key start
LH: loop header
LB: loop body
LE: loop exit
PB: predicated region body
PF: predicated region fallthrough
CT: control target
= control target key end

     0   :  { %s1381_s12 = smov 0   ;;  %s1634_s0 = inlined_call_operand.vmem [shape: bf16[8,17,17,3], index: 0, kind: input, shape index: {}]   ;;  %s1635_s1 = inlined_call_operand.vmem [shape: bf16[16,3,16], index: 1, kind: input, shape index: {}]   ;;  %s1636_s2 = inlined_call_operand.vmem [shape: f32[1,16], index: 2, kind: input, shape index: {}]   ;;  %s1637_s3 = inlined_call_operand.vmem [shape: bf16[2,16,16,16], index: 3, kind: output, shape index: {}]  }
   0x1 LB: > { %s1158_s13 = sadd.s32 4294967295, %s1354_s12   ;;  %p1162_p0 = scmp.ge.s32.totalorder %s1354_s12, 1  ;;  %s1354_s12 = sphi %s1381_s12, %s13_s12  }
   0x2   : > { %p139_p1 = scmp.lt.s32.totalorder %s1354_s12, 3 }
   0x4   : > { %p140_p2 = pnand %p1162_p0, %p139_p1 }
   0x5   : > { %s1163_s14 = sshll.u32 (!%p140_p2), %s1158_s13, 2  ;;  %p171_p3 = scmp.lt.s32.totalorder (!%p140_p2), %s1158_s13, 1 }
   0x6   : > { %143 = sbr.rel (%p140_p2) target bundleno = 274 (0x112), region = 32  ;;  %p165_p4 = scmp.lt.s32.totalorder (!%p140_p2), %s1163_s14, 7 }
   0x7   : > { %s1399_s23 = smov (!%p140_p2), 0  }
   0xb   : > { %s1639_s13 = smov (!%p171_p3, %s1158_s13), 1  ;;  %s1641_s14 = smov (!%p165_p4, %s1163_s14), 7 }
   0xc   : > { %s1307_s15 = sshll.u32 %s1639_s13, 7  ;;  %s1325_s16 = smul.u32 204, %s1641_s14 }
   0xd   : > { %s1392_s19 = scalar_lea.vmem %s1637_s3, %s1307_s15 }
   0xe   : > { %s1397_s22 = scalar_lea.vmem %s1634_s0, %s1325_s16 }
   0xf LB: >> { %v1171_v0 = vld [vmem:[%s1635_s1 + $0x2] sm:$0x3]  ;;  %vm205_vm0 = vcmask 1040384   ;;  %vm206_vm1 = vcmask 1041408   ;;  %v1360_v1 = vmov 65535   ;;  %s1308_s30 = smul.u32 12, %s1358_s23  ;;  %s1358_s23 = sphi %s1399_s23, %s182_s23  }
  0x10   : >> { %v207_v2 = vsel %vm205_vm0, 4294967295, %v1360_v1  ;;  %v188_v3 = vld [vmem:[%s1635_s1] sm:$0x3]  ;;  %v1182_v4 = vld [vmem:[%s1635_s1 + $0x4] sm:$0x3]  ;;  %vm201_vm2 = vcmask 23552  }
  0x11   : >> { %v1413_v5 = vsel %vm206_vm1, %v207_v2, 0  ;;  %v1191_v6 = vld [vmem:[%s1635_s1 + $0x6] sm:$0x3]  ;;  %v1218_v11 = vld [vmem:[%s1635_s1 + $0xc] sm:$0x3]  ;;  %s1433_s13 = scalar_lea.vmem %s1397_s22, %s1308_s30  ;;  %s1304_s8 = sshll.u32 %s1358_s23, 4 }
  0x12   : >> { %v210_v7 = vand.u32 %v1171_v0, %v1413_v5  ;;  %v235_v8 = vand.u32 %v1413_v5, %v188_v3  ;;  %v281_v9 = vand.u32 %v1182_v4, %v1413_v5  ;;  %v328_v10 = vand.u32 %v1191_v6, %v1413_v5  ;;  %v1200_v12 = vld [vmem:[%s1635_s1 + $0x8] sm:$0x3]  ;;  %v1227_v13 = vld [vmem:[%s1635_s1 + $0xe] sm:$0x3]  ;;  %v1209_v16 = vld [vmem:[%s1635_s1 + $0xa] sm:$0x3] }
  0x13   : >> { %v443_v14 = vand.u32 %v1218_v11, %v1413_v5  ;;  %v362_v15 = vand.u32 %v1200_v12, %v1413_v5  ;;  %v1235_v17 = vld [vmem:[%s1635_s1 + $0x10] sm:$0x3]  ;;  %v1309_v19 = vld [vmem:[%s1433_s13] sm:$0xff]  ;;  %v490_v21 = vand.u32 %v1227_v13, %v1413_v5  ;;  %v396_v22 = vand.u32 %v1209_v16, %v1413_v5  ;;  %v253_v23 = vld [vmem:[%s1433_s13 + $0x8] sm:$0x1]  ;;  %s834_s9 = scalar_lea.vmem [#allocation2], %s1304_s8 }
  0x14   : >> { %219 = vmatpush.bf16.msra.mxu0 %v210_v7  ;;  %244 = vmatpush.bf16.msra.mxu1 %v235_v8  ;;  %v1310_v18 = vld [vmem:[%s1433_s13 + $0xcc] sm:$0xff]  ;;  %v1311_v20 = vld [vmem:[%s1433_s13] sm:$0xff]  ;;  %v1190_v25 = vld [vmem:[%s1433_s13 + $0xd4] sm:$0x1]  ;;  %v525_v26 = vand.u32 %v1235_v17, %v1413_v5  ;;  %v261_v27 = vunpack.c.l.b16 %v253_v23  ;;  %vm264_vm3 = vsmask.f32 7424 }
  0x15   : >> { %290 = vmatpush.bf16.msra.mxu2 %v281_v9  ;;  %337 = vmatpush.bf16.msra.mxu3 %v328_v10  ;;  %v1312_v24 = vld [vmem:[%s1433_s13 + $0xcc] sm:$0xff]  ;;  %v266_v28 = vshrl.u32 %v1311_v20, 16  ;;  %v268_v29 = vshll.u32 %v1311_v20, 16  ;;  %v309_v30 = vunpack.c.l.b16 %v1190_v25  ;;  %v1217_v36 = vld [vmem:[%s1433_s13 + $0x1a0] sm:$0x1]  ;;  %v1315_v46 = vld [vmem:[%s1433_s13 + $0x198] sm:$0xff] }
  0x16   : >> { %v313_v31 = vshrl.u32 %v1312_v24, 16  ;;  %v315_v32 = vshll.u32 %v1312_v24, 16  ;;  %v263_v33 = vpack.c.b16 %v261_v27, %v261_v27  ;;  %v1226_v38 = vld [vmem:[%s1433_s13 + $0x26c] sm:$0x1]  ;;  %v1253_v39 = vld [vmem:[%s1635_s1 + $0x14] sm:$0x3]  ;;  %v424_v47 = vunpack.c.l.b16 %v1217_v36 }
  0x17   : >> { %1176 = vmatmul.msk.bf16.vlgmr.msra.gmra.mxu0 %vm201_vm2, %v1310_v18  ;;  %1181 = vmatmul.msk.bf16.vlgmr.msra.gmra.mxu1 %vm201_vm2, %v1309_v19  ;;  %v270_v34 = vrot.slane %v268_v29, 1  ;;  %v311_v35 = vpack.c.b16 %v309_v30, %v309_v30  ;;  %v1262_v43 = vld [vmem:[%s1635_s1 + $0x16] sm:$0x3]  ;;  %v1244_v44 = vld [vmem:[%s1635_s1 + $0x12] sm:$0x3]  ;;  %v1316_v50 = vld [vmem:[%s1433_s13 + $0x264] sm:$0xff]  ;;  %v471_v51 = vunpack.c.l.b16 %v1226_v38  ;;  %v606_v52 = vand.u32 %v1253_v39, %v1413_v5 }
  0x18   : >> { %371 = vmatpush.bf16.msrb.mxu0 %v362_v15  ;;  %405 = vmatpush.bf16.msrb.mxu1 %v396_v22  ;;  %v317_v37 = vrot.slane %v315_v32, 1  ;;  %v273_v41 = vshll.u32 %v263_v33, 16  ;;  %v653_v53 = vand.u32 %v1262_v43, %v1413_v5  ;;  %v559_v54 = vand.u32 %v1244_v44, %v1413_v5  ;;  %v1271_v61 = vld [vmem:[%s1635_s1 + $0x18] sm:$0x3]  ;;  %v1280_v62 = vld [vmem:[%s1635_s1 + $0x1a] sm:$0x3] }
  0x19   : >> { %452 = vmatpush.bf16.msrb.mxu2 %v443_v14  ;;  %499 = vmatpush.bf16.msrb.mxu3 %v490_v21  ;;  %v271_v40 = vor.u32 %v270_v34, %v266_v28  ;;  %v320_v42 = vshll.u32 %v311_v35, 16  ;;  %v426_v57 = vpack.c.b16 %v424_v47, %v424_v47  ;;  %v430_v58 = vshll.u32 %v1315_v46, 16  ;;  %v1313_v63 = vld [vmem:[%s1433_s13 + $0x198] sm:$0xff]  ;;  %v1314_v0 = vld [vmem:[%s1433_s13 + $0x264] sm:$0xff]  ;;  %v1252_v14 = vld [vmem:[%s1433_s13 + $0x14] sm:$0x1] }
  0x1a   : >> { %v318_v45 = vor.u32 %v317_v37, %v313_v31  ;;  %v275_v48 = vrot.slane %v273_v41, 1  ;;  %v473_v59 = vpack.c.b16 %v471_v51, %v471_v51  ;;  %v477_v60 = vshll.u32 %v1316_v50, 16  ;;  %v1261_v15 = vld [vmem:[%s1433_s13 + $0xe0] sm:$0x1]  ;;  %v1289_v16 = vld [vmem:[%s1635_s1 + $0x1c] sm:$0x3] }
  0x1b   : >> { %v322_v49 = vrot.slane %v320_v42, 1  ;;  %v428_v1 = vshrl.u32 %v1315_v46, 16  ;;  %v432_v2 = vrot.slane %v430_v58, 1  ;;  %v435_v3 = vshll.u32 %v426_v57, 16  ;;  %v1298_v17 = vld [vmem:[%s1635_s1 + $0x1e] sm:$0x3] }
  0x1c   : >> { %534 = vmatpush.bf16.msra.mxu0 %v525_v26  ;;  %v276_v55 = vsel %vm264_vm3, %v271_v40, %v275_v48  ;;  %568 = vmatpush.bf16.msra.mxu1 %v559_v54  ;;  %v475_v4 = vshrl.u32 %v1316_v50, 16  ;;  %v479_v6 = vrot.slane %v477_v60, 1  ;;  %v482_v7 = vshll.u32 %v473_v59, 16  ;;  %v1319_v21 = vld [vmem:[%s1433_s13 + $0xc] sm:$0xff]  ;;  %v1320_v22 = vld [vmem:[%s1433_s13 + $0xd8] sm:$0xff]  ;;  %v1323_v43 = vld [vmem:[%s1433_s13 + $0x1a4] sm:$0xff] }
  0x1d   : >> { %v323_v56 = vsel %vm264_vm3, %v318_v45, %v322_v49  ;;  %1187 = vmatmul.msk.bf16.vlgmr.msra.gmra.mxu2 %vm201_vm2, %v276_v55  ;;  %v687_v8 = vand.u32 %v1271_v61, %v1413_v5  ;;  %v721_v9 = vand.u32 %v1280_v62, %v1413_v5  ;;  %v433_v10 = vor.u32 %v432_v2, %v428_v1  ;;  %v1317_v30 = vld [vmem:[%s1433_s13 + $0xc] sm:$0xff]  ;;  %v1318_v31 = vld [vmem:[%s1433_s13 + $0xd8] sm:$0xff]  ;;  %s182_s23 = sadd.s32 1, %s1358_s23  }
  0x1e   : >> { %1196 = vmatmul.msk.bf16.vlgmr.msra.gmra.mxu3 %vm201_vm2, %v323_v56  ;;  %615 = vmatpush.bf16.msra.mxu2 %v606_v52  ;;  %v437_v11 = vrot.slane %v435_v3, 1  ;;  %v480_v12 = vor.u32 %v479_v6, %v475_v4  ;;  %v484_v13 = vrot.slane %v482_v7, 1  ;;  %v587_v19 = vunpack.c.l.b16 %v1252_v14  ;;  %v1288_v41 = vld [vmem:[%s1433_s13 + $0x1ac] sm:$0x1]  ;;  %v1297_v42 = vld [vmem:[%s1433_s13 + $0x278] sm:$0x1] }
  0x1f   : >> { %662 = vmatpush.bf16.msra.mxu3 %v653_v53  ;;  %v634_v23 = vunpack.c.l.b16 %v1261_v15  ;;  %v768_v24 = vand.u32 %v1289_v16, %v1413_v5  ;;  %v815_v25 = vand.u32 %v1298_v17, %v1413_v5  ;;  %v593_v27 = vshll.u32 %v1319_v21, 16  ;;  %v1324_v47 = vld [vmem:[%s1433_s13 + $0x270] sm:$0xff]  ;;  %v1321_v53 = vld [vmem:[%s1433_s13 + $0x1a4] sm:$0xff]  ;;  %p179_p5 = scmp.ge.s32.totalorder %s182_s23, 16  }
  0x20   : >> { %v438_v18 = vsel %vm264_vm3, %v433_v10, %v437_v11  ;;  %v485_v20 = vsel %vm264_vm3, %v480_v12, %v484_v13  ;;  %v589_v26 = vpack.c.b16 %v587_v19, %v587_v19  ;;  %v640_v29 = vshll.u32 %v1320_v22, 16  ;;  %v1322_v54 = vld [vmem:[%s1433_s13 + $0x270] sm:$0xff] }
  0x21   : >> { %v636_v28 = vpack.c.b16 %v634_v23, %v634_v23  ;;  %v591_v32 = vshrl.u32 %v1319_v21, 16  ;;  %v638_v33 = vshrl.u32 %v1320_v22, 16  ;;  %v595_v34 = vrot.slane %v593_v27, 1 }
  0x22   : >> { %v598_v5 = vshll.u32 %v589_v26, 16  ;;  %v642_v35 = vrot.slane %v640_v29, 1  ;;  %v749_v46 = vunpack.c.l.b16 %v1288_v41  ;;  %v796_v48 = vunpack.c.l.b16 %v1297_v42 }
  0x23   : >> { %v645_v36 = vshll.u32 %v636_v28, 16  ;;  %v596_v37 = vor.u32 %v595_v34, %v591_v32  ;;  %v755_v49 = vshll.u32 %v1323_v43, 16  ;;  %v802_v52 = vshll.u32 %v1324_v47, 16 }
  0x24   : >> { %v600_v38 = vrot.slane %v598_v5, 1  ;;  %v643_v39 = vor.u32 %v642_v35, %v638_v33  ;;  %v751_v50 = vpack.c.b16 %v749_v46, %v749_v46  ;;  %v798_v51 = vpack.c.b16 %v796_v48, %v796_v48 }
  0x25   : >> { %v647_v40 = vrot.slane %v645_v36, 1  ;;  %v753_v55 = vshrl.u32 %v1323_v43, 16  ;;  %v757_v56 = vrot.slane %v755_v49, 1  ;;  %v800_v58 = vshrl.u32 %v1324_v47, 16 }
  0x26   : >> { %v601_v44 = vsel %vm264_vm3, %v596_v37, %v600_v38  ;;  %v760_v57 = vshll.u32 %v751_v50, 16  ;;  %v804_v59 = vrot.slane %v802_v52, 1  ;;  %v807_v60 = vshll.u32 %v798_v51, 16 }
  0x27   : >> { %1205 = vmatmul.msk.bf16.vlgmr.msrb.gmra.mxu0 %vm201_vm2, %v1313_v63  ;;  %1214 = vmatmul.msk.bf16.vlgmr.msrb.gmra.mxu1 %vm201_vm2, %v1314_v0  ;;  %v648_v45 = vsel %vm264_vm3, %v643_v39, %v647_v40  ;;  %v758_v61 = vor.u32 %v757_v56, %v753_v55  ;;  %vm835_vm4 = vcmask 130048   ;;  %vm1034_vm5 = vcmask (%p179_p5), 125952  }
  0x28   : >> { %696 = vmatpush.bf16.msrb.mxu0 %v687_v8  ;;  %730 = vmatpush.bf16.msrb.mxu1 %v721_v9  ;;  %v762_v62 = vrot.slane %v760_v57, 1  ;;  %v805_v63 = vor.u32 %v804_v59, %v800_v58  ;;  %v809_v0 = vrot.slane %v807_v60, 1 }
  0x2a   : >> { %v763_v1 = vsel %vm264_vm3, %v758_v61, %v762_v62  ;;  %v810_v2 = vsel %vm264_vm3, %v805_v63, %v809_v0 }
  0x2d   : >> { %1223 = vmatmul.msk.bf16.vlgmr.msrb.gmra.mxu2 %vm201_vm2, %v438_v18 }
  0x2e   : >> { %1232 = vmatmul.msk.bf16.vlgmr.msrb.gmra.mxu3 %vm201_vm2, %v485_v20  ;;  %777 = vmatpush.bf16.msrb.mxu2 %v768_v24 }
  0x2f   : >> { %824 = vmatpush.bf16.msrb.mxu3 %v815_v25 }
  0x37   : >> { %1240 = vmatmul.msk.bf16.vlgmr.msra.gmra.mxu0 %vm201_vm2, %v1317_v30  ;;  %1249 = vmatmul.msk.bf16.vlgmr.msra.gmra.mxu1 %vm201_vm2, %v1318_v31 }
  0x3d   : >> { %1258 = vmatmul.msk.bf16.vlgmr.msra.gmra.mxu2 %vm201_vm2, %v601_v44 }
  0x3e   : >> { %1267 = vmatmul.msk.bf16.vlgmr.msra.gmra.mxu3 %vm201_vm2, %v648_v45 }
  0x47   : >> { %1276 = vmatmul.msk.bf16.vlgmr.msrb.gmra.mxu0 %vm201_vm2, %v1321_v53  ;;  %1285 = vmatmul.msk.bf16.vlgmr.msrb.gmra.mxu1 %vm201_vm2, %v1322_v54 }
  0x4d   : >> { %1294 = vmatmul.msk.bf16.vlgmr.msrb.gmra.mxu2 %vm201_vm2, %v763_v1 }
  0x4e   : >> { %1303 = vmatmul.msk.bf16.vlgmr.msrb.gmra.mxu3 %vm201_vm2, %v810_v2  ;;  %v1529_v2 = vld [vmem:[%s1636_s2] ss:$0 sm:$0xff] (%p179_p5) }
  0x94   : >> { %v221_v3 = vpop.f32.mrf.mxu0  ;;  %v246_v4 = vpop.f32.mrf.mxu1 }
  0x95   : >> { %v247_v12 = vadd.f32 %v246_v4, %v221_v3 }
  0x9c   : >> { %v223_v6 = vpop.f32.mrf.mxu0  ;;  %v248_v7 = vpop.f32.mrf.mxu1 }
  0x9d   : >> { %v249_v19 = vadd.f32 %v248_v7, %v223_v6 }
  0xa0   : >> { %v292_v8 = vpop.f32.mrf.mxu2 }
  0xa1   : >> { %v339_v9 = vpop.f32.mrf.mxu3  ;;  %v297_v13 = vadd.f32 %v292_v8, %v247_v12 }
  0xa3   : >> { %v344_v17 = vadd.f32 %v339_v9, %v297_v13 }
  0xa4   : >> { %v373_v10 = vpop.f32.mrf.mxu0  ;;  %v407_v11 = vpop.f32.mrf.mxu1 }
  0xa5   : >> { %v378_v20 = vadd.f32 %v373_v10, %v344_v17 }
  0xa7   : >> { %v412_v25 = vadd.f32 %v407_v11, %v378_v20 }
  0xa8   : >> { %v294_v14 = vpop.f32.mrf.mxu2 }
  0xa9   : >> { %v341_v15 = vpop.f32.mrf.mxu3  ;;  %v298_v21 = vadd.f32 %v294_v14, %v249_v19 }
  0xab   : >> { %v345_v26 = vadd.f32 %v341_v15, %v298_v21 }
  0xac   : >> { %v375_v16 = vpop.f32.mrf.mxu0  ;;  %v409_v18 = vpop.f32.mrf.mxu1 }
  0xad   : >> { %v379_v29 = vadd.f32 %v375_v16, %v345_v26 }
  0xaf   : >> { %v413_v33 = vadd.f32 %v409_v18, %v379_v29 }
  0xb0   : >> { %v454_v22 = vpop.f32.mrf.mxu2 }
  0xb1   : >> { %v501_v23 = vpop.f32.mrf.mxu3  ;;  %v459_v27 = vadd.f32 %v454_v22, %v412_v25 }
  0xb3   : >> { %v506_v32 = vadd.f32 %v501_v23, %v459_v27 }
  0xb4   : >> { %v536_v24 = vpop.f32.mrf.mxu0  ;;  %v570_v28 = vpop.f32.mrf.mxu1 }
  0xb5   : >> { %v541_v5 = vadd.f32 %v536_v24, %v506_v32 }
  0xb7   : >> { %v575_v39 = vadd.f32 %v570_v28, %v541_v5 }
  0xb8   : >> { %v456_v30 = vpop.f32.mrf.mxu2 }
  0xb9   : >> { %v503_v31 = vpop.f32.mrf.mxu3  ;;  %v460_v35 = vadd.f32 %v456_v30, %v413_v33 }
  0xbb   : >> { %v507_v40 = vadd.f32 %v503_v31, %v460_v35 }
  0xbc   : >> { %v538_v34 = vpop.f32.mrf.mxu0  ;;  %v572_v36 = vpop.f32.mrf.mxu1 }
  0xbd   : >> { %v542_v42 = vadd.f32 %v538_v34, %v507_v40 }
  0xbf   : >> { %v576_v47 = vadd.f32 %v572_v36, %v542_v42 }
  0xc0   : >> { %v617_v37 = vpop.f32.mrf.mxu2 }
  0xc1   : >> { %v664_v38 = vpop.f32.mrf.mxu3  ;;  %v622_v41 = vadd.f32 %v617_v37, %v575_v39 }
  0xc3   : >> { %v669_v44 = vadd.f32 %v664_v38, %v622_v41 }
  0xc4   : >> { %v698_v43 = vpop.f32.mrf.mxu0  ;;  %v732_v48 = vpop.f32.mrf.mxu1 }
  0xc5   : >> { %v703_v49 = vadd.f32 %v698_v43, %v669_v44 }
  0xc7   : >> { %v737_v51 = vadd.f32 %v732_v48, %v703_v49 }
  0xc8   : >> { %v619_v45 = vpop.f32.mrf.mxu2 }
  0xc9   : >> { %v666_v46 = vpop.f32.mrf.mxu3  ;;  %v623_v50 = vadd.f32 %v619_v45, %v576_v47 }
  0xcb   : >> { %v670_v52 = vadd.f32 %v666_v46, %v623_v50 }
  0xcc   : >> { %v700_v53 = vpop.f32.mrf.mxu0  ;;  %v734_v59 = vpop.f32.mrf.mxu1 }
  0xcd   : >> { %v704_v57 = vadd.f32 %v700_v53, %v670_v52 }
  0xcf   : >> { %v738_v60 = vadd.f32 %v734_v59, %v704_v57 }
  0xd0   : >> { %v779_v54 = vpop.f32.mrf.mxu2 }
  0xd1   : >> { %v826_v55 = vpop.f32.mrf.mxu3  ;;  %v784_v56 = vadd.f32 %v779_v54, %v737_v51 }
  0xd3   : >> { %v831_v58 = vadd.f32 %v826_v55, %v784_v56 }
  0xd5   : >> { %836 = vst.msk [vmem:[%s834_s9] sm:$0xff] %vm835_vm4, %v831_v58 }
  0xd8   : >> { %v781_v61 = vpop.f32.mrf.mxu2 }
  0xd9   : >> { %v785_v62 = vadd.f32 %v781_v61, %v738_v60  ;;  %v828_v63 = vpop.f32.mrf.mxu3  ;;  %181 = sbr.rel (!%p179_p5) target bundleno = 15 (0xf), region = 93 }
  0xdb   : >> { %v832_v0 = vadd.f32 %v828_v63, %v785_v62 }
  0xdd   : >> { %837 = vst.msk [vmem:[%s834_s9 + $0x8] sm:$0xff] %vm835_vm4, %v832_v0 }
  0xe4   : > { %v838_v1 = vld [vmem:[#allocation2] sm:$0xff]  ;;  %v839_v3 = vld [vmem:[#allocation2 + $0x8] sm:$0xff]  ;;  %v840_v4 = vld [vmem:[#allocation2 + $0x10] sm:$0xff] }
  0xe5   : > { %v841_v6 = vld [vmem:[#allocation2 + $0x18] sm:$0xff]  ;;  %v874_v7 = vadd.f32 %v1529_v2, %v838_v1  ;;  %v875_v8 = vadd.f32 %v1529_v2, %v839_v3  ;;  %v876_v9 = vadd.f32 %v1529_v2, %v840_v4  ;;  %v842_v11 = vld [vmem:[#allocation2 + $0x20] sm:$0xff]  ;;  %v843_v12 = vld [vmem:[#allocation2 + $0x28] sm:$0xff] }
  0xe6   : > { %v877_v10 = vadd.f32 %v1529_v2, %v841_v6  ;;  %v844_v13 = vld [vmem:[#allocation2 + $0x30] sm:$0xff]  ;;  %v878_v14 = vadd.f32 %v1529_v2, %v842_v11  ;;  %v879_v15 = vadd.f32 %v1529_v2, %v843_v12  ;;  %v845_v24 = vld [vmem:[#allocation2 + $0x38] sm:$0xff]  ;;  %v846_v29 = vld [vmem:[#allocation2 + $0x40] sm:$0xff] }
  0xe7   : > { %v880_v16 = vadd.f32 %v1529_v2, %v844_v13  ;;  %vm906_vm6 = vcmp.ge.f32.partialorder %v874_v7, 0.0  ;;  %v938_v17 = vmul.f32 0.2, %v874_v7  ;;  %vm907_vm7 = vcmp.ge.f32.partialorder %v875_v8, 0.0  ;;  %v847_v30 = vld [vmem:[#allocation2 + $0x48] sm:$0xff]  ;;  %v848_v31 = vld [vmem:[#allocation2 + $0x50] sm:$0xff] }
  0xe8   : > { %v939_v18 = vmul.f32 0.2, %v875_v8  ;;  %vm908_vm8 = vcmp.ge.f32.partialorder %v876_v9, 0.0  ;;  %v940_v19 = vmul.f32 0.2, %v876_v9  ;;  %vm909_vm9 = vcmp.ge.f32.partialorder %v877_v10, 0.0 }
  0xe9   : > { %v941_v20 = vmul.f32 0.2, %v877_v10  ;;  %v970_v21 = vsel %vm906_vm6, %v874_v7, %v938_v17  ;;  %vm910_vm10 = vcmp.ge.f32.partialorder %v878_v14, 0.0  ;;  %v942_v23 = vmul.f32 0.2, %v878_v14  ;;  %v849_v5 = vld [vmem:[#allocation2 + $0x58] sm:$0xff] }
  0xea   : > { %v971_v22 = vsel %vm907_vm7, %v875_v8, %v939_v18  ;;  %v1002_v25 = vpack.c.bf16 %v970_v21, %v970_v21  ;;  %v972_v27 = vsel %vm908_vm8, %v876_v9, %v940_v19  ;;  %vm911_vm11 = vcmp.ge.f32.partialorder %v879_v15, 0.0  ;;  %v850_v45 = vld [vmem:[#allocation2 + $0x60] sm:$0xff]  ;;  %v851_v49 = vld [vmem:[#allocation2 + $0x68] sm:$0xff]  ;;  %v852_v53 = vld [vmem:[#allocation2 + $0x70] sm:$0xff] }
  0xeb   : > { %v1003_v26 = vpack.c.bf16 %v971_v22, %v971_v22  ;;  %v973_v28 = vsel %vm909_vm9, %v877_v10, %v941_v20  ;;  %v1004_v32 = vpack.c.bf16 %v972_v27, %v972_v27  ;;  %v974_v34 = vsel %vm910_vm10, %v878_v14, %v942_v23  ;;  %v853_v57 = vld [vmem:[#allocation2 + $0x78] sm:$0xff]  ;;  %v854_v1 = vld [vmem:[#allocation2 + $0x80] sm:$0xff]  ;;  %v855_v8 = vld [vmem:[#allocation2 + $0x88] sm:$0xff] }
  0xec   : > { %v1005_v33 = vpack.c.bf16 %v973_v28, %v973_v28  ;;  %1035 = vst.msk [vmem:[%s1392_s19] sm:$0xf] %vm1034_vm5, %v1002_v25  ;;  %v1006_v35 = vpack.c.bf16 %v974_v34, %v974_v34  ;;  %v943_v36 = vmul.f32 0.2, %v879_v15  ;;  %vm912_vm12 = vcmp.ge.f32.partialorder %v880_v16, 0.0  ;;  %v856_v20 = vld [vmem:[#allocation2 + $0x90] sm:$0xff] }
  0xed   : > { %v881_v37 = vadd.f32 %v1529_v2, %v845_v24  ;;  %1036 = vst.msk [vmem:[%s1392_s19 + $0x4] sm:$0xf] %vm1034_vm5, %v1003_v26  ;;  %v944_v38 = vmul.f32 0.2, %v880_v16  ;;  %v882_v39 = vadd.f32 %v1529_v2, %v846_v29  ;;  %v883_v40 = vadd.f32 %v1529_v2, %v847_v30  ;;  %v857_v21 = vld [vmem:[#allocation2 + $0x98] sm:$0xff]  ;;  %v858_v22 = vld [vmem:[#allocation2 + $0xa0] sm:$0xff] }
  0xee   : > { %v884_v41 = vadd.f32 %v1529_v2, %v848_v31  ;;  %1037 = vst.msk [vmem:[%s1392_s19 + $0x8] sm:$0xf] %vm1034_vm5, %v1004_v32  ;;  %v975_v42 = vsel %vm911_vm11, %v879_v15, %v943_v36  ;;  %v885_v44 = vadd.f32 %v1529_v2, %v849_v5  ;;  %v886_v63 = vadd.f32 %v1529_v2, %v850_v45  ;;  %v859_v26 = vld [vmem:[#allocation2 + $0xa8] sm:$0xff]  ;;  %v860_v27 = vld [vmem:[#allocation2 + $0xb0] sm:$0xff]  ;;  %v861_v28 = vld [vmem:[#allocation2 + $0xb8] sm:$0xff] }
  0xef   : > { %vm913_vm13 = vcmp.ge.f32.partialorder %v881_v37, 0.0  ;;  %v945_v43 = vmul.f32 0.2, %v881_v37  ;;  %1038 = vst.msk [vmem:[%s1392_s19 + $0xc] sm:$0xf] %vm1034_vm5, %v1005_v33  ;;  %v1007_v46 = vpack.c.bf16 %v975_v42, %v975_v42  ;;  %v976_v47 = vsel %vm912_vm12, %v880_v16, %v944_v38  ;;  %v862_v36 = vld [vmem:[#allocation2 + $0xc0] sm:$0xff] }
  0xf0   : > { %vm914_vm14 = vcmp.ge.f32.partialorder %v882_v39, 0.0  ;;  %v946_v48 = vmul.f32 0.2, %v882_v39  ;;  %1039 = vst.msk [vmem:[%s1392_s19 + $0x10] sm:$0xf] %vm1034_vm5, %v1006_v35  ;;  %v1008_v50 = vpack.c.bf16 %v976_v47, %v976_v47  ;;  %vm915_vm15 = vcmp.ge.f32.partialorder %v883_v40, 0.0 }
  0xf1   : > { %v977_v51 = vsel %vm913_vm13, %v881_v37, %v945_v43  ;;  %v947_v52 = vmul.f32 0.2, %v883_v40  ;;  %1040 = vst.msk [vmem:[%s1392_s19 + $0x14] sm:$0xf] %vm1034_vm5, %v1007_v46  ;;  %vm916_vm0 = vcmp.ge.f32.partialorder %v884_v41, 0.0  ;;  %vm917_vm1 = vcmp.ge.f32.partialorder %v885_v44, 0.0 }
  0xf2   : > { %v1009_v54 = vpack.c.bf16 %v977_v51, %v977_v51  ;;  %v978_v55 = vsel %vm914_vm14, %v882_v39, %v946_v48  ;;  %v948_v56 = vmul.f32 0.2, %v884_v41  ;;  %1041 = vst.msk [vmem:[%s1392_s19 + $0x18] sm:$0xf] %vm1034_vm5, %v1008_v50  ;;  %v949_v60 = vmul.f32 0.2, %v885_v44 }
  0xf3   : > { %v1010_v58 = vpack.c.bf16 %v978_v55, %v978_v55  ;;  %v979_v59 = vsel %vm915_vm15, %v883_v40, %v947_v52  ;;  %v887_v0 = vadd.f32 %v1529_v2, %v851_v49  ;;  %v888_v6 = vadd.f32 %v1529_v2, %v852_v53 }
  0xf4   : > { %1042 = vst.msk [vmem:[%s1392_s19 + $0x1c] sm:$0xf] %vm1034_vm5, %v1009_v54  ;;  %v1011_v61 = vpack.c.bf16 %v979_v59, %v979_v59  ;;  %v980_v62 = vsel %vm916_vm0, %v884_v41, %v948_v56  ;;  %v981_v4 = vsel %vm917_vm1, %v885_v44, %v949_v60  ;;  %v889_v7 = vadd.f32 %v1529_v2, %v853_v57  ;;  %v863_v41 = vld [vmem:[#allocation2 + $0xc8] sm:$0xff]  ;;  %v864_v56 = vld [vmem:[#allocation2 + $0xd0] sm:$0xff]  ;;  %v865_v57 = vld [vmem:[#allocation2 + $0xd8] sm:$0xff] }
  0xf5   : > { %1043 = vst.msk [vmem:[%s1392_s19 + $0x20] sm:$0xf] %vm1034_vm5, %v1010_v58  ;;  %v1012_v3 = vpack.c.bf16 %v980_v62, %v980_v62  ;;  %v1013_v9 = vpack.c.bf16 %v981_v4, %v981_v4  ;;  %vm918_vm2 = vcmp.ge.f32.partialorder %v886_v63, 0.0  ;;  %v950_v10 = vmul.f32 0.2, %v886_v63  ;;  %v866_v62 = vld [vmem:[#allocation2 + $0xe0] sm:$0xff] }
  0xf6   : > { %1044 = vst.msk [vmem:[%s1392_s19 + $0x24] sm:$0xf] %vm1034_vm5, %v1011_v61  ;;  %vm919_vm3 = vcmp.ge.f32.partialorder %v887_v0, 0.0  ;;  %v951_v11 = vmul.f32 0.2, %v887_v0  ;;  %vm920_vm4 = vcmp.ge.f32.partialorder %v888_v6, 0.0  ;;  %v890_v12 = vadd.f32 %v1529_v2, %v854_v1 }
  0xf7   : > { %1045 = vst.msk [vmem:[%s1392_s19 + $0x28] sm:$0xf] %vm1034_vm5, %v1012_v3  ;;  %vm921_vm6 = vcmp.ge.f32.partialorder %v889_v7, 0.0  ;;  %v982_v13 = vsel %vm918_vm2, %v886_v63, %v950_v10  ;;  %v952_v14 = vmul.f32 0.2, %v888_v6  ;;  %v891_v16 = vadd.f32 %v1529_v2, %v855_v8  ;;  %v867_v63 = vld [vmem:[#allocation2 + $0xe8] sm:$0xff] }
  0xf8   : > { %1046 = vst.msk [vmem:[%s1392_s19 + $0x2c] sm:$0xf] %vm1034_vm5, %v1013_v9  ;;  %v953_v15 = vmul.f32 0.2, %v889_v7  ;;  %v1014_v17 = vpack.c.bf16 %v982_v13, %v982_v13  ;;  %v983_v18 = vsel %vm919_vm3, %v887_v0, %v951_v11  ;;  %vm922_vm7 = vcmp.ge.f32.partialorder %v890_v12, 0.0 }
  0xf9   : > { %v954_v19 = vmul.f32 0.2, %v890_v12  ;;  %v1015_v23 = vpack.c.bf16 %v983_v18, %v983_v18  ;;  %v984_v24 = vsel %vm920_vm4, %v888_v6, %v952_v14  ;;  %vm923_vm8 = vcmp.ge.f32.partialorder %v891_v16, 0.0 }
  0xfa   : > { %v985_v25 = vsel %vm921_vm6, %v889_v7, %v953_v15  ;;  %1047 = vst.msk [vmem:[%s1392_s19 + $0x30] sm:$0xf] %vm1034_vm5, %v1014_v17  ;;  %v1016_v29 = vpack.c.bf16 %v984_v24, %v984_v24  ;;  %v955_v32 = vmul.f32 0.2, %v891_v16  ;;  %v892_v34 = vadd.f32 %v1529_v2, %v856_v20 }
  0xfb   : > { %v1017_v30 = vpack.c.bf16 %v985_v25, %v985_v25  ;;  %v986_v31 = vsel %vm922_vm7, %v890_v12, %v954_v19  ;;  %1048 = vst.msk [vmem:[%s1392_s19 + $0x34] sm:$0xf] %vm1034_vm5, %v1015_v23  ;;  %v893_v5 = vadd.f32 %v1529_v2, %v857_v21  ;;  %v894_v35 = vadd.f32 %v1529_v2, %v858_v22  ;;  %v868_v12 = vld [vmem:[#allocation2 + $0xf0] sm:$0xff] }
  0xfc   : > { %v1018_v33 = vpack.c.bf16 %v986_v31, %v986_v31  ;;  %1049 = vst.msk [vmem:[%s1392_s19 + $0x38] sm:$0xf] %vm1034_vm5, %v1016_v29  ;;  %v987_v37 = vsel %vm923_vm8, %v891_v16, %v955_v32  ;;  %v895_v38 = vadd.f32 %v1529_v2, %v859_v26  ;;  %v896_v39 = vadd.f32 %v1529_v2, %v860_v27  ;;  %v869_v16 = vld [vmem:[#allocation2 + $0xf8] sm:$0xff] }
  0xfd   : > { %v897_v40 = vadd.f32 %v1529_v2, %v861_v28  ;;  %1050 = vst.msk [vmem:[%s1392_s19 + $0x3c] sm:$0xf] %vm1034_vm5, %v1017_v30  ;;  %v1019_v42 = vpack.c.bf16 %v987_v37, %v987_v37  ;;  %vm924_vm9 = vcmp.ge.f32.partialorder %v892_v34, 0.0  ;;  %v956_v43 = vmul.f32 0.2, %v892_v34 }
  0xfe   : > { %vm925_vm10 = vcmp.ge.f32.partialorder %v893_v5, 0.0  ;;  %1051 = vst.msk [vmem:[%s1392_s19 + $0x40] sm:$0xf] %vm1034_vm5, %v1018_v33  ;;  %v957_v44 = vmul.f32 0.2, %v893_v5  ;;  %vm926_vm11 = vcmp.ge.f32.partialorder %v894_v35, 0.0  ;;  %v898_v45 = vadd.f32 %v1529_v2, %v862_v36 }
  0xff   : > { %vm927_vm12 = vcmp.ge.f32.partialorder %v895_v38, 0.0  ;;  %1052 = vst.msk [vmem:[%s1392_s19 + $0x44] sm:$0xf] %vm1034_vm5, %v1019_v42  ;;  %v988_v46 = vsel %vm924_vm9, %v892_v34, %v956_v43  ;;  %v958_v47 = vmul.f32 0.2, %v894_v35  ;;  %v899_v49 = vadd.f32 %v1529_v2, %v863_v41 }
 0x100   : > { %v959_v48 = vmul.f32 0.2, %v895_v38  ;;  %v1020_v50 = vpack.c.bf16 %v988_v46, %v988_v46  ;;  %v989_v51 = vsel %vm925_vm10, %v893_v5, %v957_v44  ;;  %vm928_vm13 = vcmp.ge.f32.partialorder %v896_v39, 0.0 }
 0x101   : > { %v960_v52 = vmul.f32 0.2, %v896_v39  ;;  %v1021_v53 = vpack.c.bf16 %v989_v51, %v989_v51  ;;  %v990_v54 = vsel %vm926_vm11, %v894_v35, %v958_v47  ;;  %vm929_vm14 = vcmp.ge.f32.partialorder %v897_v40, 0.0 }
 0x102   : > { %v991_v55 = vsel %vm927_vm12, %v895_v38, %v959_v48  ;;  %1053 = vst.msk [vmem:[%s1392_s19 + $0x48] sm:$0xf] %vm1034_vm5, %v1020_v50  ;;  %v1022_v58 = vpack.c.bf16 %v990_v54, %v990_v54  ;;  %v961_v61 = vmul.f32 0.2, %v897_v40  ;;  %vm930_vm15 = vcmp.ge.f32.partialorder %v898_v45, 0.0 }
 0x103   : > { %v1023_v59 = vpack.c.bf16 %v991_v55, %v991_v55  ;;  %v992_v60 = vsel %vm928_vm13, %v896_v39, %v960_v52  ;;  %1054 = vst.msk [vmem:[%s1392_s19 + $0x4c] sm:$0xf] %vm1034_vm5, %v1021_v53  ;;  %v962_v1 = vmul.f32 0.2, %v898_v45  ;;  %vm931_vm0 = vcmp.ge.f32.partialorder %v899_v49, 0.0 }
 0x104   : > { %v1024_v0 = vpack.c.bf16 %v992_v60, %v992_v60  ;;  %1055 = vst.msk [vmem:[%s1392_s19 + $0x50] sm:$0xf] %vm1034_vm5, %v1022_v58  ;;  %v993_v3 = vsel %vm929_vm14, %v897_v40, %v961_v61  ;;  %v963_v4 = vmul.f32 0.2, %v899_v49  ;;  %v900_v6 = vadd.f32 %v1529_v2, %v864_v56 }
 0x105   : > { %v901_v7 = vadd.f32 %v1529_v2, %v865_v57  ;;  %1056 = vst.msk [vmem:[%s1392_s19 + $0x54] sm:$0xf] %vm1034_vm5, %v1023_v59  ;;  %v1025_v8 = vpack.c.bf16 %v993_v3, %v993_v3  ;;  %v994_v9 = vsel %vm930_vm15, %v898_v45, %v962_v1  ;;  %v902_v10 = vadd.f32 %v1529_v2, %v866_v62 }
 0x106   : > { %v903_v11 = vadd.f32 %v1529_v2, %v867_v63  ;;  %1057 = vst.msk [vmem:[%s1392_s19 + $0x58] sm:$0xf] %vm1034_vm5, %v1024_v0  ;;  %v1026_v13 = vpack.c.bf16 %v994_v9, %v994_v9  ;;  %v995_v14 = vsel %vm931_vm0, %v899_v49, %v963_v4  ;;  %vm932_vm1 = vcmp.ge.f32.partialorder %v900_v6, 0.0 }
 0x107   : > { %v964_v15 = vmul.f32 0.2, %v900_v6  ;;  %1058 = vst.msk [vmem:[%s1392_s19 + $0x5c] sm:$0xf] %vm1034_vm5, %v1025_v8  ;;  %v1027_v17 = vpack.c.bf16 %v995_v14, %v995_v14  ;;  %vm933_vm2 = vcmp.ge.f32.partialorder %v901_v7, 0.0  ;;  %vm934_vm3 = vcmp.ge.f32.partialorder %v902_v10, 0.0 }
 0x108   : > { %v965_v18 = vmul.f32 0.2, %v901_v7  ;;  %1059 = vst.msk [vmem:[%s1392_s19 + $0x60] sm:$0xf] %vm1034_vm5, %v1026_v13  ;;  %v966_v20 = vmul.f32 0.2, %v902_v10  ;;  %v904_v21 = vadd.f32 %v1529_v2, %v868_v12  ;;  %v905_v25 = vadd.f32 %v1529_v2, %v869_v16 }
 0x109   : > { %v996_v19 = vsel %vm932_vm1, %v900_v6, %v964_v15  ;;  %vm935_vm4 = vcmp.ge.f32.partialorder %v903_v11, 0.0  ;;  %1060 = vst.msk [vmem:[%s1392_s19 + $0x64] sm:$0xf] %vm1034_vm5, %v1027_v17  ;;  %v967_v24 = vmul.f32 0.2, %v903_v11 }
 0x10a   : > { %v1028_v22 = vpack.c.bf16 %v996_v19, %v996_v19  ;;  %v997_v23 = vsel %vm933_vm2, %v901_v7, %v965_v18  ;;  %v998_v27 = vsel %vm934_vm3, %v902_v10, %v966_v20  ;;  %vm936_vm6 = vcmp.ge.f32.partialorder %v904_v21, 0.0 }
 0x10b   : > { %v1029_v26 = vpack.c.bf16 %v997_v23, %v997_v23  ;;  %v968_v28 = vmul.f32 0.2, %v904_v21  ;;  %v1030_v29 = vpack.c.bf16 %v998_v27, %v998_v27  ;;  %v999_v30 = vsel %vm935_vm4, %v903_v11, %v967_v24 }
 0x10c   : > { %1061 = vst.msk [vmem:[%s1392_s19 + $0x68] sm:$0xf] %vm1034_vm5, %v1028_v22  ;;  %vm937_vm7 = vcmp.ge.f32.partialorder %v905_v25, 0.0  ;;  %v969_v31 = vmul.f32 0.2, %v905_v25  ;;  %v1031_v32 = vpack.c.bf16 %v999_v30, %v999_v30 }
 0x10d   : > { %1062 = vst.msk [vmem:[%s1392_s19 + $0x6c] sm:$0xf] %vm1034_vm5, %v1029_v26  ;;  %v1000_v33 = vsel %vm936_vm6, %v904_v21, %v968_v28 }
 0x10e   : > { %1063 = vst.msk [vmem:[%s1392_s19 + $0x70] sm:$0xf] %vm1034_vm5, %v1030_v29  ;;  %v1032_v2 = vpack.c.bf16 %v1000_v33, %v1000_v33  ;;  %v1001_v34 = vsel %vm937_vm7, %v905_v25, %v969_v31 }
 0x10f   : > { %1064 = vst.msk [vmem:[%s1392_s19 + $0x74] sm:$0xf] %vm1034_vm5, %v1031_v32  ;;  %v1033_v5 = vpack.c.bf16 %v1001_v34, %v1001_v34 }
 0x110   : > { %1065 = vst.msk [vmem:[%s1392_s19 + $0x78] sm:$0xf] %vm1034_vm5, %v1032_v2 }
 0x111   : > { %1066 = vst.msk [vmem:[%s1392_s19 + $0x7c] sm:$0xf] %vm1034_vm5, %v1033_v5 }
 0x112 PF: > { %s13_s12 = sadd.s32 1, %s1354_s12  }
 0x113   : > { %p10_p6 = scmp.ge.s32.totalorder %s13_s12, 4  }
 0x115   :  { %12 = sbr.rel (!%p10_p6) target bundleno = 1 (0x1), region = 104 }

// kernel: _lambda_.6
= control target key start
LH: loop header
LB: loop body
LE: loop exit
PB: predicated region body
PF: predicated region fallthrough
CT: control target
= control target key end

     0   :  { %s1271_s12 = smov 0   ;;  %s1434_s0 = inlined_call_operand.vmem [shape: bf16[8,9,9,16], index: 0, kind: input, shape index: {}]   ;;  %s1435_s1 = inlined_call_operand.vmem [shape: bf16[16,16,32], index: 1, kind: input, shape index: {}]   ;;  %s1436_s2 = inlined_call_operand.vmem [shape: f32[1,32], index: 2, kind: input, shape index: {}]   ;;  %s1437_s3 = inlined_call_operand.vmem [shape: bf16[2,8,8,32], index: 3, kind: output, shape index: {}]  }
   0x1 LB: > { %s989_s13 = sadd.s32 4294967295, %s1244_s12   ;;  %p993_p0 = scmp.ge.s32.totalorder %s1244_s12, 1  ;;  %s1244_s12 = sphi %s1271_s12, %s13_s12  }
   0x2   : > { %p139_p1 = scmp.lt.s32.totalorder %s1244_s12, 3 }
   0x4   : > { %p140_p2 = pnand %p993_p0, %p139_p1 }
   0x5   : > { %s994_s14 = sshll.u32 (!%p140_p2), %s989_s13, 2  ;;  %p171_p3 = scmp.lt.s32.totalorder (!%p140_p2), %s989_s13, 1 }
   0x6   : > { %143 = sbr.rel (%p140_p2) target bundleno = 325 (0x145), region = 32  ;;  %p165_p4 = scmp.lt.s32.totalorder (!%p140_p2), %s994_s14, 7 }
   0x7   : > { %s1289_s23 = smov (!%p140_p2), 0  }
   0xb   : > { %s1439_s13 = smov (!%p171_p3, %s989_s13), 1  ;;  %s1441_s14 = smov (!%p165_p4, %s994_s14), 7 }
   0xc   : > { %s1179_s15 = sshll.u32 %s1439_s13, 5  ;;  %s1211_s16 = smul.u32 72, %s1441_s14 }
   0xd   : > { %s1282_s19 = scalar_lea.vmem %s1437_s3, %s1179_s15 }
   0xe   : > { %s1287_s22 = scalar_lea.vmem %s1434_s0, %s1211_s16 }
   0xf LB: >> { %v1183_v0 = vld [vmem:[%s1435_s1 + $0x8] sm:$0xff]  ;;  %v1181_v1 = vld [vmem:[%s1435_s1] sm:$0xff]  ;;  %v1185_v2 = vld [vmem:[%s1435_s1 + $0x10] sm:$0xff]  ;;  %s1180_s9 = sshll.u32 %s1248_s23, 3  ;;  %vm202_vm0 = vcmask 130048   ;;  %vm744_vm1 = vcmask 261120   ;;  %s1248_s23 = sphi %s1289_s23, %s182_s23  }
  0x10   : >> { %v1187_v3 = vld [vmem:[%s1435_s1 + $0x18] sm:$0xff]  ;;  %v1193_v4 = vld [vmem:[%s1435_s1 + $0x30] sm:$0xff]  ;;  %213 = vmatpush.bf16.msra.mxu0 %v1183_v0  ;;  %235 = vmatpush.bf16.msra.mxu1 %v1181_v1  ;;  %v1189_v6 = vld [vmem:[%s1435_s1 + $0x20] sm:$0xff]  ;;  %s1322_s15 = scalar_lea.vmem %s1287_s22, %s1180_s9  ;;  %s743_s8 = scalar_lea.vmem [#allocation2], %s1180_s9 }
  0x11   : >> { %v1195_v5 = vld [vmem:[%s1435_s1 + $0x38] sm:$0xff]  ;;  %v1191_v7 = vld [vmem:[%s1435_s1 + $0x28] sm:$0xff]  ;;  %274 = vmatpush.bf16.msra.mxu2 %v1185_v2  ;;  %314 = vmatpush.bf16.msra.mxu3 %v1187_v3  ;;  %v1196_v8 = vld [vmem:[%s1435_s1 + $0x40] sm:$0xff]  ;;  %s182_s23 = sadd.s32 1, %s1248_s23  }
  0x12   : >> { %v1198_v9 = vld [vmem:[%s1435_s1 + $0x48] sm:$0xff]  ;;  %v186_v11 = vld [vmem:[%s1322_s15] sm:$0xf]  ;;  %v1184_v13 = vld [vmem:[%s1322_s15] sm:$0x10]  ;;  %p179_p5 = scmp.ge.s32.totalorder %s182_s23, 8  }
  0x13   : >> { %v1002_v10 = vld [vmem:[%s1322_s15 + $0x48] sm:$0xf]  ;;  %v1019_v12 = vld [vmem:[%s1322_s15] sm:$0xf]  ;;  %1014 = vmatmul.msk.bf16.vlgmr.msra.gmra.mxu1 %vm202_vm0, %v186_v11  ;;  %v1186_v15 = vld [vmem:[%s1322_s15 + $0x48] sm:$0x10] }
  0x14   : >> { %1009 = vmatmul.msk.bf16.vlgmr.msra.gmra.mxu0 %vm202_vm0, %v1002_v10  ;;  %v1032_v14 = vld [vmem:[%s1322_s15 + $0x48] sm:$0xf]  ;;  %v1020_v16 = vor.u32 %v1184_v13, %v1019_v12  ;;  %374 = vmatpush.bf16.msrb.mxu1 %v1191_v7  ;;  %v1065_v24 = vld [vmem:[%s1322_s15 + $0x90] sm:$0xf]  ;;  %v1202_v26 = vld [vmem:[%s1435_s1 + $0x58] sm:$0xff]  ;;  %vm889_vm6 = vcmask (%p179_p5), 257024  }
  0x15   : >> { %414 = vmatpush.bf16.msrb.mxu2 %v1193_v4  ;;  %454 = vmatpush.bf16.msrb.mxu3 %v1195_v5  ;;  %v1033_v17 = vor.u32 %v1186_v15, %v1032_v14  ;;  %v1200_v25 = vld [vmem:[%s1435_s1 + $0x50] sm:$0xff]  ;;  %v1078_v28 = vld [vmem:[%s1322_s15 + $0xd8] sm:$0xf]  ;;  %v1194_v29 = vld [vmem:[%s1322_s15 + $0xd8] sm:$0x10] }
  0x16   : >> { %344 = vmatpush.bf16.msrb.mxu0 %v1189_v6  ;;  %v252_v18 = vshrl.u32 %v1020_v16, 16  ;;  %v254_v19 = vshll.u32 %v1020_v16, 16  ;;  %v1192_v27 = vld [vmem:[%s1322_s15 + $0x90] sm:$0x10]  ;;  %v1079_v33 = vor.u32 %v1194_v29, %v1078_v28  ;;  %v1041_v34 = vld [vmem:[%s1322_s15 + $0x90] sm:$0xf] }
  0x17   : >> { %v292_v20 = vshrl.u32 %v1033_v17, 16  ;;  %v294_v21 = vshll.u32 %v1033_v17, 16  ;;  %v1066_v32 = vor.u32 %v1192_v27, %v1065_v24  ;;  %v1051_v35 = vld [vmem:[%s1322_s15 + $0xd8] sm:$0xf]  ;;  %v1204_v38 = vld [vmem:[%s1435_s1 + $0x60] sm:$0xff]  ;;  %v1206_v39 = vld [vmem:[%s1435_s1 + $0x68] sm:$0xff] }
  0x18   : >> { %515 = vmatpush.bf16.msra.mxu1 %v1198_v9  ;;  %v256_v22 = vrot.slane %v254_v19, 1  ;;  %v434_v37 = vshll.u32 %v1079_v33, 16  ;;  %v432_v42 = vshrl.u32 %v1079_v33, 16  ;;  %v1110_v46 = vld [vmem:[%s1322_s15 + $0x8] sm:$0xf]  ;;  %v1208_v50 = vld [vmem:[%s1435_s1 + $0x70] sm:$0xff] }
  0x19   : >> { %v296_v23 = vrot.slane %v294_v21, 1  ;;  %v394_v36 = vshll.u32 %v1066_v32, 16  ;;  %v392_v40 = vshrl.u32 %v1066_v32, 16  ;;  %v1199_v47 = vld [vmem:[%s1322_s15 + $0x8] sm:$0x10]  ;;  %v1210_v51 = vld [vmem:[%s1435_s1 + $0x78] sm:$0xff] }
  0x1a   : >> { %485 = vmatpush.bf16.msra.mxu0 %v1196_v8  ;;  %v257_v30 = vor.u32 %v256_v22, %v252_v18  ;;  %v436_v43 = vrot.slane %v434_v37, 1  ;;  %v1123_v48 = vld [vmem:[%s1322_s15 + $0x50] sm:$0xf]  ;;  %v1201_v49 = vld [vmem:[%s1322_s15 + $0x50] sm:$0x10]  ;;  %v1111_v52 = vor.u32 %v1199_v47, %v1110_v46 }
  0x1b   : >> { %v297_v31 = vor.u32 %v296_v23, %v292_v20  ;;  %v396_v41 = vrot.slane %v394_v36, 1  ;;  %v1124_v53 = vor.u32 %v1201_v49, %v1123_v48  ;;  %v1086_v54 = vld [vmem:[%s1322_s15 + $0x8] sm:$0xf]  ;;  %v1096_v55 = vld [vmem:[%s1322_s15 + $0x50] sm:$0xf] }
  0x1c   : >> { %1025 = vmatmul.msk.bf16.vlgmr.msra.gmra.mxu2 %vm202_vm0, %v257_v30  ;;  %v437_v45 = vor.u32 %v436_v43, %v432_v42  ;;  %v535_v56 = vshll.u32 %v1111_v52, 16  ;;  %v533_v58 = vshrl.u32 %v1111_v52, 16  ;;  %v1156_v0 = vld [vmem:[%s1322_s15 + $0x98] sm:$0xf]  ;;  %v1207_v1 = vld [vmem:[%s1322_s15 + $0x98] sm:$0x10] }
  0x1d   : >> { %1038 = vmatmul.msk.bf16.vlgmr.msra.gmra.mxu3 %vm202_vm0, %v297_v31  ;;  %555 = vmatpush.bf16.msra.mxu2 %v1200_v25  ;;  %v397_v44 = vor.u32 %v396_v41, %v392_v40  ;;  %v575_v57 = vshll.u32 %v1124_v53, 16  ;;  %v573_v60 = vshrl.u32 %v1124_v53, 16  ;;  %v1169_v2 = vld [vmem:[%s1322_s15 + $0xe0] sm:$0xf]  ;;  %v1209_v3 = vld [vmem:[%s1322_s15 + $0xe0] sm:$0x10]  ;;  %v1157_v4 = vor.u32 %v1207_v1, %v1156_v0 }
  0x1e   : >> { %595 = vmatpush.bf16.msra.mxu3 %v1202_v26  ;;  %v537_v59 = vrot.slane %v535_v56, 1  ;;  %v1170_v5 = vor.u32 %v1209_v3, %v1169_v2  ;;  %v1132_v6 = vld [vmem:[%s1322_s15 + $0x98] sm:$0xf]  ;;  %v1142_v7 = vld [vmem:[%s1322_s15 + $0xe0] sm:$0xf]  ;;  %v1250_v1 = vmov (%p179_p5), 8.0  }
  0x1f   : >> { %v577_v61 = vrot.slane %v575_v57, 1  ;;  %v675_v8 = vshll.u32 %v1157_v4, 16  ;;  %v673_v10 = vshrl.u32 %v1157_v4, 16  ;;  %1230 = vrcp.f32 (%p179_p5), %v1250_v1  ;;  %v1229_v4 = vld [vmem:[%s1436_s2] ss:$0 sm:$0xff] (%p179_p5) }
  0x20   : >> { %v538_v62 = vor.u32 %v537_v59, %v533_v58  ;;  %v715_v9 = vshll.u32 %v1170_v5, 16  ;;  %v713_v12 = vshrl.u32 %v1170_v5, 16 }
  0x21   : >> { %v578_v63 = vor.u32 %v577_v61, %v573_v60  ;;  %v677_v11 = vrot.slane %v675_v8, 1 }
  0x22   : >> { %v717_v13 = vrot.slane %v715_v9, 1 }
  0x23   : >> { %1058 = vmatmul.msk.bf16.vlgmr.msrb.gmra.mxu1 %vm202_vm0, %v1051_v35  ;;  %v678_v14 = vor.u32 %v677_v11, %v673_v10 }
  0x24   : >> { %1048 = vmatmul.msk.bf16.vlgmr.msrb.gmra.mxu0 %vm202_vm0, %v1041_v34  ;;  %655 = vmatpush.bf16.msrb.mxu1 %v1206_v39  ;;  %v718_v15 = vor.u32 %v717_v13, %v713_v12 }
  0x25   : >> { %625 = vmatpush.bf16.msrb.mxu0 %v1204_v38  ;;  %v1231_v11 = vpop.eup (%p179_p5), %1230 }
  0x26   : > { %vm787_vm2 = vweird.f32 (%p179_p5), %v1231_v11 }
  0x2c   : >> { %1071 = vmatmul.msk.bf16.vlgmr.msrb.gmra.mxu2 %vm202_vm0, %v397_v44 }
  0x2d   : >> { %1084 = vmatmul.msk.bf16.vlgmr.msrb.gmra.mxu3 %vm202_vm0, %v437_v45  ;;  %695 = vmatpush.bf16.msrb.mxu2 %v1208_v50 }
  0x2e   : >> { %735 = vmatpush.bf16.msrb.mxu3 %v1210_v51 }
  0x33   : >> { %1103 = vmatmul.msk.bf16.vlgmr.msra.gmra.mxu1 %vm202_vm0, %v1096_v55 }
  0x34   : >> { %1093 = vmatmul.msk.bf16.vlgmr.msra.gmra.mxu0 %vm202_vm0, %v1086_v54 }
  0x3c   : >> { %1116 = vmatmul.msk.bf16.vlgmr.msra.gmra.mxu2 %vm202_vm0, %v538_v62 }
  0x3d   : >> { %1129 = vmatmul.msk.bf16.vlgmr.msra.gmra.mxu3 %vm202_vm0, %v578_v63 }
  0x43   : >> { %1149 = vmatmul.msk.bf16.vlgmr.msrb.gmra.mxu1 %vm202_vm0, %v1142_v7 }
  0x44   : >> { %1139 = vmatmul.msk.bf16.vlgmr.msrb.gmra.mxu0 %vm202_vm0, %v1132_v6 }
  0x4c   : >> { %1162 = vmatmul.msk.bf16.vlgmr.msrb.gmra.mxu2 %vm202_vm0, %v678_v14 }
  0x4d   : >> { %1175 = vmatmul.msk.bf16.vlgmr.msrb.gmra.mxu3 %vm202_vm0, %v718_v15 }
  0x90   : >> { %v237_v17 = vpop.f32.mrf.mxu1 }
  0x91   : >> { %v215_v16 = vpop.f32.mrf.mxu0 }
  0x92   : >> { %v238_v24 = vadd.f32 %v237_v17, %v215_v16 }
  0x98   : >> { %v239_v19 = vpop.f32.mrf.mxu1 }
  0x99   : >> { %v217_v18 = vpop.f32.mrf.mxu0 }
  0x9f   : >> { %v276_v20 = vpop.f32.mrf.mxu2 }
  0xa0   : >> { %v316_v21 = vpop.f32.mrf.mxu3  ;;  %v376_v23 = vpop.f32.mrf.mxu1  ;;  %v280_v25 = vadd.f32 %v276_v20, %v238_v24  ;;  %v783_v20 = vmul.f32 (%p179_p5), 8.0, %v1231_v11 }
  0xa1   : >> { %v346_v22 = vpop.f32.mrf.mxu0 }
  0xa2   : >> { %v320_v30 = vadd.f32 %v316_v21, %v280_v25  ;;  %v784_v25 = vsub.f32 (%p179_p5), 1.0, %v783_v20 }
  0xa4   : >> { %v350_v31 = vadd.f32 %v346_v22, %v320_v30 }
  0xa6   : >> { %v380_v36 = vadd.f32 %v376_v23, %v350_v31 }
  0xa7   : >> { %v278_v26 = vpop.f32.mrf.mxu2 }
  0xa8   : >> { %v318_v27 = vpop.f32.mrf.mxu3  ;;  %v378_v29 = vpop.f32.mrf.mxu1 }
  0xa9   : >> { %v348_v28 = vpop.f32.mrf.mxu0  ;;  %v785_v29 = vmul.f32 (%p179_p5), %v1231_v11, %v784_v25 }
  0xaf   : >> { %v416_v32 = vpop.f32.mrf.mxu2 }
  0xb0   : >> { %v456_v33 = vpop.f32.mrf.mxu3  ;;  %v517_v35 = vpop.f32.mrf.mxu1  ;;  %v420_v37 = vadd.f32 %v416_v32, %v380_v36  ;;  %v786_v32 = vadd.f32 (%p179_p5), %v1231_v11, %v785_v29 }
  0xb1   : >> { %v487_v34 = vpop.f32.mrf.mxu0 }
  0xb2   : >> { %v460_v40 = vadd.f32 %v456_v33, %v420_v37  ;;  %v788_v36 = vsel (%p179_p5), %vm787_vm2, %v1231_v11, %v786_v32 }
  0xb4   : >> { %v491_v43 = vadd.f32 %v487_v34, %v460_v40 }
  0xb6   : >> { %v521_v46 = vadd.f32 %v517_v35, %v491_v43 }
  0xb7   : >> { %v418_v38 = vpop.f32.mrf.mxu2 }
  0xb8   : >> { %v458_v39 = vpop.f32.mrf.mxu3  ;;  %v519_v42 = vpop.f32.mrf.mxu1 }
  0xb9   : >> { %v489_v41 = vpop.f32.mrf.mxu0 }
  0xbf   : >> { %v557_v44 = vpop.f32.mrf.mxu2 }
  0xc0   : >> { %v597_v45 = vpop.f32.mrf.mxu3  ;;  %v657_v48 = vpop.f32.mrf.mxu1  ;;  %v561_v49 = vadd.f32 %v557_v44, %v521_v46 }
  0xc1   : >> { %v627_v47 = vpop.f32.mrf.mxu0 }
  0xc2   : >> { %v601_v50 = vadd.f32 %v597_v45, %v561_v49 }
  0xc4   : >> { %v631_v55 = vadd.f32 %v627_v47, %v601_v50 }
  0xc6   : >> { %v661_v56 = vadd.f32 %v657_v48, %v631_v55 }
  0xc7   : >> { %v559_v51 = vpop.f32.mrf.mxu2 }
  0xc8   : >> { %v599_v52 = vpop.f32.mrf.mxu3  ;;  %v659_v54 = vpop.f32.mrf.mxu1 }
  0xc9   : >> { %v629_v53 = vpop.f32.mrf.mxu0 }
  0xcf   : >> { %v697_v57 = vpop.f32.mrf.mxu2 }
  0xd0   : >> { %v737_v58 = vpop.f32.mrf.mxu3  ;;  %v701_v59 = vadd.f32 %v697_v57, %v661_v56 }
  0xd2   : >> { %v741_v60 = vadd.f32 %v737_v58, %v701_v59 }
  0xd4   : >> { %745 = vst.msk [vmem:[%s743_s8] sm:$0xff] %vm744_vm1, %v741_v60  ;;  %181 = sbr.rel (!%p179_p5) target bundleno = 15 (0xf), region = 93 }
  0xd7   : >> { %v699_v61 = vpop.f32.mrf.mxu2 }
  0xd8   : >> { %v739_v62 = vpop.f32.mrf.mxu3 }
  0xdb   : > { %v746_v63 = vld [vmem:[#allocation2] sm:$0xff]  ;;  %v747_v0 = vld [vmem:[#allocation2 + $0x8] sm:$0xff]  ;;  %v748_v2 = vld [vmem:[#allocation2 + $0x10] sm:$0xff] }
  0xdc   : > { %v749_v3 = vld [vmem:[#allocation2 + $0x18] sm:$0xff]  ;;  %v750_v5 = vld [vmem:[#allocation2 + $0x20] sm:$0xff]  ;;  %v758_v6 = vadd.f32 %v1229_v4, %v746_v63  ;;  %v759_v7 = vadd.f32 %v1229_v4, %v747_v0  ;;  %v760_v8 = vadd.f32 %v1229_v4, %v748_v2  ;;  %v751_v10 = vld [vmem:[#allocation2 + $0x28] sm:$0xff] }
  0xdd   : > { %v761_v9 = vadd.f32 %v1229_v4, %v749_v3  ;;  %v762_v12 = vadd.f32 %v1229_v4, %v750_v5  ;;  %v752_v16 = vld [vmem:[#allocation2 + $0x30] sm:$0xff]  ;;  %v763_v18 = vadd.f32 %v1229_v4, %v751_v10  ;;  %v753_v21 = vld [vmem:[#allocation2 + $0x38] sm:$0xff] }
  0xde   : > { %v767_v13 = vsel %vm744_vm1, %v758_v6, 0.0  ;;  %v768_v14 = vsel %vm744_vm1, %v759_v7, 0.0  ;;  %v770_v15 = vsel %vm744_vm1, %v760_v8, 0.0  ;;  %v764_v23 = vadd.f32 %v1229_v4, %v752_v16 }
  0xdf   : > { %v769_v17 = vadd.f32 %v768_v14, %v767_v13  ;;  %v772_v19 = vsel %vm744_vm1, %v761_v9, 0.0  ;;  %v774_v24 = vsel %vm744_vm1, %v762_v12, 0.0  ;;  %v765_v27 = vadd.f32 %v1229_v4, %v753_v21 }
  0xe0   : > { %v776_v28 = vsel %vm744_vm1, %v763_v18, 0.0  ;;  %v778_v31 = vsel %vm744_vm1, %v764_v23, 0.0 }
  0xe1   : > { %v771_v22 = vadd.f32 %v770_v15, %v769_v17  ;;  %v780_v34 = vsel %vm744_vm1, %v765_v27, 0.0 }
  0xe3   : > { %v773_v26 = vadd.f32 %v772_v19, %v771_v22 }
  0xe5   : > { %v775_v30 = vadd.f32 %v774_v24, %v773_v26 }
  0xe7   : > { %v777_v33 = vadd.f32 %v776_v28, %v775_v30 }
  0xe9   : > { %v779_v35 = vadd.f32 %v778_v31, %v777_v33 }
  0xeb   : > { %v781_v37 = vadd.f32 %v780_v34, %v779_v35 }
  0xed   : > { %v789_v38 = vmul.f32 %v788_v36, %v781_v37 }
  0xef   : > { %v790_v39 = vsel %vm744_vm1, %v789_v38, 0.0 }
  0xf0   : > { %v791_v40 = vrot.slane %v790_v39, 4 }
  0xf2   : > { %v792_v41 = vadd.f32 %v791_v40, %v790_v39 }
  0xf4   : > { %v793_v42 = vrot.slane %v792_v41, 2 }
  0xf6   : > { %v794_v43 = vadd.f32 %v793_v42, %v792_v41 }
  0xf8   : > { %v795_v44 = vrot.slane %v794_v43, 1 }
  0xfa   : > { %v796_v45 = vadd.f32 %v795_v44, %v794_v43 }
  0xfc   : > { %v797_v46 = vmul.f32 %v796_v45, %v788_v36 }
  0xfe   : > { %v798_v47 = vsub.f32 %v758_v6, %v797_v46  ;;  %v799_v48 = vsub.f32 %v759_v7, %v797_v46  ;;  %v800_v49 = vsub.f32 %v760_v8, %v797_v46  ;;  %v801_v50 = vsub.f32 %v761_v9, %v797_v46 }
  0xff   : > { %v802_v51 = vsub.f32 %v762_v12, %v797_v46  ;;  %v803_v52 = vsub.f32 %v763_v18, %v797_v46  ;;  %v804_v57 = vsub.f32 %v764_v23, %v797_v46  ;;  %v805_v63 = vsub.f32 %v765_v27, %v797_v46 }
 0x100   : > { %v806_v53 = vmul.f32 %v798_v47, %v798_v47  ;;  %v807_v54 = vmul.f32 %v799_v48, %v799_v48  ;;  %v808_v55 = vmul.f32 %v800_v49, %v800_v49  ;;  %v809_v56 = vmul.f32 %v801_v50, %v801_v50 }
 0x101   : > { %v810_v58 = vmul.f32 %v802_v51, %v802_v51  ;;  %v811_v0 = vmul.f32 %v803_v52, %v803_v52  ;;  %v812_v3 = vmul.f32 %v804_v57, %v804_v57  ;;  %v813_v6 = vmul.f32 %v805_v63, %v805_v63 }
 0x102   : > { %v814_v59 = vsel %vm744_vm1, %v806_v53, 0.0  ;;  %v815_v60 = vsel %vm744_vm1, %v807_v54, 0.0  ;;  %v817_v61 = vsel %vm744_vm1, %v808_v55, 0.0  ;;  %v819_v1 = vsel %vm744_vm1, %v809_v56, 0.0 }
 0x103   : > { %v816_v62 = vadd.f32 %v815_v60, %v814_v59  ;;  %v821_v4 = vsel %vm744_vm1, %v810_v58, 0.0  ;;  %v823_v7 = vsel %vm744_vm1, %v811_v0, 0.0  ;;  %v825_v9 = vsel %vm744_vm1, %v812_v3, 0.0 }
 0x104   : > { %v827_v11 = vsel %vm744_vm1, %v813_v6, 0.0 }
 0x105   : > { %v818_v2 = vadd.f32 %v817_v61, %v816_v62 }
 0x107   : > { %v820_v5 = vadd.f32 %v819_v1, %v818_v2 }
 0x109   : > { %v822_v8 = vadd.f32 %v821_v4, %v820_v5 }
 0x10b   : > { %v824_v10 = vadd.f32 %v823_v7, %v822_v8 }
 0x10d   : > { %v826_v12 = vadd.f32 %v825_v9, %v824_v10 }
 0x10f   : > { %v828_v13 = vadd.f32 %v827_v11, %v826_v12 }
 0x111   : > { %v829_v14 = vmul.f32 %v828_v13, %v788_v36 }
 0x113   : > { %v830_v15 = vsel %vm744_vm1, %v829_v14, 0.0 }
 0x114   : > { %v831_v16 = vrot.slane %v830_v15, 4 }
 0x116   : > { %v832_v17 = vadd.f32 %v831_v16, %v830_v15 }
 0x118   : > { %v833_v18 = vrot.slane %v832_v17, 2 }
 0x11a   : > { %v834_v19 = vadd.f32 %v833_v18, %v832_v17 }
 0x11c   : > { %v835_v20 = vrot.slane %v834_v19, 1 }
 0x11e   : > { %v836_v21 = vadd.f32 %v835_v20, %v834_v19 }
 0x120   : > { %v837_v22 = vmul.f32 %v836_v21, %v788_v36 }
 0x122   : > { %v838_v23 = vadd.f32 1e-05, %v837_v22 }
 0x124   : > { %1232 = vrsqrt.f32 %v838_v23  ;;  %vm845_vm3 = vweird.f32 %v838_v23 }
 0x12a   : > { %v1233_v24 = vpop.eup %1232 }
 0x12b   : > { %v840_v25 = vmul.f32 %v1233_v24, %v838_v23  ;;  %vm846_vm4 = vweird.f32 %v1233_v24 }
 0x12c   : > { %vm847_vm5 = vmor %vm845_vm3, %vm846_vm4 }
 0x12d   : > { %v841_v26 = vmul.f32 %v1233_v24, %v840_v25 }
 0x12f   : > { %v842_v27 = vmul.f32 0.5, %v841_v26 }
 0x131   : > { %v843_v28 = vsub.f32 1.5, %v842_v27 }
 0x133   : > { %v844_v29 = vmul.f32 %v1233_v24, %v843_v28 }
 0x135   : > { %v848_v30 = vsel %vm847_vm5, %v1233_v24, %v844_v29 }
 0x136   : > { %v849_v31 = vmul.f32 %v848_v30, %v798_v47  ;;  %v850_v32 = vmul.f32 %v848_v30, %v799_v48  ;;  %v851_v33 = vmul.f32 %v848_v30, %v800_v49  ;;  %v852_v34 = vmul.f32 %v848_v30, %v801_v50 }
 0x137   : > { %v853_v35 = vmul.f32 %v848_v30, %v802_v51  ;;  %v854_v37 = vmul.f32 %v848_v30, %v803_v52  ;;  %v855_v36 = vmul.f32 %v848_v30, %v804_v57  ;;  %v856_v38 = vmul.f32 %v848_v30, %v805_v63 }
 0x138   : > { %vm857_vm7 = vcmp.ge.f32.partialorder %v849_v31, 0.0  ;;  %v865_v39 = vmul.f32 0.2, %v849_v31  ;;  %vm858_vm8 = vcmp.ge.f32.partialorder %v850_v32, 0.0  ;;  %v866_v40 = vmul.f32 0.2, %v850_v32 }
 0x139   : > { %vm859_vm9 = vcmp.ge.f32.partialorder %v851_v33, 0.0  ;;  %v867_v41 = vmul.f32 0.2, %v851_v33  ;;  %vm860_vm10 = vcmp.ge.f32.partialorder %v852_v34, 0.0  ;;  %v868_v42 = vmul.f32 0.2, %v852_v34 }
 0x13a   : > { %v873_v43 = vsel %vm857_vm7, %v849_v31, %v865_v39  ;;  %v874_v44 = vsel %vm858_vm8, %v850_v32, %v866_v40  ;;  %vm861_vm11 = vcmp.ge.f32.partialorder %v853_v35, 0.0  ;;  %v869_v45 = vmul.f32 0.2, %v853_v35 }
 0x13b   : > { %v881_v46 = vpack.c.bf16 %v873_v43, %v873_v43  ;;  %v882_v47 = vpack.c.bf16 %v874_v44, %v874_v44  ;;  %v875_v48 = vsel %vm859_vm9, %v851_v33, %v867_v41  ;;  %v876_v49 = vsel %vm860_vm10, %v852_v34, %v868_v42 }
 0x13c   : > { %v883_v50 = vpack.c.bf16 %v875_v48, %v875_v48  ;;  %v884_v51 = vpack.c.bf16 %v876_v49, %v876_v49  ;;  %v877_v52 = vsel %vm861_vm11, %v853_v35, %v869_v45  ;;  %vm862_vm12 = vcmp.ge.f32.partialorder %v854_v37, 0.0 }
 0x13d   : > { %890 = vst.msk [vmem:[%s1282_s19] sm:$0xf] %vm889_vm6, %v881_v46  ;;  %v885_v53 = vpack.c.bf16 %v877_v52, %v877_v52  ;;  %v870_v54 = vmul.f32 0.2, %v854_v37  ;;  %vm863_vm13 = vcmp.ge.f32.partialorder %v855_v36, 0.0  ;;  %vm864_vm14 = vcmp.ge.f32.partialorder %v856_v38, 0.0 }
 0x13e   : > { %891 = vst.msk [vmem:[%s1282_s19 + $0x4] sm:$0xf] %vm889_vm6, %v882_v47  ;;  %v871_v55 = vmul.f32 0.2, %v855_v36  ;;  %v872_v56 = vmul.f32 0.2, %v856_v38 }
 0x13f   : > { %892 = vst.msk [vmem:[%s1282_s19 + $0x8] sm:$0xf] %vm889_vm6, %v883_v50  ;;  %v878_v57 = vsel %vm862_vm12, %v854_v37, %v870_v54 }
 0x140   : > { %893 = vst.msk [vmem:[%s1282_s19 + $0xc] sm:$0xf] %vm889_vm6, %v884_v51  ;;  %v886_v58 = vpack.c.bf16 %v878_v57, %v878_v57  ;;  %v879_v59 = vsel %vm863_vm13, %v855_v36, %v871_v55  ;;  %v880_v60 = vsel %vm864_vm14, %v856_v38, %v872_v56 }
 0x141   : > { %894 = vst.msk [vmem:[%s1282_s19 + $0x10] sm:$0xf] %vm889_vm6, %v885_v53  ;;  %v887_v61 = vpack.c.bf16 %v879_v59, %v879_v59  ;;  %v888_v62 = vpack.c.bf16 %v880_v60, %v880_v60 }
 0x142   : > { %895 = vst.msk [vmem:[%s1282_s19 + $0x14] sm:$0xf] %vm889_vm6, %v886_v58 }
 0x143   : > { %896 = vst.msk [vmem:[%s1282_s19 + $0x18] sm:$0xf] %vm889_vm6, %v887_v61 }
 0x144   : > { %897 = vst.msk [vmem:[%s1282_s19 + $0x1c] sm:$0xf] %vm889_vm6, %v888_v62 }
 0x145 PF: > { %s13_s12 = sadd.s32 1, %s1244_s12  }
 0x146   : > { %p10_p6 = scmp.ge.s32.totalorder %s13_s12, 4  }
 0x148   :  { %12 = sbr.rel (!%p10_p6) target bundleno = 1 (0x1), region = 104 }

// kernel: _lambda_.7
= control target key start
LH: loop header
LB: loop body
LE: loop exit
PB: predicated region body
PF: predicated region fallthrough
CT: control target
= control target key end

     0   :  { %s1360_s12 = smov 0   ;;  %s1543_s0 = inlined_call_operand.vmem [shape: bf16[8,5,5,32], index: 0, kind: input, shape index: {}]   ;;  %s1544_s1 = inlined_call_operand.vmem [shape: bf16[16,32,64], index: 1, kind: input, shape index: {}]   ;;  %s1545_s2 = inlined_call_operand.vmem [shape: f32[1,64], index: 2, kind: input, shape index: {}]   ;;  %s1546_s3 = inlined_call_operand.vmem [shape: bf16[2,4,4,64], index: 3, kind: output, shape index: {}]  }
   0x1 LB: > { %s1029_s13 = sadd.s32 4294967295, %s1333_s12   ;;  %p1033_p0 = scmp.ge.s32.totalorder %s1333_s12, 1  ;;  %s1333_s12 = sphi %s1360_s12, %s13_s12  }
   0x2   : > { %p139_p1 = scmp.lt.s32.totalorder %s1333_s12, 3 }
   0x4   : > { %p140_p2 = pnand %p1033_p0, %p139_p1 }
   0x5   : > { %s1034_s14 = sshll.u32 (!%p140_p2), %s1029_s13, 2  ;;  %p171_p3 = scmp.lt.s32.totalorder (!%p140_p2), %s1029_s13, 1 }
   0x6   : > { %143 = sbr.rel (%p140_p2) target bundleno = 307 (0x133), region = 32  ;;  %p165_p4 = scmp.lt.s32.totalorder (!%p140_p2), %s1034_s14, 7 }
   0x7   : > { %s1378_s23 = smov (!%p140_p2), 0  }
   0xb   : > { %s1548_s13 = smov (!%p171_p3, %s1029_s13), 1  ;;  %s1550_s14 = smov (!%p165_p4, %s1034_s14), 7 }
   0xc   : > { %s1267_s15 = sshll.u32 %s1548_s13, 3  ;;  %s1300_s16 = smul.u32 20, %s1550_s14 }
   0xd   : > { %s1371_s19 = scalar_lea.vmem %s1546_s3, %s1267_s15 }
   0xe   : > { %s1376_s22 = scalar_lea.vmem %s1543_s0, %s1300_s16 }
   0xf LB: >> { %v1271_v0 = vld [vmem:[%s1544_s1 + $0x18] sm:$0xff]  ;;  %v1269_v1 = vld [vmem:[%s1544_s1 + $0x8] sm:$0xff]  ;;  %v1270_v4 = vld [vmem:[%s1544_s1 + $0x10] sm:$0xff]  ;;  %s1038_s9 = sshll.u32 %s1337_s23, 2  ;;  %vm211_vm0 = vcmask 261120   ;;  %vm846_vm1 = vcmask 519168   ;;  %s1337_s23 = sphi %s1378_s23, %s182_s23  }
  0x10   : >> { %v1273_v2 = vld [vmem:[%s1544_s1 + $0x28] sm:$0xff]  ;;  %v1275_v3 = vld [vmem:[%s1544_s1 + $0x38] sm:$0xff]  ;;  %221 = vmatpush.bf16.msra.mxu0 %v1271_v0  ;;  %249 = vmatpush.bf16.msra.mxu1 %v1269_v1  ;;  %v1268_v5 = vld [vmem:[%s1544_s1] sm:$0xff]  ;;  %s1405_s10 = scalar_lea.vmem %s1376_s22, %s1038_s9  ;;  %s182_s23 = sadd.s32 1, %s1337_s23  }
  0x11   : >> { %293 = vmatpush.bf16.msra.mxu2 %v1273_v2  ;;  %338 = vmatpush.bf16.msra.mxu3 %v1275_v3  ;;  %v1272_v6 = vld [vmem:[%s1544_s1 + $0x20] sm:$0xff]  ;;  %v1274_v7 = vld [vmem:[%s1544_s1 + $0x30] sm:$0xff]  ;;  %v1281_v9 = vld [vmem:[%s1544_s1 + $0x68] sm:$0xff]  ;;  %p179_p5 = scmp.ge.s32.totalorder %s182_s23, 4  }
  0x12   : >> { %v256_v8 = vld [vmem:[%s1405_s10] sm:$0x7]  ;;  %v1283_v10 = vld [vmem:[%s1544_s1 + $0x78] sm:$0xff]  ;;  %v1076_v12 = vld [vmem:[%s1405_s10 + $0x14] sm:$0x7]  ;;  %vm939_vm10 = vcmask (%p179_p5), 517120  }
  0x13   : >> { %v263_v11 = vunpack.c.l.b16 %v256_v8  ;;  %v1277_v13 = vld [vmem:[%s1544_s1 + $0x48] sm:$0xff]  ;;  %v1040_v14 = vld [vmem:[%s1405_s10 + $0x14] sm:$0x3]  ;;  %v185_v15 = vld [vmem:[%s1405_s10] sm:$0x3]  ;;  %v308_v16 = vunpack.c.l.b16 %v1076_v12 }
  0x14   : >> { %222 = vmatpush.bf16.msra.mxu0 %v1270_v4  ;;  %250 = vmatpush.bf16.msra.mxu1 %v1268_v5  ;;  %v1279_v17 = vld [vmem:[%s1544_s1 + $0x58] sm:$0xff]  ;;  %v1280_v20 = vld [vmem:[%s1544_s1 + $0x60] sm:$0xff]  ;;  %v1282_v21 = vld [vmem:[%s1544_s1 + $0x70] sm:$0xff] }
  0x15   : >> { %294 = vmatpush.bf16.msra.mxu2 %v1272_v6  ;;  %339 = vmatpush.bf16.msra.mxu3 %v1274_v7  ;;  %v264_v18 = vpack.c.b16 %v263_v11, %v263_v11  ;;  %v309_v19 = vpack.c.b16 %v308_v16, %v308_v16  ;;  %v1120_v22 = vld [vmem:[%s1405_s10 + $0x28] sm:$0x7]  ;;  %v1134_v25 = vld [vmem:[%s1405_s10 + $0x3c] sm:$0x7]  ;;  %v1276_v28 = vld [vmem:[%s1544_s1 + $0x40] sm:$0xff] }
  0x16   : >> { %v1278_v29 = vld [vmem:[%s1544_s1 + $0x50] sm:$0xff]  ;;  %v429_v31 = vunpack.c.l.b16 %v1120_v22  ;;  %v1285_v32 = vld [vmem:[%s1544_s1 + $0x88] sm:$0xff]  ;;  %v474_v34 = vunpack.c.l.b16 %v1134_v25  ;;  %v1291_v37 = vld [vmem:[%s1544_s1 + $0xb8] sm:$0xff] }
  0x17   : >> { %1053 = vmatmul.msk.bf16.vlgmr.msra.gmra.mxu0 %vm211_vm0, %v1040_v14  ;;  %1062 = vmatmul.msk.bf16.vlgmr.msra.gmra.mxu1 %vm211_vm0, %v185_v15  ;;  %v266_v23 = vshrl.u32 %v264_v18, 16  ;;  %v268_v24 = vshll.u32 %v264_v18, 16  ;;  %v311_v26 = vshrl.u32 %v309_v19, 16  ;;  %v313_v27 = vshll.u32 %v309_v19, 16  ;;  %v1289_v35 = vld [vmem:[%s1544_s1 + $0xa8] sm:$0xff]  ;;  %v1287_v38 = vld [vmem:[%s1544_s1 + $0x98] sm:$0xff] }
  0x18   : >> { %376 = vmatpush.bf16.msrb.mxu0 %v1277_v13  ;;  %414 = vmatpush.bf16.msrb.mxu1 %v1279_v17  ;;  %v430_v40 = vpack.c.b16 %v429_v31, %v429_v31  ;;  %v1284_v41 = vld [vmem:[%s1544_s1 + $0x80] sm:$0xff]  ;;  %v475_v42 = vpack.c.b16 %v474_v34, %v474_v34  ;;  %v1290_v44 = vld [vmem:[%s1544_s1 + $0xb0] sm:$0xff]  ;;  %v1091_v48 = vld [vmem:[%s1405_s10 + $0x28] sm:$0x3] }
  0x19   : >> { %459 = vmatpush.bf16.msrb.mxu2 %v1281_v9  ;;  %504 = vmatpush.bf16.msrb.mxu3 %v1283_v10  ;;  %v270_v30 = vrot.slane %v268_v24, 1  ;;  %v315_v33 = vrot.slane %v313_v27, 1  ;;  %v1288_v43 = vld [vmem:[%s1544_s1 + $0xa0] sm:$0xff]  ;;  %v1286_v45 = vld [vmem:[%s1544_s1 + $0x90] sm:$0xff]  ;;  %v1106_v49 = vld [vmem:[%s1405_s10 + $0x3c] sm:$0x3] }
  0x1a   : >> { %v434_v46 = vshll.u32 %v430_v40, 16  ;;  %v479_v47 = vshll.u32 %v475_v42, 16  ;;  %v1293_v50 = vld [vmem:[%s1544_s1 + $0xc8] sm:$0xff]  ;;  %v1295_v51 = vld [vmem:[%s1544_s1 + $0xd8] sm:$0xff]  ;;  %v432_v52 = vshrl.u32 %v430_v40, 16  ;;  %v477_v54 = vshrl.u32 %v475_v42, 16 }
  0x1b   : >> { %v271_v36 = vor.u32 %v270_v30, %v266_v23  ;;  %v316_v39 = vor.u32 %v315_v33, %v311_v26  ;;  %v1178_v56 = vld [vmem:[%s1405_s10 + $0x4] sm:$0x7]  ;;  %v1192_v57 = vld [vmem:[%s1405_s10 + $0x18] sm:$0x7]  ;;  %v1294_v59 = vld [vmem:[%s1544_s1 + $0xd0] sm:$0xff] }
  0x1c   : >> { %377 = vmatpush.bf16.msrb.mxu0 %v1276_v28  ;;  %415 = vmatpush.bf16.msrb.mxu1 %v1278_v29  ;;  %v436_v53 = vrot.slane %v434_v46, 1  ;;  %v481_v55 = vrot.slane %v479_v47, 1  ;;  %v1292_v58 = vld [vmem:[%s1544_s1 + $0xc0] sm:$0xff]  ;;  %v595_v61 = vunpack.c.l.b16 %v1178_v56  ;;  %v640_v63 = vunpack.c.l.b16 %v1192_v57  ;;  %v1297_v0 = vld [vmem:[%s1544_s1 + $0xe8] sm:$0xff]  ;;  %v1299_v1 = vld [vmem:[%s1544_s1 + $0xf8] sm:$0xff] }
  0x1d   : >> { %460 = vmatpush.bf16.msrb.mxu2 %v1280_v20  ;;  %505 = vmatpush.bf16.msrb.mxu3 %v1282_v21  ;;  %v1296_v4 = vld [vmem:[%s1544_s1 + $0xe0] sm:$0xff]  ;;  %v1298_v5 = vld [vmem:[%s1544_s1 + $0xf0] sm:$0xff]  ;;  %v1164_v9 = vld [vmem:[%s1405_s10 + $0x18] sm:$0x3] }
  0x1e   : >> { %1075 = vmatmul.msk.bf16.vlgmr.msra.gmra.mxu2 %vm211_vm0, %v271_v36  ;;  %1089 = vmatmul.msk.bf16.vlgmr.msra.gmra.mxu3 %vm211_vm0, %v316_v39  ;;  %v437_v60 = vor.u32 %v436_v53, %v432_v52  ;;  %v482_v62 = vor.u32 %v481_v55, %v477_v54  ;;  %v596_v2 = vpack.c.b16 %v595_v61, %v595_v61  ;;  %v1149_v8 = vld [vmem:[%s1405_s10 + $0x4] sm:$0x3]  ;;  %v1236_v14 = vld [vmem:[%s1405_s10 + $0x2c] sm:$0x7]  ;;  %v1250_v15 = vld [vmem:[%s1405_s10 + $0x40] sm:$0x7] }
  0x1f   : >> { %v641_v3 = vpack.c.b16 %v640_v63, %v640_v63  ;;  %v761_v17 = vunpack.c.l.b16 %v1236_v14  ;;  %v806_v19 = vunpack.c.l.b16 %v1250_v15  ;;  %v1207_v24 = vld [vmem:[%s1405_s10 + $0x2c] sm:$0x3]  ;;  %v1222_v25 = vld [vmem:[%s1405_s10 + $0x40] sm:$0x3]  ;;  %s845_s10 = scalar_lea.vmem [#allocation2], %s1038_s9 }
  0x20   : >> { %542 = vmatpush.bf16.msra.mxu0 %v1285_v32  ;;  %580 = vmatpush.bf16.msra.mxu1 %v1287_v38  ;;  %v600_v6 = vshll.u32 %v596_v2, 16  ;;  %v598_v10 = vshrl.u32 %v596_v2, 16 }
  0x21   : >> { %625 = vmatpush.bf16.msra.mxu2 %v1289_v35  ;;  %670 = vmatpush.bf16.msra.mxu3 %v1291_v37  ;;  %v645_v7 = vshll.u32 %v641_v3, 16  ;;  %v643_v12 = vshrl.u32 %v641_v3, 16  ;;  %v762_v20 = vpack.c.b16 %v761_v17, %v761_v17  ;;  %v807_v21 = vpack.c.b16 %v806_v19, %v806_v19  ;;  %v1318_v17 = vld [vmem:[%s1545_s2] ss:$0 sm:$0xff] (%p179_p5) }
  0x22   : >> { %v602_v11 = vrot.slane %v600_v6, 1 }
  0x23   : >> { %v647_v13 = vrot.slane %v645_v7, 1  ;;  %v766_v22 = vshll.u32 %v762_v20, 16  ;;  %v811_v23 = vshll.u32 %v807_v21, 16  ;;  %v764_v26 = vshrl.u32 %v762_v20, 16 }
  0x24   : >> { %543 = vmatpush.bf16.msra.mxu0 %v1284_v41  ;;  %581 = vmatpush.bf16.msra.mxu1 %v1286_v45  ;;  %v603_v16 = vor.u32 %v602_v11, %v598_v10  ;;  %v809_v28 = vshrl.u32 %v807_v21, 16  ;;  %v1339_v21 = vmov (%p179_p5), 4.0  }
  0x25   : >> { %626 = vmatpush.bf16.msra.mxu2 %v1288_v43  ;;  %671 = vmatpush.bf16.msra.mxu3 %v1290_v44  ;;  %v648_v18 = vor.u32 %v647_v13, %v643_v12  ;;  %v768_v27 = vrot.slane %v766_v22, 1  ;;  %v813_v29 = vrot.slane %v811_v23, 1  ;;  %1319 = vrcp.f32 (%p179_p5), %v1339_v21 }
  0x27   : >> { %1104 = vmatmul.msk.bf16.vlgmr.msrb.gmra.mxu0 %vm211_vm0, %v1091_v48  ;;  %1119 = vmatmul.msk.bf16.vlgmr.msrb.gmra.mxu1 %vm211_vm0, %v1106_v49  ;;  %v769_v30 = vor.u32 %v768_v27, %v764_v26  ;;  %v814_v31 = vor.u32 %v813_v29, %v809_v28 }
  0x28   : >> { %708 = vmatpush.bf16.msrb.mxu0 %v1293_v50  ;;  %746 = vmatpush.bf16.msrb.mxu1 %v1295_v51 }
  0x2b   : > { %v1320_v29 = vpop.eup (%p179_p5), %1319 }
  0x2c   : >> { %709 = vmatpush.bf16.msrb.mxu0 %v1292_v58  ;;  %747 = vmatpush.bf16.msrb.mxu1 %v1294_v59  ;;  %vm873_vm2 = vweird.f32 (%p179_p5), %v1320_v29 }
  0x2e   : >> { %1133 = vmatmul.msk.bf16.vlgmr.msrb.gmra.mxu2 %vm211_vm0, %v437_v60  ;;  %1147 = vmatmul.msk.bf16.vlgmr.msrb.gmra.mxu3 %vm211_vm0, %v482_v62 }
  0x2f   : >> { %791 = vmatpush.bf16.msrb.mxu2 %v1297_v0  ;;  %836 = vmatpush.bf16.msrb.mxu3 %v1299_v1 }
  0x33   : >> { %792 = vmatpush.bf16.msrb.mxu2 %v1296_v4  ;;  %837 = vmatpush.bf16.msrb.mxu3 %v1298_v5 }
  0x37   : >> { %1162 = vmatmul.msk.bf16.vlgmr.msra.gmra.mxu0 %vm211_vm0, %v1149_v8  ;;  %1177 = vmatmul.msk.bf16.vlgmr.msra.gmra.mxu1 %vm211_vm0, %v1164_v9 }
  0x3e   : >> { %1191 = vmatmul.msk.bf16.vlgmr.msra.gmra.mxu2 %vm211_vm0, %v603_v16  ;;  %1205 = vmatmul.msk.bf16.vlgmr.msra.gmra.mxu3 %vm211_vm0, %v648_v18 }
  0x47   : >> { %1220 = vmatmul.msk.bf16.vlgmr.msrb.gmra.mxu0 %vm211_vm0, %v1207_v24  ;;  %1235 = vmatmul.msk.bf16.vlgmr.msrb.gmra.mxu1 %vm211_vm0, %v1222_v25 }
  0x4e   : >> { %1249 = vmatmul.msk.bf16.vlgmr.msrb.gmra.mxu2 %vm211_vm0, %v769_v30  ;;  %1263 = vmatmul.msk.bf16.vlgmr.msrb.gmra.mxu3 %vm211_vm0, %v814_v31  ;;  %v869_v30 = vmul.f32 (%p179_p5), 4.0, %v1320_v29 }
  0x94   : >> { %v224_v32 = vpop.f32.mrf.mxu0  ;;  %v252_v33 = vpop.f32.mrf.mxu1 }
  0x95   : >> { %v253_v38 = vadd.f32 %v252_v33, %v224_v32  ;;  %v870_v33 = vsub.f32 (%p179_p5), 1.0, %v869_v30 }
  0x9c   : >> { %v226_v34 = vpop.f32.mrf.mxu0  ;;  %v254_v35 = vpop.f32.mrf.mxu1 }
  0x9d   : > { %v871_v34 = vmul.f32 (%p179_p5), %v1320_v29, %v870_v33 }
  0xa1   : >> { %v296_v36 = vpop.f32.mrf.mxu2  ;;  %v341_v37 = vpop.f32.mrf.mxu3 }
  0xa2   : >> { %v300_v41 = vadd.f32 %v296_v36, %v253_v38  ;;  %v872_v36 = vadd.f32 (%p179_p5), %v1320_v29, %v871_v34 }
  0xa4   : >> { %v379_v39 = vpop.f32.mrf.mxu0  ;;  %v417_v40 = vpop.f32.mrf.mxu1  ;;  %v345_v44 = vadd.f32 %v341_v37, %v300_v41  ;;  %v874_v37 = vsel (%p179_p5), %vm873_vm2, %v1320_v29, %v872_v36 }
  0xa6   : >> { %v383_v47 = vadd.f32 %v379_v39, %v345_v44 }
  0xa8   : >> { %v421_v50 = vadd.f32 %v417_v40, %v383_v47 }
  0xa9   : >> { %v298_v42 = vpop.f32.mrf.mxu2  ;;  %v343_v43 = vpop.f32.mrf.mxu3 }
  0xac   : >> { %v381_v45 = vpop.f32.mrf.mxu0  ;;  %v419_v46 = vpop.f32.mrf.mxu1 }
  0xb1   : >> { %v462_v48 = vpop.f32.mrf.mxu2  ;;  %v507_v49 = vpop.f32.mrf.mxu3 }
  0xb2   : >> { %v466_v53 = vadd.f32 %v462_v48, %v421_v50 }
  0xb4   : >> { %v545_v51 = vpop.f32.mrf.mxu0  ;;  %v583_v52 = vpop.f32.mrf.mxu1  ;;  %v511_v55 = vadd.f32 %v507_v49, %v466_v53 }
  0xb6   : >> { %v549_v59 = vadd.f32 %v545_v51, %v511_v55 }
  0xb8   : >> { %v587_v61 = vadd.f32 %v583_v52, %v549_v59 }
  0xb9   : >> { %v464_v54 = vpop.f32.mrf.mxu2  ;;  %v509_v56 = vpop.f32.mrf.mxu3 }
  0xbc   : >> { %v547_v57 = vpop.f32.mrf.mxu0  ;;  %v585_v58 = vpop.f32.mrf.mxu1 }
  0xc1   : >> { %v628_v60 = vpop.f32.mrf.mxu2  ;;  %v673_v62 = vpop.f32.mrf.mxu3 }
  0xc2   : >> { %v632_v63 = vadd.f32 %v628_v60, %v587_v61 }
  0xc4   : >> { %v711_v0 = vpop.f32.mrf.mxu0  ;;  %v749_v1 = vpop.f32.mrf.mxu1  ;;  %v677_v2 = vadd.f32 %v673_v62, %v632_v63 }
  0xc6   : >> { %v715_v5 = vadd.f32 %v711_v0, %v677_v2 }
  0xc8   : >> { %v753_v8 = vadd.f32 %v749_v1, %v715_v5 }
  0xc9   : >> { %v630_v3 = vpop.f32.mrf.mxu2  ;;  %v675_v4 = vpop.f32.mrf.mxu3 }
  0xcc   : >> { %v713_v6 = vpop.f32.mrf.mxu0  ;;  %v751_v7 = vpop.f32.mrf.mxu1 }
  0xd1   : >> { %v794_v9 = vpop.f32.mrf.mxu2  ;;  %v839_v11 = vpop.f32.mrf.mxu3 }
  0xd2   : >> { %v798_v10 = vadd.f32 %v794_v9, %v753_v8 }
  0xd4   : >> { %v843_v12 = vadd.f32 %v839_v11, %v798_v10 }
  0xd5   : > { %181 = sbr.rel (!%p179_p5) target bundleno = 15 (0xf), region = 93 }
  0xd6   : >> { %847 = vst.msk [vmem:[%s845_s10] sm:$0xf] %vm846_vm1, %v843_v12 }
  0xd9   : >> { %v796_v13 = vpop.f32.mrf.mxu2  ;;  %v841_v14 = vpop.f32.mrf.mxu3 }
  0xdd   : > { %v848_v15 = vld [vmem:[#allocation2] sm:$0xf]  ;;  %v849_v16 = vld [vmem:[#allocation2 + $0x4] sm:$0xf]  ;;  %v850_v18 = vld [vmem:[#allocation2 + $0x8] sm:$0xf] }
  0xde   : > { %v856_v19 = vadd.f32 %v1318_v17, %v848_v15  ;;  %v857_v20 = vadd.f32 %v1318_v17, %v849_v16  ;;  %v858_v22 = vadd.f32 %v1318_v17, %v850_v18  ;;  %v851_v25 = vld [vmem:[#allocation2 + $0xc] sm:$0xf] }
  0xdf   : > { %v859_v27 = vadd.f32 %v1318_v17, %v851_v25 }
  0xe0   : > { %v861_v23 = vsel %vm846_vm1, %v856_v19, 0.0  ;;  %v862_v24 = vsel %vm846_vm1, %v857_v20, 0.0  ;;  %v864_v28 = vsel %vm846_vm1, %v858_v22, 0.0 }
  0xe1   : > { %v863_v26 = vadd.f32 %v862_v24, %v861_v23  ;;  %v866_v32 = vsel %vm846_vm1, %v859_v27, 0.0 }
  0xe3   : > { %v865_v31 = vadd.f32 %v864_v28, %v863_v26 }
  0xe5   : > { %v867_v35 = vadd.f32 %v866_v32, %v865_v31 }
  0xe7   : > { %v875_v38 = vmul.f32 %v874_v37, %v867_v35 }
  0xe9   : > { %v876_v39 = vsel %vm846_vm1, %v875_v38, 0.0 }
  0xea   : > { %v877_v40 = vrot.slane %v876_v39, 4 }
  0xec   : > { %v878_v41 = vadd.f32 %v877_v40, %v876_v39 }
  0xee   : > { %v879_v42 = vrot.slane %v878_v41, 2 }
  0xf0   : > { %v880_v43 = vadd.f32 %v879_v42, %v878_v41 }
  0xf2   : > { %v881_v44 = vrot.slane %v880_v43, 1 }
  0xf4   : > { %v882_v45 = vadd.f32 %v881_v44, %v880_v43 }
  0xf6   : > { %v883_v46 = vmul.f32 %v882_v45, %v874_v37 }
  0xf8   : > { %v884_v47 = vsub.f32 %v856_v19, %v883_v46  ;;  %v885_v48 = vsub.f32 %v857_v20, %v883_v46  ;;  %v886_v49 = vsub.f32 %v858_v22, %v883_v46  ;;  %v887_v50 = vsub.f32 %v859_v27, %v883_v46 }
  0xfa   : > { %v888_v51 = vmul.f32 %v884_v47, %v884_v47  ;;  %v889_v52 = vmul.f32 %v885_v48, %v885_v48  ;;  %v890_v53 = vmul.f32 %v886_v49, %v886_v49  ;;  %v891_v54 = vmul.f32 %v887_v50, %v887_v50 }
  0xfc   : > { %v892_v55 = vsel %vm846_vm1, %v888_v51, 0.0  ;;  %v893_v56 = vsel %vm846_vm1, %v889_v52, 0.0  ;;  %v895_v57 = vsel %vm846_vm1, %v890_v53, 0.0  ;;  %v897_v59 = vsel %vm846_vm1, %v891_v54, 0.0 }
  0xfd   : > { %v894_v58 = vadd.f32 %v893_v56, %v892_v55 }
  0xff   : > { %v896_v60 = vadd.f32 %v895_v57, %v894_v58 }
 0x101   : > { %v898_v61 = vadd.f32 %v897_v59, %v896_v60 }
 0x103   : > { %v899_v62 = vmul.f32 %v898_v61, %v874_v37 }
 0x105   : > { %v900_v63 = vsel %vm846_vm1, %v899_v62, 0.0 }
 0x106   : > { %v901_v0 = vrot.slane %v900_v63, 4 }
 0x108   : > { %v902_v1 = vadd.f32 %v901_v0, %v900_v63 }
 0x10a   : > { %v903_v2 = vrot.slane %v902_v1, 2 }
 0x10c   : > { %v904_v3 = vadd.f32 %v903_v2, %v902_v1 }
 0x10e   : > { %v905_v4 = vrot.slane %v904_v3, 1 }
 0x110   : > { %v906_v5 = vadd.f32 %v905_v4, %v904_v3 }
 0x112   : > { %v907_v6 = vmul.f32 %v906_v5, %v874_v37 }
 0x114   : > { %v908_v7 = vadd.f32 1e-05, %v907_v6 }
 0x116   : > { %1321 = vrsqrt.f32 %v908_v7  ;;  %vm915_vm3 = vweird.f32 %v908_v7 }
 0x11c   : > { %v1322_v8 = vpop.eup %1321 }
 0x11d   : > { %v910_v9 = vmul.f32 %v1322_v8, %v908_v7  ;;  %vm916_vm4 = vweird.f32 %v1322_v8 }
 0x11e   : > { %vm917_vm5 = vmor %vm915_vm3, %vm916_vm4 }
 0x11f   : > { %v911_v10 = vmul.f32 %v1322_v8, %v910_v9 }
 0x121   : > { %v912_v11 = vmul.f32 0.5, %v911_v10 }
 0x123   : > { %v913_v12 = vsub.f32 1.5, %v912_v11 }
 0x125   : > { %v914_v13 = vmul.f32 %v1322_v8, %v913_v12 }
 0x127   : > { %v918_v14 = vsel %vm917_vm5, %v1322_v8, %v914_v13 }
 0x128   : > { %v919_v15 = vmul.f32 %v918_v14, %v884_v47  ;;  %v920_v16 = vmul.f32 %v918_v14, %v885_v48  ;;  %v921_v17 = vmul.f32 %v918_v14, %v886_v49  ;;  %v922_v18 = vmul.f32 %v918_v14, %v887_v50 }
 0x12a   : > { %vm923_vm6 = vcmp.ge.f32.partialorder %v919_v15, 0.0  ;;  %v927_v19 = vmul.f32 0.2, %v919_v15  ;;  %vm924_vm7 = vcmp.ge.f32.partialorder %v920_v16, 0.0  ;;  %v928_v20 = vmul.f32 0.2, %v920_v16 }
 0x12b   : > { %vm925_vm8 = vcmp.ge.f32.partialorder %v921_v17, 0.0  ;;  %v929_v21 = vmul.f32 0.2, %v921_v17  ;;  %vm926_vm9 = vcmp.ge.f32.partialorder %v922_v18, 0.0  ;;  %v930_v22 = vmul.f32 0.2, %v922_v18 }
 0x12c   : > { %v931_v23 = vsel %vm923_vm6, %v919_v15, %v927_v19  ;;  %v932_v24 = vsel %vm924_vm7, %v920_v16, %v928_v20 }
 0x12d   : > { %v935_v25 = vpack.c.bf16 %v931_v23, %v931_v23  ;;  %v936_v26 = vpack.c.bf16 %v932_v24, %v932_v24  ;;  %v933_v27 = vsel %vm925_vm8, %v921_v17, %v929_v21  ;;  %v934_v28 = vsel %vm926_vm9, %v922_v18, %v930_v22 }
 0x12e   : > { %v937_v29 = vpack.c.bf16 %v933_v27, %v933_v27  ;;  %v938_v30 = vpack.c.bf16 %v934_v28, %v934_v28 }
 0x12f   : > { %940 = vst.msk [vmem:[%s1371_s19] sm:$0x3] %vm939_vm10, %v935_v25 }
 0x130   : > { %941 = vst.msk [vmem:[%s1371_s19 + $0x2] sm:$0x3] %vm939_vm10, %v936_v26 }
 0x131   : > { %942 = vst.msk [vmem:[%s1371_s19 + $0x4] sm:$0x3] %vm939_vm10, %v937_v29 }
 0x132   : > { %943 = vst.msk [vmem:[%s1371_s19 + $0x6] sm:$0x3] %vm939_vm10, %v938_v30 }
 0x133 PF: > { %s13_s12 = sadd.s32 1, %s1333_s12  }
 0x134   : > { %p10_p6 = scmp.ge.s32.totalorder %s13_s12, 4  }
 0x136   :  { %12 = sbr.rel (!%p10_p6) target bundleno = 1 (0x1), region = 104 }

// kernel: _lambda_.8
= control target key start
LH: loop header
LB: loop body
LE: loop exit
PB: predicated region body
PF: predicated region fallthrough
CT: control target
= control target key end

     0   :  { %s1786_s12 = smov 0   ;;  %s2064_s0 = inlined_call_operand.vmem [shape: bf16[2,6,6,64], index: 0, kind: input, shape index: {}]   ;;  %s2065_s1 = inlined_call_operand.vmem [shape: bf16[16,64,128], index: 1, kind: input, shape index: {}]   ;;  %s2066_s2 = inlined_call_operand.vmem [shape: f32[1,128], index: 2, kind: input, shape index: {}]   ;;  %s2067_s3 = inlined_call_operand.vmem [shape: bf16[2,3,3,128], index: 3, kind: output, shape index: {}]  }
   0x1 LB: > { %s1249_s13 = sadd.s32 4294967295, %s1759_s12   ;;  %p1253_p0 = scmp.ge.s32.totalorder %s1759_s12, 1  ;;  %s1759_s12 = sphi %s1786_s12, %s13_s12  }
   0x2   : > { %p137_p1 = scmp.lt.s32.totalorder %s1759_s12, 3 }
   0x4   : > { %p138_p2 = pnand %p1253_p0, %p137_p1 }
   0x5   : > { %p161_p3 = scmp.lt.s32.totalorder (!%p138_p2), %s1249_s13, 1  ;;  %s1804_s22 = smov (!%p138_p2), 0  }
   0x6   : > { %141 = sbr.rel (%p138_p2) target bundleno = 307 (0x133), region = 32 }
   0xb   : > { %s2069_s13 = smov (!%p161_p3, %s1249_s13), 1 }
   0xc   : > { %s1725_s14 = smul.u32 24, %s2069_s13 }
   0xd   : > { %s1726_s15 = smul.u32 6, %s2069_s13 }
   0xe   : > { %s1797_s18 = scalar_lea.vmem %s2064_s0, %s1725_s14 }
   0xf   : > { %s1802_s21 = scalar_lea.vmem %s2067_s3, %s1726_s15 }
  0x10 LB: >> { %v1668_v0 = vld [vmem:[%s2065_s1 + $0x38] sm:$0xff]  ;;  %v1667_v4 = vld [vmem:[%s2065_s1 + $0x30] sm:$0xff]  ;;  %s1256_s8 = sshll.u32 %s1763_s22, 2  ;;  %v1666_v10 = vld [vmem:[%s2065_s1 + $0x28] sm:$0xff]  ;;  %vm232_vm0 = vcmask 523264   ;;  %s177_s22 = sadd.s32 1, %s1763_s22   ;;  %s1763_s22 = sphi %s1804_s22, %s177_s22  }
  0x11   : >> { %v1664_v1 = vld [vmem:[%s2065_s1 + $0x18] sm:$0xff]  ;;  %240 = vmatpush.bf16.msra.mxu0 %v1668_v0  ;;  %v1663_v5 = vld [vmem:[%s2065_s1 + $0x10] sm:$0xff]  ;;  %s1837_s14 = scalar_lea.vmem %s1797_s18, %s1256_s8  ;;  %v1662_v11 = vld [vmem:[%s2065_s1 + $0x8] sm:$0xff]  ;;  %s1084_s24 = scalar_lea.vmem [#allocation2], %s1256_s8 }
  0x12   : >> { %v1672_v2 = vld [vmem:[%s2065_s1 + $0x58] sm:$0xff]  ;;  %280 = vmatpush.bf16.msra.mxu1 %v1664_v1  ;;  %v1671_v6 = vld [vmem:[%s2065_s1 + $0x50] sm:$0xff]  ;;  %v180_v8 = vld [vmem:[%s1837_s14] sm:$0x3]  ;;  %p174_p4 = scmp.ge.s32.totalorder %s177_s22, 3  }
  0x13   : >> { %v1676_v3 = vld [vmem:[%s2065_s1 + $0x78] sm:$0xff]  ;;  %334 = vmatpush.bf16.msra.mxu2 %v1672_v2  ;;  %v1675_v7 = vld [vmem:[%s2065_s1 + $0x70] sm:$0xff]  ;;  %v289_v9 = vld [vmem:[%s1837_s14] sm:$0x6]  ;;  %v199_v12 = vunpack.c.l.b16 %v180_v8  ;;  %vm1096_vm1 = vcmask (%p174_p4), 1042432   ;;  %vm1164_vm6 = vcmask (%p174_p4), 1041408  }
  0x14   : >> { %392 = vmatpush.bf16.msra.mxu3 %v1676_v3  ;;  %v300_v13 = vunpack.c.l.b16 %v289_v9  ;;  %v1670_v14 = vld [vmem:[%s2065_s1 + $0x48] sm:$0xff]  ;;  %v1665_v18 = vld [vmem:[%s2065_s1 + $0x20] sm:$0xff]  ;;  %v1688_v29 = vld [vmem:[%s2065_s1 + $0xd8] sm:$0xff]  ;;  %vm1165_vm7 = vsmask.f32 (%p174_p4), 1280 }
  0x15   : >> { %241 = vmatpush.bf16.msra.mxu0 %v1667_v4  ;;  %v1674_v15 = vld [vmem:[%s2065_s1 + $0x68] sm:$0xff]  ;;  %v200_v16 = vpack.c.b16 %v199_v12, %v199_v12  ;;  %v1661_v19 = vld [vmem:[%s2065_s1] sm:$0xff]  ;;  %v1692_v30 = vld [vmem:[%s2065_s1 + $0xf8] sm:$0xff] }
  0x16   : >> { %281 = vmatpush.bf16.msra.mxu1 %v1663_v5  ;;  %v301_v17 = vpack.c.b16 %v300_v13, %v300_v13  ;;  %v1669_v23 = vld [vmem:[%s2065_s1 + $0x40] sm:$0xff]  ;;  %v1680_v37 = vld [vmem:[%s2065_s1 + $0x98] sm:$0xff]  ;;  %v1687_v40 = vld [vmem:[%s2065_s1 + $0xd0] sm:$0xff] }
  0x17   : >> { %335 = vmatpush.bf16.msra.mxu2 %v1671_v6  ;;  %v202_v20 = vshrl.u32 %v200_v16, 16  ;;  %v204_v21 = vshll.u32 %v200_v16, 16  ;;  %v1673_v24 = vld [vmem:[%s2065_s1 + $0x60] sm:$0xff]  ;;  %v1684_v38 = vld [vmem:[%s2065_s1 + $0xb8] sm:$0xff]  ;;  %v1691_v41 = vld [vmem:[%s2065_s1 + $0xf0] sm:$0xff] }
  0x18   : >> { %393 = vmatpush.bf16.msra.mxu3 %v1675_v7  ;;  %v354_v22 = vshrl.u32 %v301_v17, 16  ;;  %v357_v25 = vshll.u32 %v301_v17, 16  ;;  %v1866_v26 = vld [vmem:[%s1837_s14 + $0x4] sm:$0x3]  ;;  %v302_v34 = vrot.slane %v301_v17, 1  ;;  %v1679_v43 = vld [vmem:[%s2065_s1 + $0x90] sm:$0xff]  ;;  %vm1166_vm11 = vmand (%p174_p4), %vm1164_vm6, %vm1165_vm7 }
  0x19   : >> { %242 = vmatpush.bf16.msra.mxu0 %v1666_v10  ;;  %v206_v27 = vrot.slane %v204_v21, 1  ;;  %v1401_v31 = vld [vmem:[%s1837_s14 + $0x4] sm:$0x6]  ;;  %v466_v35 = vunpack.c.l.b16 %v1866_v26  ;;  %v1683_v44 = vld [vmem:[%s2065_s1 + $0xb0] sm:$0xff]  ;;  %v1686_v46 = vld [vmem:[%s2065_s1 + $0xc8] sm:$0xff] }
  0x1a   : >> { %282 = vmatpush.bf16.msra.mxu1 %v1662_v11  ;;  %v356_v28 = vrot.slane %v354_v22, 1  ;;  %v359_v32 = vrot.slane %v357_v25, 2  ;;  %v527_v39 = vunpack.c.l.b16 %v1401_v31  ;;  %v1690_v47 = vld [vmem:[%s2065_s1 + $0xe8] sm:$0xff]  ;;  %v1685_v53 = vld [vmem:[%s2065_s1 + $0xc0] sm:$0xff]  ;;  %v1704_v55 = vld [vmem:[%s2065_s1 + $0x158] sm:$0xff] }
  0x1b   : >> { %336 = vmatpush.bf16.msra.mxu2 %v1670_v14  ;;  %v207_v33 = vor.u32 %v206_v27, %v202_v20  ;;  %v467_v42 = vpack.c.b16 %v466_v35, %v466_v35  ;;  %v1678_v49 = vld [vmem:[%s2065_s1 + $0x88] sm:$0xff]  ;;  %v1689_v54 = vld [vmem:[%s2065_s1 + $0xe0] sm:$0xff]  ;;  %v1708_v56 = vld [vmem:[%s2065_s1 + $0x178] sm:$0xff] }
  0x1c   : >> { %394 = vmatpush.bf16.msra.mxu3 %v1674_v15  ;;  %v360_v36 = vor.u32 %v359_v32, %v356_v28  ;;  %v528_v45 = vpack.c.b16 %v527_v39, %v527_v39  ;;  %v1682_v50 = vld [vmem:[%s2065_s1 + $0xa8] sm:$0xff]  ;;  %v1677_v59 = vld [vmem:[%s2065_s1 + $0x80] sm:$0xff]  ;;  %v1696_v0 = vld [vmem:[%s2065_s1 + $0x118] sm:$0xff] }
  0x1d   : >> { %243 = vmatpush.bf16.msra.mxu0 %v1665_v18  ;;  %v471_v48 = vshll.u32 %v467_v42, 16  ;;  %v469_v57 = vshrl.u32 %v467_v42, 16  ;;  %v1681_v60 = vld [vmem:[%s2065_s1 + $0xa0] sm:$0xff]  ;;  %v1929_v63 = vld [vmem:[%s1837_s14 + $0x8] sm:$0x3]  ;;  %v1700_v1 = vld [vmem:[%s2065_s1 + $0x138] sm:$0xff] }
  0x1e   : >> { %283 = vmatpush.bf16.msra.mxu1 %v1661_v19  ;;  %v581_v51 = vshrl.u32 %v528_v45, 16  ;;  %v584_v52 = vshll.u32 %v528_v45, 16  ;;  %v1504_v2 = vld [vmem:[%s1837_s14 + $0x8] sm:$0x6]  ;;  %v1703_v3 = vld [vmem:[%s2065_s1 + $0x150] sm:$0xff]  ;;  %v693_v6 = vunpack.c.l.b16 %v1929_v63  ;;  %v529_v7 = vrot.slane %v528_v45, 1 }
  0x1f   : >> { %337 = vmatpush.bf16.msra.mxu2 %v1669_v23  ;;  %v473_v58 = vrot.slane %v471_v48, 1  ;;  %v1707_v4 = vld [vmem:[%s2065_s1 + $0x170] sm:$0xff]  ;;  %v754_v9 = vunpack.c.l.b16 %v1504_v2  ;;  %v1702_v12 = vld [vmem:[%s2065_s1 + $0x148] sm:$0xff]  ;;  %v1701_v18 = vld [vmem:[%s2065_s1 + $0x140] sm:$0xff] }
  0x20   : >> { %395 = vmatpush.bf16.msra.mxu3 %v1673_v24  ;;  %1281 = vmatmul.msk.bf16.vlgmr.msra.gmra.mxu0 %vm232_vm0, %v207_v33  ;;  %v583_v61 = vrot.slane %v581_v51, 1  ;;  %v586_v62 = vrot.slane %v584_v52, 2  ;;  %v1695_v10 = vld [vmem:[%s2065_s1 + $0x110] sm:$0xff]  ;;  %v1706_v13 = vld [vmem:[%s2065_s1 + $0x168] sm:$0xff]  ;;  %v694_v14 = vpack.c.b16 %v693_v6, %v693_v6  ;;  %v1705_v19 = vld [vmem:[%s2065_s1 + $0x160] sm:$0xff] }
  0x21   : >> { %1298 = vmatmul.msk.bf16.vlgmr.msra.gmra.mxu1 %vm232_vm0, %v180_v8  ;;  %446 = vmatpush.bf16.msrb.mxu0 %v1680_v37  ;;  %v474_v5 = vor.u32 %v473_v58, %v469_v57  ;;  %v1699_v11 = vld [vmem:[%s2065_s1 + $0x130] sm:$0xff]  ;;  %v755_v15 = vpack.c.b16 %v754_v9, %v754_v9  ;;  %v1694_v16 = vld [vmem:[%s2065_s1 + $0x108] sm:$0xff]  ;;  %v1720_v21 = vld [vmem:[%s2065_s1 + $0x1d8] sm:$0xff] }
  0x22   : >> { %1323 = vmatmul.msk.bf16.vlgmr.msra.gmra.mxu2 %vm232_vm0, %v302_v34  ;;  %506 = vmatpush.bf16.msrb.mxu1 %v1684_v38  ;;  %v587_v8 = vor.u32 %v586_v62, %v583_v61  ;;  %v1698_v17 = vld [vmem:[%s2065_s1 + $0x128] sm:$0xff]  ;;  %v698_v20 = vshll.u32 %v694_v14, 16  ;;  %v1724_v22 = vld [vmem:[%s2065_s1 + $0x1f8] sm:$0xff]  ;;  %v1693_v25 = vld [vmem:[%s2065_s1 + $0x100] sm:$0xff] }
  0x23   : >> { %561 = vmatpush.bf16.msrb.mxu2 %v1688_v29  ;;  %1348 = vmatmul.msk.bf16.vlgmr.msra.gmra.mxu3 %vm232_vm0, %v360_v36  ;;  %v808_v23 = vshrl.u32 %v755_v15, 16  ;;  %v811_v24 = vshll.u32 %v755_v15, 16  ;;  %v1712_v27 = vld [vmem:[%s2065_s1 + $0x198] sm:$0xff]  ;;  %v696_v29 = vshrl.u32 %v694_v14, 16  ;;  %v1719_v31 = vld [vmem:[%s2065_s1 + $0x1d0] sm:$0xff]  ;;  %v1722_v45 = vld [vmem:[%s2065_s1 + $0x1e8] sm:$0xff] }
  0x24   : >> { %619 = vmatpush.bf16.msrb.mxu3 %v1692_v30  ;;  %v1716_v28 = vld [vmem:[%s2065_s1 + $0x1b8] sm:$0xff]  ;;  %v700_v30 = vrot.slane %v698_v20, 1  ;;  %v1723_v32 = vld [vmem:[%s2065_s1 + $0x1f0] sm:$0xff]  ;;  %v1556_v35 = vld [vmem:[%s1837_s14 + $0xc] sm:$0x3] }
  0x25   : >> { %447 = vmatpush.bf16.msrb.mxu0 %v1679_v43  ;;  %v810_v33 = vrot.slane %v808_v23, 1  ;;  %v813_v34 = vrot.slane %v811_v24, 2  ;;  %v1607_v36 = vld [vmem:[%s1837_s14 + $0xc] sm:$0x6]  ;;  %v1711_v37 = vld [vmem:[%s2065_s1 + $0x190] sm:$0xff]  ;;  %v1721_v51 = vld [vmem:[%s2065_s1 + $0x1e0] sm:$0xff] }
  0x26   : >> { %507 = vmatpush.bf16.msrb.mxu1 %v1683_v44  ;;  %v1715_v38 = vld [vmem:[%s2065_s1 + $0x1b0] sm:$0xff]  ;;  %v701_v39 = vor.u32 %v700_v30, %v696_v29  ;;  %v981_v43 = vunpack.c.l.b16 %v1607_v36  ;;  %v1718_v44 = vld [vmem:[%s2065_s1 + $0x1c8] sm:$0xff]  ;;  %v1709_v52 = vld [vmem:[%s2065_s1 + $0x180] sm:$0xff] }
  0x27   : >> { %562 = vmatpush.bf16.msrb.mxu2 %v1687_v40  ;;  %v920_v40 = vunpack.c.l.b16 %v1556_v35  ;;  %v814_v42 = vor.u32 %v813_v34, %v810_v33 }
  0x28   : >> { %620 = vmatpush.bf16.msrb.mxu3 %v1691_v41  ;;  %v756_v41 = vrot.slane %v755_v15, 1 }
  0x29   : >> { %448 = vmatpush.bf16.msrb.mxu0 %v1678_v49  ;;  %v921_v48 = vpack.c.b16 %v920_v40, %v920_v40  ;;  %v982_v49 = vpack.c.b16 %v981_v43, %v981_v43 }
  0x2a   : >> { %508 = vmatpush.bf16.msrb.mxu1 %v1682_v50  ;;  %v1717_v50 = vld [vmem:[%s2065_s1 + $0x1c0] sm:$0xff] }
  0x2b   : >> { %563 = vmatpush.bf16.msrb.mxu2 %v1686_v46  ;;  %v1710_v46 = vld [vmem:[%s2065_s1 + $0x188] sm:$0xff]  ;;  %v923_v57 = vshrl.u32 %v921_v48, 16  ;;  %v983_v62 = vrot.slane %v982_v49, 1 }
  0x2c   : >> { %621 = vmatpush.bf16.msrb.mxu3 %v1690_v47  ;;  %v1714_v47 = vld [vmem:[%s2065_s1 + $0x1a8] sm:$0xff] }
  0x2d   : >> { %449 = vmatpush.bf16.msrb.mxu0 %v1677_v59 }
  0x2e   : >> { %509 = vmatpush.bf16.msrb.mxu1 %v1681_v60 }
  0x2f   : >> { %564 = vmatpush.bf16.msrb.mxu2 %v1685_v53  ;;  %v1713_v53 = vld [vmem:[%s2065_s1 + $0x1a0] sm:$0xff] }
  0x30   : >> { %622 = vmatpush.bf16.msrb.mxu3 %v1689_v54  ;;  %1375 = vmatmul.msk.bf16.vlgmr.msrb.gmra.mxu0 %vm232_vm0, %v1866_v26  ;;  %v1697_v26 = vld [vmem:[%s2065_s1 + $0x120] sm:$0xff]  ;;  %v925_v54 = vshll.u32 %v921_v48, 16 }
  0x31   : >> { %673 = vmatpush.bf16.msra.mxu0 %v1696_v0  ;;  %1400 = vmatmul.msk.bf16.vlgmr.msrb.gmra.mxu1 %vm232_vm0, %v474_v5 }
  0x32   : >> { %733 = vmatpush.bf16.msra.mxu1 %v1700_v1  ;;  %1426 = vmatmul.msk.bf16.vlgmr.msrb.gmra.mxu2 %vm232_vm0, %v529_v7  ;;  %v927_v58 = vrot.slane %v925_v54, 1 }
  0x33   : >> { %788 = vmatpush.bf16.msra.mxu2 %v1704_v55  ;;  %1451 = vmatmul.msk.bf16.vlgmr.msrb.gmra.mxu3 %vm232_vm0, %v587_v8  ;;  %v1035_v55 = vshrl.u32 %v982_v49, 16 }
  0x34   : >> { %846 = vmatpush.bf16.msra.mxu3 %v1708_v56  ;;  %v1038_v56 = vshll.u32 %v982_v49, 16  ;;  %v928_v61 = vor.u32 %v927_v58, %v923_v57  ;;  %v1744_v49 = vld [vmem:[%s2066_s2] ss:$0 sm:$0xff] (%p174_p4) }
  0x35   : >> { %674 = vmatpush.bf16.msra.mxu0 %v1695_v10  ;;  %v1037_v59 = vrot.slane %v1035_v55, 1 }
  0x36   : >> { %734 = vmatpush.bf16.msra.mxu1 %v1699_v11  ;;  %v1040_v60 = vrot.slane %v1038_v56, 2 }
  0x37   : >> { %789 = vmatpush.bf16.msra.mxu2 %v1703_v3 }
  0x38   : >> { %847 = vmatpush.bf16.msra.mxu3 %v1707_v4 }
  0x39   : >> { %675 = vmatpush.bf16.msra.mxu0 %v1694_v16 }
  0x3a   : >> { %735 = vmatpush.bf16.msra.mxu1 %v1698_v17 }
  0x3b   : >> { %790 = vmatpush.bf16.msra.mxu2 %v1702_v12 }
  0x3c   : >> { %848 = vmatpush.bf16.msra.mxu3 %v1706_v13 }
  0x3d   : >> { %676 = vmatpush.bf16.msra.mxu0 %v1693_v25 }
  0x3e   : >> { %736 = vmatpush.bf16.msra.mxu1 %v1697_v26 }
  0x3f   : >> { %791 = vmatpush.bf16.msra.mxu2 %v1701_v18 }
  0x40   : >> { %849 = vmatpush.bf16.msra.mxu3 %v1705_v19  ;;  %1478 = vmatmul.msk.bf16.vlgmr.msra.gmra.mxu0 %vm232_vm0, %v1929_v63  ;;  %v1041_v63 = vor.u32 %v1040_v60, %v1037_v59 }
  0x41   : >> { %900 = vmatpush.bf16.msrb.mxu0 %v1712_v27  ;;  %1503 = vmatmul.msk.bf16.vlgmr.msra.gmra.mxu1 %vm232_vm0, %v701_v39 }
  0x42   : >> { %960 = vmatpush.bf16.msrb.mxu1 %v1716_v28  ;;  %1529 = vmatmul.msk.bf16.vlgmr.msra.gmra.mxu2 %vm232_vm0, %v756_v41 }
  0x43   : >> { %1015 = vmatpush.bf16.msrb.mxu2 %v1720_v21  ;;  %1554 = vmatmul.msk.bf16.vlgmr.msra.gmra.mxu3 %vm232_vm0, %v814_v42 }
  0x44   : >> { %1073 = vmatpush.bf16.msrb.mxu3 %v1724_v22 }
  0x45   : >> { %901 = vmatpush.bf16.msrb.mxu0 %v1711_v37 }
  0x46   : >> { %961 = vmatpush.bf16.msrb.mxu1 %v1715_v38 }
  0x47   : >> { %1016 = vmatpush.bf16.msrb.mxu2 %v1719_v31 }
  0x48   : >> { %1074 = vmatpush.bf16.msrb.mxu3 %v1723_v32 }
  0x49   : >> { %902 = vmatpush.bf16.msrb.mxu0 %v1710_v46 }
  0x4a   : >> { %962 = vmatpush.bf16.msrb.mxu1 %v1714_v47 }
  0x4b   : >> { %1017 = vmatpush.bf16.msrb.mxu2 %v1718_v44 }
  0x4c   : >> { %1075 = vmatpush.bf16.msrb.mxu3 %v1722_v45 }
  0x4d   : >> { %903 = vmatpush.bf16.msrb.mxu0 %v1709_v52 }
  0x4e   : >> { %963 = vmatpush.bf16.msrb.mxu1 %v1713_v53 }
  0x4f   : >> { %1018 = vmatpush.bf16.msrb.mxu2 %v1717_v50  ;;  %v1765_v50 = vmov (%p174_p4), 3.0  }
  0x50   : >> { %1076 = vmatpush.bf16.msrb.mxu3 %v1721_v51  ;;  %1581 = vmatmul.msk.bf16.vlgmr.msrb.gmra.mxu0 %vm232_vm0, %v1556_v35  ;;  %1745 = vrcp.f32 (%p174_p4), %v1765_v50 }
  0x51   : >> { %1606 = vmatmul.msk.bf16.vlgmr.msrb.gmra.mxu1 %vm232_vm0, %v928_v61 }
  0x52   : >> { %1632 = vmatmul.msk.bf16.vlgmr.msrb.gmra.mxu2 %vm232_vm0, %v983_v62 }
  0x53   : >> { %1657 = vmatmul.msk.bf16.vlgmr.msrb.gmra.mxu3 %vm232_vm0, %v1041_v63 }
  0x56   : > { %v1746_v57 = vpop.eup (%p174_p4), %1745 }
  0x57   : > { %v1103_v58 = vmul.f32 (%p174_p4), 3.0, %v1746_v57  ;;  %vm1107_vm2 = vweird.f32 (%p174_p4), %v1746_v57 }
  0x59   : > { %v1104_v61 = vsub.f32 (%p174_p4), 1.0, %v1103_v58 }
  0x5b   : > { %v1105_v62 = vmul.f32 (%p174_p4), %v1746_v57, %v1104_v61 }
  0x9d   : >> { %v245_v0 = vpop.f32.mrf.mxu0 }
  0x9e   : >> { %v285_v1 = vpop.f32.mrf.mxu1 }
  0x9f   : >> { %v286_v8 = vadd.f32 %v285_v1, %v245_v0  ;;  %v1106_v0 = vadd.f32 (%p174_p4), %v1746_v57, %v1105_v62 }
  0xa1   : > { %v1108_v1 = vsel (%p174_p4), %vm1107_vm2, %v1746_v57, %v1106_v0 }
  0xa5   : >> { %v339_v2 = vpop.f32.mrf.mxu2  ;;  %v247_v4 = vpop.f32.mrf.mxu0 }
  0xa6   : >> { %v397_v3 = vpop.f32.mrf.mxu3  ;;  %v287_v5 = vpop.f32.mrf.mxu1  ;;  %v343_v11 = vadd.f32 %v339_v2, %v286_v8 }
  0xa8   : >> { %v401_v14 = vadd.f32 %v397_v3, %v343_v11 }
  0xad   : >> { %v341_v6 = vpop.f32.mrf.mxu2  ;;  %v451_v9 = vpop.f32.mrf.mxu0 }
  0xae   : >> { %v399_v7 = vpop.f32.mrf.mxu3  ;;  %v511_v10 = vpop.f32.mrf.mxu1  ;;  %v455_v17 = vadd.f32 %v451_v9, %v401_v14 }
  0xb0   : >> { %v515_v18 = vadd.f32 %v511_v10, %v455_v17 }
  0xb5   : >> { %v566_v12 = vpop.f32.mrf.mxu2  ;;  %v453_v15 = vpop.f32.mrf.mxu0 }
  0xb6   : >> { %v624_v13 = vpop.f32.mrf.mxu3  ;;  %v513_v16 = vpop.f32.mrf.mxu1  ;;  %v570_v21 = vadd.f32 %v566_v12, %v515_v18 }
  0xb8   : >> { %v628_v24 = vadd.f32 %v624_v13, %v570_v21 }
  0xbd   : >> { %v568_v19 = vpop.f32.mrf.mxu2  ;;  %v678_v22 = vpop.f32.mrf.mxu0 }
  0xbe   : >> { %v626_v20 = vpop.f32.mrf.mxu3  ;;  %v738_v23 = vpop.f32.mrf.mxu1  ;;  %v682_v25 = vadd.f32 %v678_v22, %v628_v24 }
  0xc0   : >> { %v742_v30 = vadd.f32 %v738_v23, %v682_v25 }
  0xc5   : >> { %v793_v26 = vpop.f32.mrf.mxu2  ;;  %v680_v28 = vpop.f32.mrf.mxu0 }
  0xc6   : >> { %v851_v27 = vpop.f32.mrf.mxu3  ;;  %v740_v29 = vpop.f32.mrf.mxu1  ;;  %v797_v31 = vadd.f32 %v793_v26, %v742_v30 }
  0xc8   : >> { %v855_v34 = vadd.f32 %v851_v27, %v797_v31 }
  0xcd   : >> { %v795_v32 = vpop.f32.mrf.mxu2  ;;  %v905_v35 = vpop.f32.mrf.mxu0 }
  0xce   : >> { %v853_v33 = vpop.f32.mrf.mxu3  ;;  %v965_v36 = vpop.f32.mrf.mxu1  ;;  %v909_v37 = vadd.f32 %v905_v35, %v855_v34 }
  0xd0   : >> { %v969_v38 = vadd.f32 %v965_v36, %v909_v37 }
  0xd5   : >> { %v1020_v39 = vpop.f32.mrf.mxu2  ;;  %v907_v42 = vpop.f32.mrf.mxu0 }
  0xd6   : >> { %v1078_v40 = vpop.f32.mrf.mxu3  ;;  %v1024_v41 = vadd.f32 %v1020_v39, %v969_v38  ;;  %v967_v43 = vpop.f32.mrf.mxu1 }
  0xd8   : >> { %v1082_v44 = vadd.f32 %v1078_v40, %v1024_v41 }
  0xda   : >> { %1085 = vst [vmem:[%s1084_s24] sm:$0x7] %v1082_v44  ;;  %176 = sbr.rel (!%p174_p4) target bundleno = 16 (0x10), region = 89 }
  0xdd   : >> { %v1022_v45 = vpop.f32.mrf.mxu2 }
  0xde   : >> { %v1080_v46 = vpop.f32.mrf.mxu3 }
  0xdf   : > { %v1167_v46 = vld [vmem:[%s1802_s21] sm:$0x3] }
  0xe1   : > { %v1086_v47 = vld [vmem:[#allocation2] sm:$0x7]  ;;  %v1087_v48 = vld [vmem:[#allocation2 + $0x4] sm:$0x7]  ;;  %v1088_v53 = vld [vmem:[#allocation2 + $0x8] sm:$0x7] }
  0xe2   : > { %v1093_v51 = vadd.f32 %v1744_v49, %v1086_v47  ;;  %v1094_v52 = vadd.f32 %v1744_v49, %v1087_v48  ;;  %v1095_v54 = vadd.f32 %v1744_v49, %v1088_v53  ;;  %v1170_v48 = vld [vmem:[%s1802_s21 + $0x2] sm:$0x3] }
  0xe4   : > { %v1097_v55 = vsel %vm1096_vm1, %v1093_v51, 0.0  ;;  %v1098_v56 = vsel %vm1096_vm1, %v1094_v52, 0.0  ;;  %v1100_v60 = vsel %vm1096_vm1, %v1095_v54, 0.0 }
  0xe5   : > { %v1099_v59 = vadd.f32 %v1098_v56, %v1097_v55 }
  0xe7   : > { %v1101_v63 = vadd.f32 %v1100_v60, %v1099_v59 }
  0xe9   : > { %v1109_v2 = vmul.f32 %v1108_v1, %v1101_v63 }
  0xeb   : > { %v1110_v3 = vsel %vm1096_vm1, %v1109_v2, 0.0 }
  0xec   : > { %v1111_v4 = vrot.slane %v1110_v3, 4 }
  0xee   : > { %v1112_v5 = vadd.f32 %v1111_v4, %v1110_v3 }
  0xf0   : > { %v1113_v6 = vrot.slane %v1112_v5, 2 }
  0xf2   : > { %v1114_v7 = vadd.f32 %v1113_v6, %v1112_v5 }
  0xf4   : > { %v1115_v8 = vrot.slane %v1114_v7, 1 }
  0xf6   : > { %v1116_v9 = vadd.f32 %v1115_v8, %v1114_v7 }
  0xf8   : > { %v1117_v10 = vmul.f32 %v1116_v9, %v1108_v1 }
  0xfa   : > { %v1118_v11 = vsub.f32 %v1093_v51, %v1117_v10  ;;  %v1119_v12 = vsub.f32 %v1094_v52, %v1117_v10  ;;  %v1120_v13 = vsub.f32 %v1095_v54, %v1117_v10  ;;  %v1173_v52 = vld [vmem:[%s1802_s21 + $0x4] sm:$0x3] }
  0xfc   : > { %v1121_v14 = vmul.f32 %v1118_v11, %v1118_v11  ;;  %v1122_v15 = vmul.f32 %v1119_v12, %v1119_v12  ;;  %v1123_v16 = vmul.f32 %v1120_v13, %v1120_v13 }
  0xfe   : > { %v1124_v17 = vsel %vm1096_vm1, %v1121_v14, 0.0  ;;  %v1125_v18 = vsel %vm1096_vm1, %v1122_v15, 0.0  ;;  %v1127_v19 = vsel %vm1096_vm1, %v1123_v16, 0.0 }
  0xff   : > { %v1126_v20 = vadd.f32 %v1125_v18, %v1124_v17 }
 0x101   : > { %v1128_v21 = vadd.f32 %v1127_v19, %v1126_v20 }
 0x103   : > { %v1129_v22 = vmul.f32 %v1128_v21, %v1108_v1 }
 0x105   : > { %v1130_v23 = vsel %vm1096_vm1, %v1129_v22, 0.0 }
 0x106   : > { %v1131_v24 = vrot.slane %v1130_v23, 4 }
 0x108   : > { %v1132_v25 = vadd.f32 %v1131_v24, %v1130_v23 }
 0x10a   : > { %v1133_v26 = vrot.slane %v1132_v25, 2 }
 0x10c   : > { %v1134_v27 = vadd.f32 %v1133_v26, %v1132_v25 }
 0x10e   : > { %v1135_v28 = vrot.slane %v1134_v27, 1 }
 0x110   : > { %v1136_v29 = vadd.f32 %v1135_v28, %v1134_v27 }
 0x112   : > { %v1137_v30 = vmul.f32 %v1136_v29, %v1108_v1 }
 0x114   : > { %v1138_v31 = vadd.f32 1e-05, %v1137_v30 }
 0x116   : > { %1747 = vrsqrt.f32 %v1138_v31  ;;  %vm1145_vm3 = vweird.f32 %v1138_v31 }
 0x11c   : > { %v1748_v32 = vpop.eup %1747 }
 0x11d   : > { %v1140_v33 = vmul.f32 %v1748_v32, %v1138_v31  ;;  %vm1146_vm4 = vweird.f32 %v1748_v32 }
 0x11e   : > { %vm1147_vm5 = vmor %vm1145_vm3, %vm1146_vm4 }
 0x11f   : > { %v1141_v34 = vmul.f32 %v1748_v32, %v1140_v33 }
 0x121   : > { %v1142_v35 = vmul.f32 0.5, %v1141_v34 }
 0x123   : > { %v1143_v36 = vsub.f32 1.5, %v1142_v35 }
 0x125   : > { %v1144_v37 = vmul.f32 %v1748_v32, %v1143_v36 }
 0x127   : > { %v1148_v38 = vsel %vm1147_vm5, %v1748_v32, %v1144_v37 }
 0x128   : > { %v1149_v39 = vmul.f32 %v1148_v38, %v1118_v11  ;;  %v1150_v40 = vmul.f32 %v1148_v38, %v1119_v12  ;;  %v1151_v41 = vmul.f32 %v1148_v38, %v1120_v13 }
 0x12a   : > { %vm1152_vm8 = vcmp.ge.f32.partialorder %v1149_v39, 0.0  ;;  %v1155_v42 = vmul.f32 0.2, %v1149_v39  ;;  %vm1153_vm9 = vcmp.ge.f32.partialorder %v1150_v40, 0.0  ;;  %v1156_v43 = vmul.f32 0.2, %v1150_v40 }
 0x12b   : > { %vm1154_vm10 = vcmp.ge.f32.partialorder %v1151_v41, 0.0  ;;  %v1157_v44 = vmul.f32 0.2, %v1151_v41 }
 0x12c   : > { %v1158_v45 = vsel %vm1152_vm8, %v1149_v39, %v1155_v42  ;;  %v1159_v47 = vsel %vm1153_vm9, %v1150_v40, %v1156_v43 }
 0x12d   : > { %v1161_v49 = vpack.c.bf16 %v1158_v45, %v1158_v45  ;;  %v1162_v50 = vpack.c.bf16 %v1159_v47, %v1159_v47  ;;  %v1160_v51 = vsel %vm1154_vm10, %v1151_v41, %v1157_v44 }
 0x12e   : > { %v1163_v53 = vpack.c.bf16 %v1160_v51, %v1160_v51 }
 0x12f   : > { %v1168_v54 = vsel %vm1166_vm11, %v1161_v49, %v1167_v46  ;;  %v1171_v55 = vsel %vm1166_vm11, %v1162_v50, %v1170_v48 }
 0x130   : > { %1169 = vst [vmem:[%s1802_s21] sm:$0x3] %v1168_v54  ;;  %v1174_v56 = vsel %vm1166_vm11, %v1163_v53, %v1173_v52 }
 0x131   : > { %1172 = vst [vmem:[%s1802_s21 + $0x2] sm:$0x3] %v1171_v55 }
 0x132   : > { %1175 = vst [vmem:[%s1802_s21 + $0x4] sm:$0x3] %v1174_v56 }
 0x133 PF: > { %s13_s12 = sadd.s32 1, %s1759_s12  }
 0x134   : > { %p10_p5 = scmp.ge.s32.totalorder %s13_s12, 4  }
 0x136   :  { %12 = sbr.rel (!%p10_p5) target bundleno = 1 (0x1), region = 100 }

// kernel: _lambda_.9
= control target key start
LH: loop header
LB: loop body
LE: loop exit
PB: predicated region body
PF: predicated region fallthrough
CT: control target
= control target key end

     0   :  { %s2632_s14 = smov 0   ;;  %s3071_s0 = inlined_call_operand.vmem [shape: bf16[2,5,5,128], index: 0, kind: input, shape index: {}]   ;;  %s3072_s1 = inlined_call_operand.vmem [shape: bf16[16,128,1], index: 1, kind: input, shape index: {}]   ;;  %s3073_s2 = inlined_call_operand.<no memory space> [shape: f32[1,1], index: 2, kind: input, shape index: {}]   ;;  %s3074_s3 = inlined_call_operand.vmem [shape: f32[2,2,2,1], index: 3, kind: output, shape index: {}]  }
   0x1   :  { %v8_v0 = vstv %s3073_s2 }
   0x2   :  { %9 = vst [vmem:[#allocation3] sm:$0x1] %v8_v0 }
   0x3 LB: > { %s1667_s15 = sadd.s32 4294967295, %s2603_s14   ;;  %p1671_p0 = scmp.ge.s32.totalorder %s2603_s14, 1  ;;  %s2603_s14 = sphi %s2632_s14, %s15_s14  }
   0x4   : > { %p139_p1 = scmp.lt.s32.totalorder %s2603_s14, 3 }
   0x6   : > { %p140_p2 = pnand %p1671_p0, %p139_p1 }
   0x7   : > { %p163_p3 = scmp.lt.s32.totalorder (!%p140_p2), %s1667_s15, 1  ;;  %s2650_s23 = smov (!%p140_p2), 0  }
   0x8   : > { %143 = sbr.rel (%p140_p2) target bundleno = 295 (0x127), region = 32 }
   0xd   : > { %s3076_s15 = smov (!%p163_p3, %s1667_s15), 1 }
   0xe   : > { %s2575_s16 = smul.u32 20, %s3076_s15  ;;  %s2446_s2 = sshll.u32 %s3076_s15, 2 }
   0xf   : > { %s2643_s19 = scalar_lea.vmem %s3074_s3, %s2446_s2 }
  0x10   : > { %s2648_s22 = scalar_lea.vmem %s3071_s0, %s2575_s16 }
  0x11 LB: >> { %v2462_v1 = vld [vmem:[%s3072_s1 + $0x78] sm:$0xff]  ;;  %v2461_v5 = vld [vmem:[%s3072_s1 + $0x70] sm:$0xff]  ;;  %v2460_v9 = vld [vmem:[%s3072_s1 + $0x68] sm:$0xff]  ;;  %s1675_s5 = sshll.u32 %s2607_s23, 2  ;;  %vm1581_vm0 = vcmask 1024   ;;  %s2607_s23 = sphi %s2650_s23, %s178_s23  }
  0x12   : >> { %v2454_v2 = vld [vmem:[%s3072_s1 + $0x38] sm:$0xff]  ;;  %275 = vmatpush.bf16.msra.mxu0 %v2462_v1  ;;  %v2453_v6 = vld [vmem:[%s3072_s1 + $0x30] sm:$0xff]  ;;  %v2452_v10 = vld [vmem:[%s3072_s1 + $0x28] sm:$0xff]  ;;  %s2717_s15 = scalar_lea.vmem %s2648_s22, %s1675_s5 }
  0x13   : >> { %v2470_v3 = vld [vmem:[%s3072_s1 + $0xb8] sm:$0xff]  ;;  %336 = vmatpush.bf16.msra.mxu1 %v2454_v2  ;;  %v2469_v7 = vld [vmem:[%s3072_s1 + $0xb0] sm:$0xff]  ;;  %v2468_v11 = vld [vmem:[%s3072_s1 + $0xa8] sm:$0xff] }
  0x14   : >> { %v2478_v4 = vld [vmem:[%s3072_s1 + $0xf8] sm:$0xff]  ;;  %420 = vmatpush.bf16.msra.mxu2 %v2470_v3  ;;  %v2477_v8 = vld [vmem:[%s3072_s1 + $0xf0] sm:$0xff]  ;;  %v2476_v12 = vld [vmem:[%s3072_s1 + $0xe8] sm:$0xff] }
  0x15   : >> { %512 = vmatpush.bf16.msra.mxu3 %v2478_v4  ;;  %v2459_v13 = vld [vmem:[%s3072_s1 + $0x60] sm:$0xff]  ;;  %v2458_v17 = vld [vmem:[%s3072_s1 + $0x58] sm:$0xff]  ;;  %v2457_v21 = vld [vmem:[%s3072_s1 + $0x50] sm:$0xff] }
  0x16   : >> { %276 = vmatpush.bf16.msra.mxu0 %v2461_v5  ;;  %v2451_v14 = vld [vmem:[%s3072_s1 + $0x20] sm:$0xff]  ;;  %v2450_v18 = vld [vmem:[%s3072_s1 + $0x18] sm:$0xff]  ;;  %v2449_v22 = vld [vmem:[%s3072_s1 + $0x10] sm:$0xff] }
  0x17   : >> { %337 = vmatpush.bf16.msra.mxu1 %v2453_v6  ;;  %v2467_v15 = vld [vmem:[%s3072_s1 + $0xa0] sm:$0xff]  ;;  %v2466_v19 = vld [vmem:[%s3072_s1 + $0x98] sm:$0xff]  ;;  %v2465_v25 = vld [vmem:[%s3072_s1 + $0x90] sm:$0xff] }
  0x18   : >> { %421 = vmatpush.bf16.msra.mxu2 %v2469_v7  ;;  %v2475_v16 = vld [vmem:[%s3072_s1 + $0xe0] sm:$0xff]  ;;  %v2474_v20 = vld [vmem:[%s3072_s1 + $0xd8] sm:$0xff]  ;;  %v2473_v26 = vld [vmem:[%s3072_s1 + $0xd0] sm:$0xff] }
  0x19   : >> { %513 = vmatpush.bf16.msra.mxu3 %v2477_v8  ;;  %v198_v23 = vld [vmem:[%s2717_s15] sm:$0x3]  ;;  %v2456_v32 = vld [vmem:[%s3072_s1 + $0x48] sm:$0xff]  ;;  %v2486_v49 = vld [vmem:[%s3072_s1 + $0x138] sm:$0xff] }
  0x1a   : >> { %277 = vmatpush.bf16.msra.mxu0 %v2460_v9  ;;  %v434_v24 = vld [vmem:[%s2717_s15] sm:$0x6]  ;;  %v217_v28 = vunpack.c.l.b16 %v198_v23  ;;  %v2448_v33 = vld [vmem:[%s3072_s1 + $0x8] sm:$0xff]  ;;  %v2494_v50 = vld [vmem:[%s3072_s1 + $0x178] sm:$0xff] }
  0x1b   : >> { %338 = vmatpush.bf16.msra.mxu1 %v2452_v10  ;;  %v349_v27 = vld [vmem:[%s2717_s15] sm:$0x2]  ;;  %v453_v29 = vunpack.c.l.b16 %v434_v24  ;;  %v2464_v35 = vld [vmem:[%s3072_s1 + $0x88] sm:$0xff]  ;;  %v2502_v51 = vld [vmem:[%s3072_s1 + $0x1b8] sm:$0xff] }
  0x1c   : >> { %422 = vmatpush.bf16.msra.mxu2 %v2468_v11  ;;  %v218_v30 = vpack.c.b16 %v217_v28, %v217_v28  ;;  %v368_v34 = vunpack.c.l.b16 %v349_v27  ;;  %v2472_v36 = vld [vmem:[%s3072_s1 + $0xc8] sm:$0xff]  ;;  %v2455_v40 = vld [vmem:[%s3072_s1 + $0x40] sm:$0xff]  ;;  %v2510_v52 = vld [vmem:[%s3072_s1 + $0x1f8] sm:$0xff] }
  0x1d   : >> { %514 = vmatpush.bf16.msra.mxu3 %v2476_v12  ;;  %v454_v31 = vpack.c.b16 %v453_v29, %v453_v29  ;;  %v2447_v41 = vld [vmem:[%s3072_s1] sm:$0xff]  ;;  %v2485_v56 = vld [vmem:[%s3072_s1 + $0x130] sm:$0xff]  ;;  %v2484_v61 = vld [vmem:[%s3072_s1 + $0x128] sm:$0xff] }
  0x1e   : >> { %278 = vmatpush.bf16.msra.mxu0 %v2459_v13  ;;  %v222_v37 = vshll.u32 %v218_v30, 16  ;;  %v369_v42 = vpack.c.b16 %v368_v34, %v368_v34  ;;  %v220_v43 = vshrl.u32 %v218_v30, 16  ;;  %v2463_v45 = vld [vmem:[%s3072_s1 + $0x80] sm:$0xff]  ;;  %v2493_v57 = vld [vmem:[%s3072_s1 + $0x170] sm:$0xff]  ;;  %v2492_v62 = vld [vmem:[%s3072_s1 + $0x168] sm:$0xff] }
  0x1f   : >> { %339 = vmatpush.bf16.msra.mxu1 %v2451_v14  ;;  %v456_v38 = vshrl.u32 %v454_v31, 16  ;;  %v459_v39 = vshll.u32 %v454_v31, 16  ;;  %v2471_v46 = vld [vmem:[%s3072_s1 + $0xc0] sm:$0xff]  ;;  %v2501_v59 = vld [vmem:[%s3072_s1 + $0x1b0] sm:$0xff]  ;;  %v2500_v63 = vld [vmem:[%s3072_s1 + $0x1a8] sm:$0xff] }
  0x20   : >> { %423 = vmatpush.bf16.msra.mxu2 %v2467_v15  ;;  %v224_v44 = vrot.slane %v222_v37, 1  ;;  %v370_v53 = vrot.slane %v369_v42, 1  ;;  %v181_v58 = vld [vmem:[%s2717_s15] sm:$0x1]  ;;  %v2509_v60 = vld [vmem:[%s3072_s1 + $0x1f0] sm:$0xff]  ;;  %v2508_v0 = vld [vmem:[%s3072_s1 + $0x1e8] sm:$0xff] }
  0x21   : >> { %515 = vmatpush.bf16.msra.mxu3 %v2475_v16  ;;  %v458_v47 = vrot.slane %v456_v38, 1  ;;  %v461_v48 = vrot.slane %v459_v39, 2  ;;  %v2483_v1 = vld [vmem:[%s3072_s1 + $0x120] sm:$0xff]  ;;  %v2482_v7 = vld [vmem:[%s3072_s1 + $0x118] sm:$0xff]  ;;  %v2481_v13 = vld [vmem:[%s3072_s1 + $0x110] sm:$0xff] }
  0x22   : >> { %279 = vmatpush.bf16.msra.mxu0 %v2458_v17  ;;  %v225_v54 = vor.u32 %v224_v44, %v220_v43  ;;  %v2491_v2 = vld [vmem:[%s3072_s1 + $0x160] sm:$0xff]  ;;  %v2490_v8 = vld [vmem:[%s3072_s1 + $0x158] sm:$0xff]  ;;  %v2489_v14 = vld [vmem:[%s3072_s1 + $0x150] sm:$0xff] }
  0x23   : >> { %340 = vmatpush.bf16.msra.mxu1 %v2450_v18  ;;  %v462_v55 = vor.u32 %v461_v48, %v458_v47  ;;  %v2499_v3 = vld [vmem:[%s3072_s1 + $0x1a0] sm:$0xff]  ;;  %v2498_v9 = vld [vmem:[%s3072_s1 + $0x198] sm:$0xff]  ;;  %v2497_v15 = vld [vmem:[%s3072_s1 + $0x190] sm:$0xff] }
  0x24   : >> { %424 = vmatpush.bf16.msra.mxu2 %v2466_v19  ;;  %v2507_v4 = vld [vmem:[%s3072_s1 + $0x1e0] sm:$0xff]  ;;  %v2506_v10 = vld [vmem:[%s3072_s1 + $0x1d8] sm:$0xff]  ;;  %v2505_v16 = vld [vmem:[%s3072_s1 + $0x1d0] sm:$0xff] }
  0x25   : >> { %516 = vmatpush.bf16.msra.mxu3 %v2474_v20  ;;  %v2000_v5 = vld [vmem:[%s2717_s15 + $0x4] sm:$0x6]  ;;  %v2480_v20 = vld [vmem:[%s3072_s1 + $0x108] sm:$0xff]  ;;  %v2518_v37 = vld [vmem:[%s3072_s1 + $0x238] sm:$0xff] }
  0x26   : >> { %280 = vmatpush.bf16.msra.mxu0 %v2457_v21  ;;  %v1902_v6 = vld [vmem:[%s2717_s15 + $0x4] sm:$0x3]  ;;  %v804_v11 = vunpack.c.l.b16 %v2000_v5  ;;  %v2488_v21 = vld [vmem:[%s3072_s1 + $0x148] sm:$0xff]  ;;  %v2526_v38 = vld [vmem:[%s3072_s1 + $0x278] sm:$0xff] }
  0x27   : >> { %341 = vmatpush.bf16.msra.mxu1 %v2449_v22  ;;  %v628_v12 = vunpack.c.l.b16 %v1902_v6  ;;  %v1951_v17 = vld [vmem:[%s2717_s15 + $0x4] sm:$0x2]  ;;  %v2496_v23 = vld [vmem:[%s3072_s1 + $0x188] sm:$0xff]  ;;  %v2534_v39 = vld [vmem:[%s3072_s1 + $0x2b8] sm:$0xff] }
  0x28   : >> { %425 = vmatpush.bf16.msra.mxu2 %v2465_v25  ;;  %v805_v18 = vpack.c.b16 %v804_v11, %v804_v11  ;;  %v719_v22 = vunpack.c.l.b16 %v1951_v17  ;;  %v2504_v24 = vld [vmem:[%s3072_s1 + $0x1c8] sm:$0xff]  ;;  %v2479_v28 = vld [vmem:[%s3072_s1 + $0x100] sm:$0xff]  ;;  %v2533_v47 = vld [vmem:[%s3072_s1 + $0x2b0] sm:$0xff] }
  0x29   : >> { %517 = vmatpush.bf16.msra.mxu3 %v2473_v26  ;;  %v629_v19 = vpack.c.b16 %v628_v12, %v628_v12  ;;  %v2487_v29 = vld [vmem:[%s3072_s1 + $0x140] sm:$0xff]  ;;  %v2541_v48 = vld [vmem:[%s3072_s1 + $0x2f0] sm:$0xff]  ;;  %v2148_v5 = vld [vmem:[%s2717_s15 + $0x8] sm:$0x2] }
  0x2a   : >> { %281 = vmatpush.bf16.msra.mxu0 %v2456_v32  ;;  %v807_v25 = vshrl.u32 %v805_v18, 16  ;;  %v810_v26 = vshll.u32 %v805_v18, 16  ;;  %v720_v30 = vpack.c.b16 %v719_v22, %v719_v22  ;;  %v2495_v31 = vld [vmem:[%s3072_s1 + $0x180] sm:$0xff]  ;;  %v2528_v11 = vld [vmem:[%s3072_s1 + $0x288] sm:$0xff] }
  0x2b   : >> { %342 = vmatpush.bf16.msra.mxu1 %v2448_v33  ;;  %v633_v27 = vshll.u32 %v629_v19, 16  ;;  %v2503_v32 = vld [vmem:[%s3072_s1 + $0x1c0] sm:$0xff]  ;;  %v2536_v12 = vld [vmem:[%s3072_s1 + $0x2c8] sm:$0xff] }
  0x2c   : >> { %426 = vmatpush.bf16.msra.mxu2 %v2464_v35  ;;  %v809_v33 = vrot.slane %v807_v25, 1  ;;  %v812_v34 = vrot.slane %v810_v26, 2  ;;  %v631_v35 = vshrl.u32 %v629_v19, 16  ;;  %v1853_v42 = vld [vmem:[%s2717_s15 + $0x4] sm:$0x1]  ;;  %v2550_v25 = vld [vmem:[%s3072_s1 + $0x338] sm:$0xff] }
  0x2d   : >> { %518 = vmatpush.bf16.msra.mxu3 %v2472_v36  ;;  %v635_v36 = vrot.slane %v633_v27, 1  ;;  %v2519_v17 = vld [vmem:[%s3072_s1 + $0x240] sm:$0xff]  ;;  %v2558_v26 = vld [vmem:[%s3072_s1 + $0x378] sm:$0xff] }
  0x2e   : >> { %282 = vmatpush.bf16.msra.mxu0 %v2455_v40  ;;  %v2542_v40 = vld [vmem:[%s3072_s1 + $0x2f8] sm:$0xff]  ;;  %v813_v43 = vor.u32 %v812_v34, %v809_v33  ;;  %v2527_v19 = vld [vmem:[%s3072_s1 + $0x280] sm:$0xff]  ;;  %v2549_v33 = vld [vmem:[%s3072_s1 + $0x330] sm:$0xff] }
  0x2f   : >> { %343 = vmatpush.bf16.msra.mxu1 %v2447_v41  ;;  %v721_v41 = vrot.slane %v720_v30, 1  ;;  %v636_v44 = vor.u32 %v635_v36, %v631_v35  ;;  %v2566_v27 = vld [vmem:[%s3072_s1 + $0x3b8] sm:$0xff]  ;;  %v2050_v30 = vld [vmem:[%s2717_s15 + $0x8] sm:$0x1]  ;;  %v2557_v34 = vld [vmem:[%s3072_s1 + $0x370] sm:$0xff] }
  0x30   : >> { %427 = vmatpush.bf16.msra.mxu2 %v2463_v45  ;;  %v2517_v45 = vld [vmem:[%s3072_s1 + $0x230] sm:$0xff] }
  0x31   : >> { %519 = vmatpush.bf16.msra.mxu3 %v2471_v46  ;;  %283 = vmatmul.bf16.vlgmr.msra.gmra.mxu0 %v225_v54  ;;  %v2525_v46 = vld [vmem:[%s3072_s1 + $0x270] sm:$0xff]  ;;  %v2523_v54 = vld [vmem:[%s3072_s1 + $0x260] sm:$0xff] }
  0x32   : >> { %595 = vmatpush.bf16.msrb.mxu0 %v2486_v49  ;;  %344 = vmatmul.bf16.vlgmr.msra.gmra.mxu1 %v181_v58  ;;  %v2516_v49 = vld [vmem:[%s3072_s1 + $0x228] sm:$0xff]  ;;  %v2565_v35 = vld [vmem:[%s3072_s1 + $0x3b0] sm:$0xff] }
  0x33   : >> { %686 = vmatpush.bf16.msrb.mxu1 %v2494_v50  ;;  %428 = vmatmul.bf16.vlgmr.msra.gmra.mxu2 %v370_v53  ;;  %v2524_v50 = vld [vmem:[%s3072_s1 + $0x268] sm:$0xff]  ;;  %v2515_v53 = vld [vmem:[%s3072_s1 + $0x220] sm:$0xff]  ;;  %v2573_v36 = vld [vmem:[%s3072_s1 + $0x3f0] sm:$0xff] }
  0x34   : >> { %771 = vmatpush.bf16.msrb.mxu2 %v2502_v51  ;;  %520 = vmatmul.bf16.vlgmr.msra.gmra.mxu3 %v462_v55  ;;  %v2532_v51 = vld [vmem:[%s3072_s1 + $0x2a8] sm:$0xff]  ;;  %v2531_v55 = vld [vmem:[%s3072_s1 + $0x2a0] sm:$0xff] }
  0x35   : >> { %863 = vmatpush.bf16.msrb.mxu3 %v2510_v52  ;;  %v2540_v52 = vld [vmem:[%s3072_s1 + $0x2e8] sm:$0xff] }
  0x36   : >> { %596 = vmatpush.bf16.msrb.mxu0 %v2485_v56  ;;  %v2539_v56 = vld [vmem:[%s3072_s1 + $0x2e0] sm:$0xff]  ;;  %v2197_v58 = vld [vmem:[%s2717_s15 + $0x8] sm:$0x6] }
  0x37   : >> { %687 = vmatpush.bf16.msrb.mxu1 %v2493_v57  ;;  %v2099_v57 = vld [vmem:[%s2717_s15 + $0x8] sm:$0x3] }
  0x38   : >> { %772 = vmatpush.bf16.msrb.mxu2 %v2501_v59  ;;  %v2514_v59 = vld [vmem:[%s3072_s1 + $0x218] sm:$0xff] }
  0x39   : >> { %864 = vmatpush.bf16.msrb.mxu3 %v2509_v60  ;;  %v2522_v60 = vld [vmem:[%s3072_s1 + $0x258] sm:$0xff] }
  0x3a   : >> { %597 = vmatpush.bf16.msrb.mxu0 %v2484_v61  ;;  %v2530_v61 = vld [vmem:[%s3072_s1 + $0x298] sm:$0xff] }
  0x3b   : >> { %688 = vmatpush.bf16.msrb.mxu1 %v2492_v62  ;;  %v2538_v62 = vld [vmem:[%s3072_s1 + $0x2d8] sm:$0xff] }
  0x3c   : >> { %773 = vmatpush.bf16.msrb.mxu2 %v2500_v63  ;;  %v979_v63 = vunpack.c.l.b16 %v2099_v57  ;;  %v2561_v57 = vld [vmem:[%s3072_s1 + $0x390] sm:$0xff] }
  0x3d   : >> { %865 = vmatpush.bf16.msrb.mxu3 %v2508_v0  ;;  %v1155_v0 = vunpack.c.l.b16 %v2197_v58  ;;  %v2569_v58 = vld [vmem:[%s3072_s1 + $0x3d0] sm:$0xff] }
  0x3e   : >> { %598 = vmatpush.bf16.msrb.mxu0 %v2483_v1  ;;  %v2513_v1 = vld [vmem:[%s3072_s1 + $0x210] sm:$0xff]  ;;  %v980_v6 = vpack.c.b16 %v979_v63, %v979_v63 }
  0x3f   : >> { %689 = vmatpush.bf16.msrb.mxu1 %v2491_v2  ;;  %v2521_v2 = vld [vmem:[%s3072_s1 + $0x250] sm:$0xff] }
  0x40   : >> { %774 = vmatpush.bf16.msrb.mxu2 %v2499_v3  ;;  %v2529_v3 = vld [vmem:[%s3072_s1 + $0x290] sm:$0xff] }
  0x41   : >> { %866 = vmatpush.bf16.msrb.mxu3 %v2507_v4  ;;  %v2537_v4 = vld [vmem:[%s3072_s1 + $0x2d0] sm:$0xff] }
  0x42   : >> { %599 = vmatpush.bf16.msrb.mxu0 %v2482_v7  ;;  %v1156_v7 = vpack.c.b16 %v1155_v0, %v1155_v0 }
  0x43   : >> { %690 = vmatpush.bf16.msrb.mxu1 %v2490_v8  ;;  %v2512_v8 = vld [vmem:[%s3072_s1 + $0x208] sm:$0xff] }
  0x44   : >> { %775 = vmatpush.bf16.msrb.mxu2 %v2498_v9  ;;  %v2520_v9 = vld [vmem:[%s3072_s1 + $0x248] sm:$0xff] }
  0x45   : >> { %867 = vmatpush.bf16.msrb.mxu3 %v2506_v10  ;;  %v1070_v10 = vunpack.c.l.b16 %v2148_v5 }
  0x46   : >> { %600 = vmatpush.bf16.msrb.mxu0 %v2481_v13  ;;  %v984_v13 = vshll.u32 %v980_v6, 16 }
  0x47   : >> { %691 = vmatpush.bf16.msrb.mxu1 %v2489_v14  ;;  %v1158_v14 = vshrl.u32 %v1156_v7, 16  ;;  %v1071_v18 = vpack.c.b16 %v1070_v10, %v1070_v10 }
  0x48   : >> { %776 = vmatpush.bf16.msrb.mxu2 %v2497_v15  ;;  %v1161_v15 = vshll.u32 %v1156_v7, 16  ;;  %v986_v22 = vrot.slane %v984_v13, 1  ;;  %v2551_v7 = vld [vmem:[%s3072_s1 + $0x340] sm:$0xff] }
  0x49   : >> { %868 = vmatpush.bf16.msrb.mxu3 %v2505_v16  ;;  %v2511_v16 = vld [vmem:[%s3072_s1 + $0x200] sm:$0xff] }
  0x4a   : >> { %601 = vmatpush.bf16.msrb.mxu0 %v2480_v20  ;;  %v2535_v20 = vld [vmem:[%s3072_s1 + $0x2c0] sm:$0xff] }
  0x4b   : >> { %692 = vmatpush.bf16.msrb.mxu1 %v2488_v21  ;;  %v982_v21 = vshrl.u32 %v980_v6, 16  ;;  %v2543_v6 = vld [vmem:[%s3072_s1 + $0x300] sm:$0xff] }
  0x4c   : >> { %777 = vmatpush.bf16.msrb.mxu2 %v2496_v23  ;;  %v1160_v23 = vrot.slane %v1158_v14, 1  ;;  %v2247_v14 = vld [vmem:[%s2717_s15 + $0xc] sm:$0x1] }
  0x4d   : >> { %869 = vmatpush.bf16.msrb.mxu3 %v2504_v24  ;;  %v1163_v24 = vrot.slane %v1161_v15, 2 }
  0x4e   : >> { %602 = vmatpush.bf16.msrb.mxu0 %v2479_v28  ;;  %v2574_v28 = vld [vmem:[%s3072_s1 + $0x3f8] sm:$0xff] }
  0x4f   : >> { %693 = vmatpush.bf16.msrb.mxu1 %v2487_v29  ;;  %v1072_v29 = vrot.slane %v1071_v18, 1 }
  0x50   : >> { %778 = vmatpush.bf16.msrb.mxu2 %v2495_v31  ;;  %v987_v31 = vor.u32 %v986_v22, %v982_v21 }
  0x51   : >> { %870 = vmatpush.bf16.msrb.mxu3 %v2503_v32  ;;  %603 = vmatmul.bf16.vlgmr.msrb.gmra.mxu0 %v1853_v42  ;;  %v1164_v32 = vor.u32 %v1163_v24, %v1160_v23  ;;  %v2555_v42 = vld [vmem:[%s3072_s1 + $0x360] sm:$0xff] }
  0x52   : >> { %946 = vmatpush.bf16.msra.mxu0 %v2518_v37  ;;  %694 = vmatmul.bf16.vlgmr.msrb.gmra.mxu1 %v636_v44  ;;  %v2548_v37 = vld [vmem:[%s3072_s1 + $0x328] sm:$0xff]  ;;  %v2563_v44 = vld [vmem:[%s3072_s1 + $0x3a0] sm:$0xff] }
  0x53   : >> { %1037 = vmatpush.bf16.msra.mxu1 %v2526_v38  ;;  %779 = vmatmul.bf16.vlgmr.msrb.gmra.mxu2 %v721_v41  ;;  %v2556_v38 = vld [vmem:[%s3072_s1 + $0x368] sm:$0xff]  ;;  %v2547_v41 = vld [vmem:[%s3072_s1 + $0x320] sm:$0xff] }
  0x54   : >> { %1122 = vmatpush.bf16.msra.mxu2 %v2534_v39  ;;  %871 = vmatmul.bf16.vlgmr.msrb.gmra.mxu3 %v813_v43  ;;  %v2564_v39 = vld [vmem:[%s3072_s1 + $0x3a8] sm:$0xff] }
  0x55   : >> { %1214 = vmatpush.bf16.msra.mxu3 %v2542_v40  ;;  %v2572_v40 = vld [vmem:[%s3072_s1 + $0x3e8] sm:$0xff] }
  0x56   : >> { %947 = vmatpush.bf16.msra.mxu0 %v2517_v45  ;;  %v2296_v43 = vld [vmem:[%s2717_s15 + $0xc] sm:$0x3]  ;;  %v2571_v45 = vld [vmem:[%s3072_s1 + $0x3e0] sm:$0xff] }
  0x57   : >> { %1038 = vmatpush.bf16.msra.mxu1 %v2525_v46  ;;  %v2394_v46 = vld [vmem:[%s2717_s15 + $0xc] sm:$0x6] }
  0x58   : >> { %1123 = vmatpush.bf16.msra.mxu2 %v2533_v47  ;;  %v1330_v47 = vunpack.c.l.b16 %v2296_v43 }
  0x59   : >> { %1215 = vmatpush.bf16.msra.mxu3 %v2541_v48  ;;  %v2546_v48 = vld [vmem:[%s3072_s1 + $0x318] sm:$0xff] }
  0x5a   : >> { %948 = vmatpush.bf16.msra.mxu0 %v2516_v49  ;;  %v2554_v49 = vld [vmem:[%s3072_s1 + $0x358] sm:$0xff] }
  0x5b   : >> { %1039 = vmatpush.bf16.msra.mxu1 %v2524_v50  ;;  %v1506_v50 = vunpack.c.l.b16 %v2394_v46 }
  0x5c   : >> { %1124 = vmatpush.bf16.msra.mxu2 %v2532_v51  ;;  %v2562_v51 = vld [vmem:[%s3072_s1 + $0x398] sm:$0xff] }
  0x5d   : >> { %1216 = vmatpush.bf16.msra.mxu3 %v2540_v52  ;;  %v2570_v52 = vld [vmem:[%s3072_s1 + $0x3d8] sm:$0xff] }
  0x5e   : >> { %949 = vmatpush.bf16.msra.mxu0 %v2515_v53  ;;  %v1331_v53 = vpack.c.b16 %v1330_v47, %v1330_v47 }
  0x5f   : >> { %1040 = vmatpush.bf16.msra.mxu1 %v2523_v54  ;;  %v2545_v54 = vld [vmem:[%s3072_s1 + $0x310] sm:$0xff] }
  0x60   : >> { %1125 = vmatpush.bf16.msra.mxu2 %v2531_v55  ;;  %v2553_v55 = vld [vmem:[%s3072_s1 + $0x350] sm:$0xff] }
  0x61   : >> { %1217 = vmatpush.bf16.msra.mxu3 %v2539_v56  ;;  %v1507_v56 = vpack.c.b16 %v1506_v50, %v1506_v50 }
  0x62   : >> { %950 = vmatpush.bf16.msra.mxu0 %v2514_v59  ;;  %v2345_v59 = vld [vmem:[%s2717_s15 + $0xc] sm:$0x2]  ;;  %s2443_s15 = sshll.u32 %s2607_s23, 1  ;;  %s178_s23 = sadd.s32 1, %s2607_s23  }
  0x63   : >> { %1041 = vmatpush.bf16.msra.mxu1 %v2522_v60  ;;  %v1335_v60 = vshll.u32 %v1331_v53, 16  ;;  %v1421_v63 = vunpack.c.l.b16 %v2345_v59  ;;  %v1509_v0 = vshrl.u32 %v1507_v56, 16  ;;  %s1580_s27 = scalar_lea.vmem [#allocation2], %s2443_s15  ;;  %p175_p4 = scmp.ge.s32.totalorder %s178_s23, 2  }
  0x64   : >> { %1126 = vmatpush.bf16.msra.mxu2 %v2530_v61  ;;  %v2544_v61 = vld [vmem:[%s3072_s1 + $0x308] sm:$0xff] }
  0x65   : >> { %1218 = vmatpush.bf16.msra.mxu3 %v2538_v62  ;;  %v2552_v62 = vld [vmem:[%s3072_s1 + $0x348] sm:$0xff]  ;;  %v1337_v5 = vrot.slane %v1335_v60, 1 }
  0x66   : >> { %951 = vmatpush.bf16.msra.mxu0 %v2513_v1  ;;  %v1512_v1 = vshll.u32 %v1507_v56, 16 }
  0x67   : >> { %1042 = vmatpush.bf16.msra.mxu1 %v2521_v2  ;;  %v2560_v2 = vld [vmem:[%s3072_s1 + $0x388] sm:$0xff] }
  0x68   : >> { %1127 = vmatpush.bf16.msra.mxu2 %v2529_v3  ;;  %v2568_v3 = vld [vmem:[%s3072_s1 + $0x3c8] sm:$0xff]  ;;  %v1514_v10 = vrot.slane %v1512_v1, 2  ;;  %v2592_v1 = vld [vmem:[#allocation3] ss:$0 sm:$0xff] (%p175_p4) }
  0x69   : >> { %1219 = vmatpush.bf16.msra.mxu3 %v2537_v4  ;;  %v1333_v4 = vshrl.u32 %v1331_v53, 16 }
  0x6a   : >> { %952 = vmatpush.bf16.msra.mxu0 %v2512_v8  ;;  %v1422_v8 = vpack.c.b16 %v1421_v63, %v1421_v63 }
  0x6b   : >> { %1043 = vmatpush.bf16.msra.mxu1 %v2520_v9  ;;  %v1511_v9 = vrot.slane %v1509_v0, 1  ;;  %v1338_v13 = vor.u32 %v1337_v5, %v1333_v4 }
  0x6c   : >> { %1128 = vmatpush.bf16.msra.mxu2 %v2528_v11  ;;  %v2559_v11 = vld [vmem:[%s3072_s1 + $0x380] sm:$0xff]  ;;  %v1423_v15 = vrot.slane %v1422_v8, 1 }
  0x6d   : >> { %1220 = vmatpush.bf16.msra.mxu3 %v2536_v12  ;;  %v2567_v12 = vld [vmem:[%s3072_s1 + $0x3c0] sm:$0xff] }
  0x6e   : >> { %953 = vmatpush.bf16.msra.mxu0 %v2511_v16  ;;  %v1515_v16 = vor.u32 %v1514_v10, %v1511_v9 }
  0x6f   : >> { %1044 = vmatpush.bf16.msra.mxu1 %v2519_v17 }
  0x70   : >> { %1129 = vmatpush.bf16.msra.mxu2 %v2527_v19 }
  0x71   : >> { %1221 = vmatpush.bf16.msra.mxu3 %v2535_v20  ;;  %954 = vmatmul.bf16.vlgmr.msra.gmra.mxu0 %v2050_v30 }
  0x72   : >> { %1297 = vmatpush.bf16.msrb.mxu0 %v2550_v25  ;;  %1045 = vmatmul.bf16.vlgmr.msra.gmra.mxu1 %v987_v31 }
  0x73   : >> { %1388 = vmatpush.bf16.msrb.mxu1 %v2558_v26  ;;  %1130 = vmatmul.bf16.vlgmr.msra.gmra.mxu2 %v1072_v29 }
  0x74   : >> { %1473 = vmatpush.bf16.msrb.mxu2 %v2566_v27  ;;  %1222 = vmatmul.bf16.vlgmr.msra.gmra.mxu3 %v1164_v32 }
  0x75   : >> { %1565 = vmatpush.bf16.msrb.mxu3 %v2574_v28 }
  0x76   : >> { %1298 = vmatpush.bf16.msrb.mxu0 %v2549_v33 }
  0x77   : >> { %1389 = vmatpush.bf16.msrb.mxu1 %v2557_v34 }
  0x78   : >> { %1474 = vmatpush.bf16.msrb.mxu2 %v2565_v35 }
  0x79   : >> { %1566 = vmatpush.bf16.msrb.mxu3 %v2573_v36 }
  0x7a   : >> { %1299 = vmatpush.bf16.msrb.mxu0 %v2548_v37 }
  0x7b   : >> { %1390 = vmatpush.bf16.msrb.mxu1 %v2556_v38 }
  0x7c   : >> { %1475 = vmatpush.bf16.msrb.mxu2 %v2564_v39 }
  0x7d   : >> { %1567 = vmatpush.bf16.msrb.mxu3 %v2572_v40 }
  0x7e   : >> { %1300 = vmatpush.bf16.msrb.mxu0 %v2547_v41 }
  0x7f   : >> { %1391 = vmatpush.bf16.msrb.mxu1 %v2555_v42 }
  0x80   : >> { %1476 = vmatpush.bf16.msrb.mxu2 %v2563_v44 }
  0x81   : >> { %1568 = vmatpush.bf16.msrb.mxu3 %v2571_v45 }
  0x82   : >> { %1301 = vmatpush.bf16.msrb.mxu0 %v2546_v48 }
  0x83   : >> { %1392 = vmatpush.bf16.msrb.mxu1 %v2554_v49 }
  0x84   : >> { %1477 = vmatpush.bf16.msrb.mxu2 %v2562_v51 }
  0x85   : >> { %1569 = vmatpush.bf16.msrb.mxu3 %v2570_v52 }
  0x86   : >> { %1302 = vmatpush.bf16.msrb.mxu0 %v2545_v54 }
  0x87   : >> { %1393 = vmatpush.bf16.msrb.mxu1 %v2553_v55 }
  0x88   : >> { %1478 = vmatpush.bf16.msrb.mxu2 %v2561_v57 }
  0x89   : >> { %1570 = vmatpush.bf16.msrb.mxu3 %v2569_v58 }
  0x8a   : >> { %1303 = vmatpush.bf16.msrb.mxu0 %v2544_v61 }
  0x8b   : >> { %1394 = vmatpush.bf16.msrb.mxu1 %v2552_v62 }
  0x8c   : >> { %1479 = vmatpush.bf16.msrb.mxu2 %v2560_v2 }
  0x8d   : >> { %1571 = vmatpush.bf16.msrb.mxu3 %v2568_v3 }
  0x8e   : >> { %1304 = vmatpush.bf16.msrb.mxu0 %v2543_v6 }
  0x8f   : >> { %1395 = vmatpush.bf16.msrb.mxu1 %v2551_v7 }
  0x90   : >> { %1480 = vmatpush.bf16.msrb.mxu2 %v2559_v11 }
  0x91   : >> { %1572 = vmatpush.bf16.msrb.mxu3 %v2567_v12  ;;  %1305 = vmatmul.bf16.vlgmr.msrb.gmra.mxu0 %v2247_v14 }
  0x92   : >> { %1396 = vmatmul.bf16.vlgmr.msrb.gmra.mxu1 %v1338_v13 }
  0x93   : >> { %1481 = vmatmul.bf16.vlgmr.msrb.gmra.mxu2 %v1423_v15 }
  0x94   : >> { %1573 = vmatmul.bf16.vlgmr.msrb.gmra.mxu3 %v1515_v16 }
  0xae   : >> { %v284_v17 = vpop.f32.mrf.mxu0 }
  0xaf   : >> { %v345_v18 = vpop.f32.mrf.mxu1 }
  0xb0   : >> { %v346_v19 = vadd.f32 %v345_v18, %v284_v17 }
  0xb6   : >> { %v429_v20 = vpop.f32.mrf.mxu2  ;;  %v286_v23 = vpop.f32.mrf.mxu0 }
  0xb7   : >> { %v433_v21 = vadd.f32 %v429_v20, %v346_v19  ;;  %v521_v22 = vpop.f32.mrf.mxu3  ;;  %v347_v25 = vpop.f32.mrf.mxu1 }
  0xb9   : >> { %v525_v24 = vadd.f32 %v521_v22, %v433_v21 }
  0xbe   : >> { %v431_v26 = vpop.f32.mrf.mxu2 }
  0xbf   : >> { %v523_v27 = vpop.f32.mrf.mxu3 }
  0xce   : >> { %v604_v28 = vpop.f32.mrf.mxu0 }
  0xcf   : >> { %v695_v29 = vpop.f32.mrf.mxu1  ;;  %v608_v38 = vadd.f32 %v604_v28, %v525_v24 }
  0xd1   : >> { %v699_v42 = vadd.f32 %v695_v29, %v608_v38 }
  0xd6   : >> { %v780_v30 = vpop.f32.mrf.mxu2  ;;  %v606_v32 = vpop.f32.mrf.mxu0 }
  0xd7   : >> { %v872_v31 = vpop.f32.mrf.mxu3  ;;  %v697_v33 = vpop.f32.mrf.mxu1  ;;  %v784_v44 = vadd.f32 %v780_v30, %v699_v42 }
  0xd9   : >> { %v876_v47 = vadd.f32 %v872_v31, %v784_v44 }
  0xde   : >> { %v782_v34 = vpop.f32.mrf.mxu2 }
  0xdf   : >> { %v874_v35 = vpop.f32.mrf.mxu3 }
  0xee   : >> { %v955_v36 = vpop.f32.mrf.mxu0 }
  0xef   : >> { %v1046_v37 = vpop.f32.mrf.mxu1  ;;  %v959_v48 = vadd.f32 %v955_v36, %v876_v47 }
  0xf1   : >> { %v1050_v49 = vadd.f32 %v1046_v37, %v959_v48 }
  0xf6   : >> { %v1131_v39 = vpop.f32.mrf.mxu2  ;;  %v957_v41 = vpop.f32.mrf.mxu0 }
  0xf7   : >> { %v1223_v40 = vpop.f32.mrf.mxu3  ;;  %v1048_v43 = vpop.f32.mrf.mxu1  ;;  %v1135_v50 = vadd.f32 %v1131_v39, %v1050_v49 }
  0xf9   : >> { %v1227_v51 = vadd.f32 %v1223_v40, %v1135_v50 }
  0xfe   : >> { %v1133_v45 = vpop.f32.mrf.mxu2 }
  0xff   : >> { %v1225_v46 = vpop.f32.mrf.mxu3 }
 0x10e   : >> { %v1306_v52 = vpop.f32.mrf.mxu0 }
 0x10f   : >> { %v1397_v53 = vpop.f32.mrf.mxu1  ;;  %v1310_v54 = vadd.f32 %v1306_v52, %v1227_v51 }
 0x111   : >> { %v1401_v55 = vadd.f32 %v1397_v53, %v1310_v54 }
 0x116   : >> { %v1482_v56 = vpop.f32.mrf.mxu2  ;;  %v1308_v59 = vpop.f32.mrf.mxu0 }
 0x117   : >> { %v1574_v57 = vpop.f32.mrf.mxu3  ;;  %v1486_v58 = vadd.f32 %v1482_v56, %v1401_v55  ;;  %v1399_v60 = vpop.f32.mrf.mxu1 }
 0x119   : >> { %v1578_v61 = vadd.f32 %v1574_v57, %v1486_v58 }
 0x11b   : >> { %1582 = vst.msk [vmem:[%s1580_s27] sm:$0x3] %vm1581_vm0, %v1578_v61  ;;  %177 = sbr.rel (!%p175_p4) target bundleno = 17 (0x11), region = 89 }
 0x11e   : >> { %v1484_v62 = vpop.f32.mrf.mxu2 }
 0x11f   : >> { %v1576_v63 = vpop.f32.mrf.mxu3 }
 0x122   : > { %v1583_v0 = vld [vmem:[#allocation2] sm:$0x3]  ;;  %v1584_v2 = vld [vmem:[#allocation2 + $0x2] sm:$0x3] }
 0x123   : > { %v1589_v3 = vadd.f32 %v2592_v1, %v1583_v0  ;;  %v1590_v4 = vadd.f32 %v2592_v1, %v1584_v2 }
 0x125   : > { %1592 = vst.msk [vmem:[%s2643_s19] sm:$0x3] %vm1581_vm0, %v1589_v3 }
 0x126   : > { %1593 = vst.msk [vmem:[%s2643_s19 + $0x2] sm:$0x3] %vm1581_vm0, %v1590_v4 }
 0x127 PF: > { %s15_s14 = sadd.s32 1, %s2603_s14  }
 0x128   : > { %p12_p5 = scmp.ge.s32.totalorder %s15_s14, 4  }
 0x12a   :  { %14 = sbr.rel (!%p12_p5) target bundleno = 3 (0x3), region = 100 }

</bundles_post_ra>
